<compile_context>
chip_gen: v7x
topology: tpu7x:2x2x1
jax: 0.10.0
libtpu: 0.0.40
codegen_flags: <defaults>
</compile_context>

<pallas_src>
import functools

import jax
import jax.numpy as jnp
from jax.experimental import pallas as pl
from jax.experimental.pallas import tpu as pltpu

# ---- module-consistent hyperparameters --------------------------------------
VOCAB_SIZE = 256               # stands in for len(RegexTokenizer().vocab)
N_EMBED    = 256               # n_embed
CTX_LEN    = 256               # ctx_len
NUM_HEADS  = 4                 # num_heads
HEAD_SIZE  = N_EMBED // NUM_HEADS
NUM_LAYERS = 6                 # num_layers
LN_EPS     = 1e-5              # torch.nn.LayerNorm default
NEG_INF    = -1e9              # finite mask constant (robust vs -inf)


def _layernorm(x, w, b, eps=LN_EPS):
    mu = jnp.mean(x, axis=-1, keepdims=True)
    var = jnp.mean((x - mu) ** 2, axis=-1, keepdims=True)
    return (x - mu) * jax.lax.rsqrt(var + eps) * w + b


# -----------------------------------------------------------------------------
# Fused Pallas kernel: grid = (batch_tiles, NUM_LAYERS)
#   per layer: x = x + MHA(LN1(x)); x = x + FFN(LN2(x))
#   at l == NUM_LAYERS-1: logits = LN_f(x) @ W_lm + b_lm
# -----------------------------------------------------------------------------
def gpt_kernel(x_ref, mask_ref,
               ln1w_ref, ln1b_ref,
               wq_ref, wk_ref, wv_ref, wproj_ref, bproj_ref,
               ln2w_ref, ln2b_ref,
               w1_ref, b1_ref, w2_ref, b2_ref,
               lnfw_ref, lnfb_ref, lmw_ref, lmb_ref,
               out_ref,
               x_scr):
    l = pl.program_id(1)

    # Load the activation into the resident VMEM accumulator on the first layer.
    @pl.when(l == 0)
    def _():
        x_scr[...] = x_ref[...]

    x = x_scr[...]                                   # (Bt, T, C) f32
    Bt, T, C = x.shape
    H, _, D = wq_ref.shape                           # (H, C, D)
    BT = Bt * T
    scale = D ** -0.5
    mask = mask_ref[...]                             # (T, T) additive, 0 / -1e9

    # ---- LN1 + multi-head causal self-attention --------------------------------
    h = _layernorm(x, ln1w_ref[...], ln1b_ref[...])
    hb = h.reshape(BT, C).astype(jnp.bfloat16)       # matmul operand (bf16)

    att = jnp.zeros((BT, C), jnp.float32)
    for hd in range(H):                              # static unroll, 4 heads
        qh = jnp.dot(hb, wq_ref[hd], preferred_element_type=jnp.float32)   # (BT, D)
        kh = jnp.dot(hb, wk_ref[hd], preferred_element_type=jnp.float32)
        vh = jnp.dot(hb, wv_ref[hd], preferred_element_type=jnp.float32)
        qh = qh.reshape(Bt, T, D)
        kh = kh.reshape(Bt, T, D)
        vh = vh.reshape(Bt, T, D)

        wei = jnp.einsum('bqd,bkd->bqk', qh.astype(jnp.bfloat16),
                         kh.astype(jnp.bfloat16),
                         preferred_element_type=jnp.float32) * scale
        wei = wei + mask[None, :, :]
        wei = wei - jnp.max(wei, axis=-1, keepdims=True)
        p = jnp.exp(wei)
        p = p * pl.reciprocal(jnp.sum(p, axis=-1, keepdims=True), approx=True)

        oh = jnp.einsum('bqk,bkd->bqd', p.astype(jnp.bfloat16),
                        vh.astype(jnp.bfloat16),
                        preferred_element_type=jnp.float32)                 # (Bt, T, D)
        # proj(concat_h oh) == sum_h oh @ Wproj_h  -> no lane concat, full-width acc
        att = att + jnp.dot(oh.reshape(BT, D).astype(jnp.bfloat16),
                            wproj_ref[hd], preferred_element_type=jnp.float32)
    att = att + bproj_ref[...]
    x = x + att.reshape(Bt, T, C)

    # ---- LN2 + FFN ---------------------------------------------------------------
    h2 = _layernorm(x, ln2w_ref[...], ln2b_ref[...]).reshape(BT, C).astype(jnp.bfloat16)
    ff = jnp.dot(h2, w1_ref[...], preferred_element_type=jnp.float32) + b1_ref[...]
    ff = jnp.maximum(ff, 0.0)
    ff = jnp.dot(ff.astype(jnp.bfloat16), w2_ref[...],
                 preferred_element_type=jnp.float32) + b2_ref[...]
    x = x + ff.reshape(Bt, T, C)

    x_scr[...] = x

    # ---- final LayerNorm + lm_head, fused into the last layer iteration ----------
    @pl.when(l == pl.num_programs(1) - 1)
    def _():
        hf = _layernorm(x, lnfw_ref[...], lnfb_ref[...]).reshape(BT, C)
        logits = jnp.dot(hf.astype(jnp.bfloat16), lmw_ref[...],
                         preferred_element_type=jnp.float32) + lmb_ref[...]
        out_ref[...] = logits.reshape(Bt, T, -1)


# -----------------------------------------------------------------------------
# Parameter construction (deterministic).  Matmul weights stored bf16, stacked
# along a leading layer axis (and a head axis for attention weights).
# -----------------------------------------------------------------------------
def init_params(key):
    def dense(k, shape, scale=0.02, dtype=jnp.bfloat16):
        return (scale * jax.random.normal(k, shape, dtype=jnp.float32)).astype(dtype)

    L, H, C, D = NUM_LAYERS, NUM_HEADS, N_EMBED, HEAD_SIZE
    F, V = 4 * N_EMBED, VOCAB_SIZE
    k = jax.random.split(key, 9)

    return {
        'tok_emb': dense(k[0], (V, C), dtype=jnp.float32),
        'pos_emb': dense(k[1], (CTX_LEN, C), dtype=jnp.float32),
        # per-block params, stacked along L (and per-head for attention)
        'ln1_w': jnp.ones((L, 1, C), jnp.float32),
        'ln1_b': jnp.zeros((L, 1, C), jnp.float32),
        'wq': dense(k[2], (L, H, C, D)),          # bias=False in module
        'wk': dense(k[3], (L, H, C, D)),
        'wv': dense(k[4], (L, H, C, D)),
        'wproj': dense(k[5], (L, H, D, C)),
        'bproj': jnp.zeros((L, 1, C), jnp.float32),
        'ln2_w': jnp.ones((L, 1, C), jnp.float32),
        'ln2_b': jnp.zeros((L, 1, C), jnp.float32),
        'w1': dense(k[6], (L, C, F)),
        'b1': jnp.zeros((L, 1, F), jnp.float32),
        'w2': dense(k[7], (L, F, C)),
        'b2': jnp.zeros((L, 1, C), jnp.float32),
        # final LN + lm_head
        'ln_f_w': jnp.ones((1, C), jnp.float32),
        'ln_f_b': jnp.zeros((1, C), jnp.float32),
        'lm_w': dense(k[8], (C, V)),
        'lm_b': jnp.zeros((1, V), jnp.float32),
    }


# -----------------------------------------------------------------------------
# Single fused pallas_call over all layers
# -----------------------------------------------------------------------------
def _gpt_stack_call(x_emb, mask, params, batch_tile):
    B, T, C = x_emb.shape
    L, H, D = NUM_LAYERS, NUM_HEADS, HEAD_SIZE
    F, V = 4 * C, VOCAB_SIZE
    assert B % batch_tile == 0
    grid = (B // batch_tile, L)

    def per_layer(shape):            # block follows the layer grid axis
        return pl.BlockSpec(shape, lambda b, l: (l,) + (0,) * (len(shape) - 1))

    def fixed(shape):                # same block every step -> stays VMEM-resident
        return pl.BlockSpec(shape, lambda b, l: (0,) * len(shape))

    in_specs = [
        pl.BlockSpec((batch_tile, T, C), lambda b, l: (b, 0, 0)),   # x (read at l==0)
        fixed((T, T)),                                              # additive causal mask
        per_layer((None, 1, C)), per_layer((None, 1, C)),           # ln1 w, b
        per_layer((None, H, C, D)),                                 # wq
        per_layer((None, H, C, D)),                                 # wk
        per_layer((None, H, C, D)),                                 # wv
        per_layer((None, H, D, C)), per_layer((None, 1, C)),        # wproj, bproj
        per_layer((None, 1, C)), per_layer((None, 1, C)),           # ln2 w, b
        per_layer((None, C, F)), per_layer((None, 1, F)),           # w1, b1
        per_layer((None, F, C)), per_layer((None, 1, C)),           # w2, b2
        fixed((1, C)), fixed((1, C)),                               # ln_f w, b
        fixed((C, V)), fixed((1, V)),                               # lm_w, lm_b
    ]
    out_specs = pl.BlockSpec((batch_tile, T, V), lambda b, l: (b, 0, 0))

    grid_spec = pltpu.PrefetchScalarGridSpec(
        num_scalar_prefetch=0,
        grid=grid,
        in_specs=in_specs,
        out_specs=out_specs,
        scratch_shapes=[pltpu.VMEM((batch_tile, T, C), jnp.float32)],  # resident activation
    )

    return pl.pallas_call(
        gpt_kernel,
        out_shape=jax.ShapeDtypeStruct((B, T, V), jnp.float32),
        grid_spec=grid_spec,
        compiler_params=pltpu.CompilerParams(
            dimension_semantics=("parallel", "arbitrary"),
            vmem_limit_bytes=32 * 1024 * 1024,
        ),
    )(x_emb, mask,
      params['ln1_w'], params['ln1_b'],
      params['wq'], params['wk'], params['wv'],
      params['wproj'], params['bproj'],
      params['ln2_w'], params['ln2_b'],
      params['w1'], params['b1'], params['w2'], params['b2'],
      params['ln_f_w'], params['ln_f_b'], params['lm_w'], params['lm_b'])


# -----------------------------------------------------------------------------
# Forward pass (embedding gather + fused kernel + optional loss glue)
# -----------------------------------------------------------------------------
@functools.partial(jax.jit, static_argnames=('with_targets', 'batch_tile'))
def gpt_forward(params, tokens, targets=None, with_targets=False, batch_tile=None):
    B, T = tokens.shape
    tok_embed = params['tok_emb'][tokens]                 # (B, T, C) gather (glue)
    pos_embed = params['pos_emb'][:T]                     # (T, C)
    x = (tok_embed + pos_embed[None, :, :]).astype(jnp.float32)

    # additive causal mask, computed once per trace (hoisted out of the kernel)
    row = jnp.arange(T, dtype=jnp.int32)[:, None]
    col = jnp.arange(T, dtype=jnp.int32)[None, :]
    mask = jnp.where(row >= col, 0.0, NEG_INF).astype(jnp.float32)

    # batch_tile < B shards the parallel batch axis across TensorCores (v7x) and
    # bounds VMEM when B/T are scaled up; default keeps the whole batch per tile
    # to maximize MXU rows (M = B*T).
    bt = B if batch_tile is None else batch_tile
    logits = _gpt_stack_call(x, mask, params, bt)         # (B, T, V)

    if not with_targets:
        return logits, None

    # cross-entropy glue, matches F.cross_entropy over B*T rows
    flat_logits = logits.reshape(B * T, VOCAB_SIZE)
    flat_targets = targets.reshape(B * T)
    logp = jax.nn.log_softmax(flat_logits, axis=-1)
    loss = -jnp.mean(jnp.take_along_axis(logp, flat_targets[:, None], axis=-1))
    return logits, loss


# -----------------------------------------------------------------------------
if __name__ == "__main__":
    key = jax.random.PRNGKey(0)
    pkey, tkey = jax.random.split(key)

    params = init_params(pkey)

    B, T = 2, 8
    tokens = jax.random.randint(tkey, (B, T), 0, VOCAB_SIZE, dtype=jnp.int32)

    logits, loss = gpt_forward(params, tokens)
    logits = jax.block_until_ready(logits)

    assert logits.shape == (B, T, VOCAB_SIZE)
    assert logits.dtype == jnp.float32
    assert bool(jnp.all(jnp.isfinite(logits)))
    print("KERNEL_OK")
</pallas_src>

<mosaic_0001>
module attributes {stable_mosaic.version = 11 : i64} {
  func.func @gpt_kernel(%arg0: i32, %arg1: i32, %arg2: memref<2x8x256xf32, #tpu.memory_space<vmem>>, %arg3: memref<8x8xf32, #tpu.memory_space<vmem>>, %arg4: memref<1x1x256xf32, #tpu.memory_space<vmem>>, %arg5: memref<1x1x256xf32, #tpu.memory_space<vmem>>, %arg6: memref<1x4x256x64xbf16, #tpu.memory_space<vmem>>, %arg7: memref<1x4x256x64xbf16, #tpu.memory_space<vmem>>, %arg8: memref<1x4x256x64xbf16, #tpu.memory_space<vmem>>, %arg9: memref<1x4x64x256xbf16, #tpu.memory_space<vmem>>, %arg10: memref<1x1x256xf32, #tpu.memory_space<vmem>>, %arg11: memref<1x1x256xf32, #tpu.memory_space<vmem>>, %arg12: memref<1x1x256xf32, #tpu.memory_space<vmem>>, %arg13: memref<1x256x1024xbf16, #tpu.memory_space<vmem>>, %arg14: memref<1x1x1024xf32, #tpu.memory_space<vmem>>, %arg15: memref<1x1024x256xbf16, #tpu.memory_space<vmem>>, %arg16: memref<1x1x256xf32, #tpu.memory_space<vmem>>, %arg17: memref<1x256xf32, #tpu.memory_space<vmem>>, %arg18: memref<1x256xf32, #tpu.memory_space<vmem>>, %arg19: memref<256x256xbf16, #tpu.memory_space<vmem>>, %arg20: memref<1x256xf32, #tpu.memory_space<vmem>>, %arg21: memref<2x8x256xf32, #tpu.memory_space<vmem>>, %arg22: memref<2x8x256xf32, #tpu.memory_space<vmem>>) attributes {dimension_semantics = [#tpu.dimension_semantics<parallel>, #tpu.dimension_semantics<arbitrary>], iteration_bounds = array<i64: 1, 6>, scalar_prefetch = 0 : i64, scratch_operands = 1 : i64, tpu.core_type = #tpu.core_type<tc>, window_params = [{transform_indices = @transform_0, window_bounds = array<i64: 2, 8, 256>}, {pipeline_mode = #tpu.pipeline_mode<synchronous>, transform_indices = @transform_1, window_bounds = array<i64: 8, 8>}, {transform_indices = @transform_2, window_bounds = array<i64: 1, 1, 256>}, {transform_indices = @transform_3, window_bounds = array<i64: 1, 1, 256>}, {transform_indices = @transform_4, window_bounds = array<i64: 1, 4, 256, 64>}, {transform_indices = @transform_5, window_bounds = array<i64: 1, 4, 256, 64>}, {transform_indices = @transform_6, window_bounds = array<i64: 1, 4, 256, 64>}, {transform_indices = @transform_7, window_bounds = array<i64: 1, 4, 64, 256>}, {transform_indices = @transform_8, window_bounds = array<i64: 1, 1, 256>}, {transform_indices = @transform_9, window_bounds = array<i64: 1, 1, 256>}, {transform_indices = @transform_10, window_bounds = array<i64: 1, 1, 256>}, {transform_indices = @transform_11, window_bounds = array<i64: 1, 256, 1024>}, {transform_indices = @transform_12, window_bounds = array<i64: 1, 1, 1024>}, {transform_indices = @transform_13, window_bounds = array<i64: 1, 1024, 256>}, {transform_indices = @transform_14, window_bounds = array<i64: 1, 1, 256>}, {pipeline_mode = #tpu.pipeline_mode<synchronous>, transform_indices = @transform_15, window_bounds = array<i64: 1, 256>}, {pipeline_mode = #tpu.pipeline_mode<synchronous>, transform_indices = @transform_16, window_bounds = array<i64: 1, 256>}, {pipeline_mode = #tpu.pipeline_mode<synchronous>, transform_indices = @transform_17, window_bounds = array<i64: 256, 256>}, {pipeline_mode = #tpu.pipeline_mode<synchronous>, transform_indices = @transform_18, window_bounds = array<i64: 1, 256>}, {transform_indices = @transform_19, window_bounds = array<i64: 2, 8, 256>}]} {
    %c0_i32 = arith.constant 0 : i32
    %0 = arith.cmpi eq, %arg1, %c0_i32 : i32
    %1 = arith.extui %0 : i1 to i32
    %c0_i32_0 = arith.constant 0 : i32
    %2 = arith.cmpi ne, %1, %c0_i32_0 : i32
    scf.if %2 {
      %c0_146 = arith.constant 0 : index
      %c0_147 = arith.constant 0 : index
      %c0_148 = arith.constant 0 : index
      %251 = vector.load %arg2[%c0_146, %c0_147, %c0_148] : memref<2x8x256xf32, #tpu.memory_space<vmem>>, vector<2x8x256xf32>
      %c0_149 = arith.constant 0 : index
      %c0_150 = arith.constant 0 : index
      %c0_151 = arith.constant 0 : index
      %252 = vector.load %arg22[%c0_149, %c0_150, %c0_151] : memref<2x8x256xf32, #tpu.memory_space<vmem>>, vector<2x8x256xf32>
      tpu.vector_store %arg22[%c0_149, %c0_150, %c0_151], %251 {strides = array<i32>} : memref<2x8x256xf32, #tpu.memory_space<vmem>>, vector<2x8x256xf32>,
    } else {
    }
    %c0 = arith.constant 0 : index
    %c0_1 = arith.constant 0 : index
    %c0_2 = arith.constant 0 : index
    %3 = vector.load %arg22[%c0, %c0_1, %c0_2] : memref<2x8x256xf32, #tpu.memory_space<vmem>>, vector<2x8x256xf32>
    %c0_3 = arith.constant 0 : index
    %c0_4 = arith.constant 0 : index
    %4 = vector.load %arg3[%c0_3, %c0_4] : memref<8x8xf32, #tpu.memory_space<vmem>>, vector<8x8xf32>
    %c0_5 = arith.constant 0 : index
    %c0_6 = arith.constant 0 : index
    %c0_7 = arith.constant 0 : index
    %5 = vector.load %arg4[%c0_5, %c0_6, %c0_7] : memref<1x1x256xf32, #tpu.memory_space<vmem>>, vector<1x1x256xf32>
    %6 = vector.shape_cast %5 : vector<1x1x256xf32> to vector<1x256xf32>
    %c0_8 = arith.constant 0 : index
    %c0_9 = arith.constant 0 : index
    %c0_10 = arith.constant 0 : index
    %7 = vector.load %arg5[%c0_8, %c0_9, %c0_10] : memref<1x1x256xf32, #tpu.memory_space<vmem>>, vector<1x1x256xf32>
    %8 = vector.shape_cast %7 : vector<1x1x256xf32> to vector<1x256xf32>
    %cst = arith.constant dense<0.000000e+00> : vector<2x8xf32>
    %9 = vector.multi_reduction <add>, %3, %cst [2] : vector<2x8x256xf32> to vector<2x8xf32>
    %10 = vector.shape_cast %9 : vector<2x8xf32> to vector<2x8x1xf32>
    %cst_11 = arith.constant 2.560000e+02 : f32
    %11 = vector.broadcast %cst_11 : f32 to vector<2x8x1xf32>
    %12 = arith.divf %10, %11 : vector<2x8x1xf32>
    %13 = vector.broadcast %12 : vector<2x8x1xf32> to vector<2x8x256xf32>
    %14 = arith.subf %3, %13 : vector<2x8x256xf32>
    %15 = arith.mulf %14, %14 : vector<2x8x256xf32>
    %cst_12 = arith.constant dense<0.000000e+00> : vector<2x8xf32>
    %16 = vector.multi_reduction <add>, %15, %cst_12 [2] : vector<2x8x256xf32> to vector<2x8xf32>
    %17 = vector.shape_cast %16 : vector<2x8xf32> to vector<2x8x1xf32>
    %cst_13 = arith.constant 2.560000e+02 : f32
    %18 = vector.broadcast %cst_13 : f32 to vector<2x8x1xf32>
    %19 = arith.divf %17, %18 : vector<2x8x1xf32>
    %20 = vector.broadcast %12 : vector<2x8x1xf32> to vector<2x8x256xf32>
    %21 = arith.subf %3, %20 : vector<2x8x256xf32>
    %cst_14 = arith.constant 9.99999974E-6 : f32
    %22 = vector.broadcast %cst_14 : f32 to vector<2x8x1xf32>
    %23 = arith.addf %19, %22 : vector<2x8x1xf32>
    %24 = math.rsqrt %23 : vector<2x8x1xf32>
    %25 = vector.broadcast %24 : vector<2x8x1xf32> to vector<2x8x256xf32>
    %26 = arith.mulf %21, %25 : vector<2x8x256xf32>
    %27 = vector.shape_cast %6 : vector<1x256xf32> to vector<1x1x256xf32>
    %28 = vector.broadcast %27 : vector<1x1x256xf32> to vector<2x8x256xf32>
    %29 = arith.mulf %26, %28 : vector<2x8x256xf32>
    %30 = vector.shape_cast %8 : vector<1x256xf32> to vector<1x1x256xf32>
    %31 = vector.broadcast %30 : vector<1x1x256xf32> to vector<2x8x256xf32>
    %32 = arith.addf %29, %31 : vector<2x8x256xf32>
    %33 = vector.shape_cast %32 : vector<2x8x256xf32> to vector<16x256xf32>
    %34 = arith.truncf %33 : vector<16x256xf32> to vector<16x256xbf16>
    %cst_15 = arith.constant 0.000000e+00 : f32
    %35 = vector.broadcast %cst_15 : f32 to vector<16x256xf32>
    %c0_16 = arith.constant 0 : index
    %c0_17 = arith.constant 0 : index
    %c0_18 = arith.constant 0 : index
    %c0_19 = arith.constant 0 : index
    %36 = vector.load %arg6[%c0_16, %c0_17, %c0_18, %c0_19] : memref<1x4x256x64xbf16, #tpu.memory_space<vmem>>, vector<1x1x256x64xbf16>
    %37 = vector.shape_cast %36 : vector<1x1x256x64xbf16> to vector<256x64xbf16>
    %cst_20 = arith.constant dense<0.000000e+00> : vector<16x64xf32>
    %38 = tpu.matmul %34, %37, %cst_20 {dimension_numbers = #tpu.dot_dimension_numbers<[1], [0], [0], [1], [0, 0, 1, 1], [], []>} : vector<16x256xbf16>, vector<256x64xbf16>, vector<16x64xf32> -> vector<16x64xf32>
    %c0_21 = arith.constant 0 : index
    %c0_22 = arith.constant 0 : index
    %c0_23 = arith.constant 0 : index
    %c0_24 = arith.constant 0 : index
    %39 = vector.load %arg7[%c0_21, %c0_22, %c0_23, %c0_24] : memref<1x4x256x64xbf16, #tpu.memory_space<vmem>>, vector<1x1x256x64xbf16>
    %40 = vector.shape_cast %39 : vector<1x1x256x64xbf16> to vector<256x64xbf16>
    %cst_25 = arith.constant dense<0.000000e+00> : vector<16x64xf32>
    %41 = tpu.matmul %34, %40, %cst_25 {dimension_numbers = #tpu.dot_dimension_numbers<[1], [0], [0], [1], [0, 0, 1, 1], [], []>} : vector<16x256xbf16>, vector<256x64xbf16>, vector<16x64xf32> -> vector<16x64xf32>
    %c0_26 = arith.constant 0 : index
    %c0_27 = arith.constant 0 : index
    %c0_28 = arith.constant 0 : index
    %c0_29 = arith.constant 0 : index
    %42 = vector.load %arg8[%c0_26, %c0_27, %c0_28, %c0_29] : memref<1x4x256x64xbf16, #tpu.memory_space<vmem>>, vector<1x1x256x64xbf16>
    %43 = vector.shape_cast %42 : vector<1x1x256x64xbf16> to vector<256x64xbf16>
    %cst_30 = arith.constant dense<0.000000e+00> : vector<16x64xf32>
    %44 = tpu.matmul %34, %43, %cst_30 {dimension_numbers = #tpu.dot_dimension_numbers<[1], [0], [0], [1], [0, 0, 1, 1], [], []>} : vector<16x256xbf16>, vector<256x64xbf16>, vector<16x64xf32> -> vector<16x64xf32>
    %45 = vector.shape_cast %38 : vector<16x64xf32> to vector<2x8x64xf32>
    %46 = vector.shape_cast %41 : vector<16x64xf32> to vector<2x8x64xf32>
    %47 = vector.shape_cast %44 : vector<16x64xf32> to vector<2x8x64xf32>
    %48 = arith.truncf %45 : vector<2x8x64xf32> to vector<2x8x64xbf16>
    %49 = arith.truncf %46 : vector<2x8x64xf32> to vector<2x8x64xbf16>
    "tpu.trace_start"() <{level = 10 : i32, message = "bqd,bkd->bqk"}> : () -> ()
    %cst_31 = arith.constant dense<0.000000e+00> : vector<2x8x8xf32>
    %50 = tpu.matmul %48, %49, %cst_31 {dimension_numbers = #tpu.dot_dimension_numbers<[2], [2], [1], [1], [0, 0, 0, 1, 1, 1], [0], [0]>} : vector<2x8x64xbf16>, vector<2x8x64xbf16>, vector<2x8x8xf32> -> vector<2x8x8xf32>
    "tpu.trace_stop"() : () -> ()
    %cst_32 = arith.constant 1.250000e-01 : f32
    %51 = vector.broadcast %cst_32 : f32 to vector<2x8x8xf32>
    %52 = arith.mulf %50, %51 : vector<2x8x8xf32>
    %53 = vector.shape_cast %4 : vector<8x8xf32> to vector<1x8x8xf32>
    %54 = vector.broadcast %53 : vector<1x8x8xf32> to vector<2x8x8xf32>
    %55 = arith.addf %52, %54 : vector<2x8x8xf32>
    %cst_33 = arith.constant dense<0xFF800000> : vector<2x8xf32>
    %56 = vector.multi_reduction <maximumf>, %55, %cst_33 [2] : vector<2x8x8xf32> to vector<2x8xf32>
    %57 = vector.shape_cast %56 : vector<2x8xf32> to vector<2x8x1xf32>
    %58 = vector.broadcast %57 : vector<2x8x1xf32> to vector<2x8x8xf32>
    %59 = arith.subf %55, %58 : vector<2x8x8xf32>
    %60 = math.exp %59 : vector<2x8x8xf32>
    %cst_34 = arith.constant dense<0.000000e+00> : vector<2x8xf32>
    %61 = vector.multi_reduction <add>, %60, %cst_34 [2] : vector<2x8x8xf32> to vector<2x8xf32>
    %62 = vector.shape_cast %61 : vector<2x8xf32> to vector<2x8x1xf32>
    %63 = tpu.reciprocal %62 {approx = true} : vector<2x8x1xf32> -> vector<2x8x1xf32>
    %64 = vector.broadcast %63 : vector<2x8x1xf32> to vector<2x8x8xf32>
    %65 = arith.mulf %60, %64 : vector<2x8x8xf32>
    %66 = arith.truncf %65 : vector<2x8x8xf32> to vector<2x8x8xbf16>
    %67 = arith.truncf %47 : vector<2x8x64xf32> to vector<2x8x64xbf16>
    "tpu.trace_start"() <{level = 10 : i32, message = "bqk,bkd->bqd"}> : () -> ()
    %cst_35 = arith.constant dense<0.000000e+00> : vector<2x8x64xf32>
    %68 = tpu.matmul %66, %67, %cst_35 {dimension_numbers = #tpu.dot_dimension_numbers<[2], [1], [1], [2], [0, 0, 0, 1, 1, 2], [0], [0]>} : vector<2x8x8xbf16>, vector<2x8x64xbf16>, vector<2x8x64xf32> -> vector<2x8x64xf32>
    "tpu.trace_stop"() : () -> ()
    %69 = vector.shape_cast %68 : vector<2x8x64xf32> to vector<16x64xf32>
    %70 = arith.truncf %69 : vector<16x64xf32> to vector<16x64xbf16>
    %c0_36 = arith.constant 0 : index
    %c0_37 = arith.constant 0 : index
    %c0_38 = arith.constant 0 : index
    %c0_39 = arith.constant 0 : index
    %71 = vector.load %arg9[%c0_36, %c0_37, %c0_38, %c0_39] : memref<1x4x64x256xbf16, #tpu.memory_space<vmem>>, vector<1x1x64x256xbf16>
    %72 = vector.shape_cast %71 : vector<1x1x64x256xbf16> to vector<64x256xbf16>
    %cst_40 = arith.constant dense<0.000000e+00> : vector<16x256xf32>
    %73 = tpu.matmul %70, %72, %cst_40 {dimension_numbers = #tpu.dot_dimension_numbers<[1], [0], [0], [1], [0, 0, 1, 1], [], []>} : vector<16x64xbf16>, vector<64x256xbf16>, vector<16x256xf32> -> vector<16x256xf32>
    %74 = arith.addf %35, %73 : vector<16x256xf32>
    %c0_41 = arith.constant 0 : index
    %c1 = arith.constant 1 : index
    %c0_42 = arith.constant 0 : index
    %c0_43 = arith.constant 0 : index
    %75 = vector.load %arg6[%c0_41, %c1, %c0_42, %c0_43] : memref<1x4x256x64xbf16, #tpu.memory_space<vmem>>, vector<1x1x256x64xbf16>
    %76 = vector.shape_cast %75 : vector<1x1x256x64xbf16> to vector<256x64xbf16>
    %cst_44 = arith.constant dense<0.000000e+00> : vector<16x64xf32>
    %77 = tpu.matmul %34, %76, %cst_44 {dimension_numbers = #tpu.dot_dimension_numbers<[1], [0], [0], [1], [0, 0, 1, 1], [], []>} : vector<16x256xbf16>, vector<256x64xbf16>, vector<16x64xf32> -> vector<16x64xf32>
    %c0_45 = arith.constant 0 : index
    %c1_46 = arith.constant 1 : index
    %c0_47 = arith.constant 0 : index
    %c0_48 = arith.constant 0 : index
    %78 = vector.load %arg7[%c0_45, %c1_46, %c0_47, %c0_48] : memref<1x4x256x64xbf16, #tpu.memory_space<vmem>>, vector<1x1x256x64xbf16>
    %79 = vector.shape_cast %78 : vector<1x1x256x64xbf16> to vector<256x64xbf16>
    %cst_49 = arith.constant dense<0.000000e+00> : vector<16x64xf32>
    %80 = tpu.matmul %34, %79, %cst_49 {dimension_numbers = #tpu.dot_dimension_numbers<[1], [0], [0], [1], [0, 0, 1, 1], [], []>} : vector<16x256xbf16>, vector<256x64xbf16>, vector<16x64xf32> -> vector<16x64xf32>
    %c0_50 = arith.constant 0 : index
    %c1_51 = arith.constant 1 : index
    %c0_52 = arith.constant 0 : index
    %c0_53 = arith.constant 0 : index
    %81 = vector.load %arg8[%c0_50, %c1_51, %c0_52, %c0_53] : memref<1x4x256x64xbf16, #tpu.memory_space<vmem>>, vector<1x1x256x64xbf16>
    %82 = vector.shape_cast %81 : vector<1x1x256x64xbf16> to vector<256x64xbf16>
    %cst_54 = arith.constant dense<0.000000e+00> : vector<16x64xf32>
    %83 = tpu.matmul %34, %82, %cst_54 {dimension_numbers = #tpu.dot_dimension_numbers<[1], [0], [0], [1], [0, 0, 1, 1], [], []>} : vector<16x256xbf16>, vector<256x64xbf16>, vector<16x64xf32> -> vector<16x64xf32>
    %84 = vector.shape_cast %77 : vector<16x64xf32> to vector<2x8x64xf32>
    %85 = vector.shape_cast %80 : vector<16x64xf32> to vector<2x8x64xf32>
    %86 = vector.shape_cast %83 : vector<16x64xf32> to vector<2x8x64xf32>
    %87 = arith.truncf %84 : vector<2x8x64xf32> to vector<2x8x64xbf16>
    %88 = arith.truncf %85 : vector<2x8x64xf32> to vector<2x8x64xbf16>
    "tpu.trace_start"() <{level = 10 : i32, message = "bqd,bkd->bqk"}> : () -> ()
    %cst_55 = arith.constant dense<0.000000e+00> : vector<2x8x8xf32>
    %89 = tpu.matmul %87, %88, %cst_55 {dimension_numbers = #tpu.dot_dimension_numbers<[2], [2], [1], [1], [0, 0, 0, 1, 1, 1], [0], [0]>} : vector<2x8x64xbf16>, vector<2x8x64xbf16>, vector<2x8x8xf32> -> vector<2x8x8xf32>
    "tpu.trace_stop"() : () -> ()
    %cst_56 = arith.constant 1.250000e-01 : f32
    %90 = vector.broadcast %cst_56 : f32 to vector<2x8x8xf32>
    %91 = arith.mulf %89, %90 : vector<2x8x8xf32>
    %92 = vector.shape_cast %4 : vector<8x8xf32> to vector<1x8x8xf32>
    %93 = vector.broadcast %92 : vector<1x8x8xf32> to vector<2x8x8xf32>
    %94 = arith.addf %91, %93 : vector<2x8x8xf32>
    %cst_57 = arith.constant dense<0xFF800000> : vector<2x8xf32>
    %95 = vector.multi_reduction <maximumf>, %94, %cst_57 [2] : vector<2x8x8xf32> to vector<2x8xf32>
    %96 = vector.shape_cast %95 : vector<2x8xf32> to vector<2x8x1xf32>
    %97 = vector.broadcast %96 : vector<2x8x1xf32> to vector<2x8x8xf32>
    %98 = arith.subf %94, %97 : vector<2x8x8xf32>
    %99 = math.exp %98 : vector<2x8x8xf32>
    %cst_58 = arith.constant dense<0.000000e+00> : vector<2x8xf32>
    %100 = vector.multi_reduction <add>, %99, %cst_58 [2] : vector<2x8x8xf32> to vector<2x8xf32>
    %101 = vector.shape_cast %100 : vector<2x8xf32> to vector<2x8x1xf32>
    %102 = tpu.reciprocal %101 {approx = true} : vector<2x8x1xf32> -> vector<2x8x1xf32>
    %103 = vector.broadcast %102 : vector<2x8x1xf32> to vector<2x8x8xf32>
    %104 = arith.mulf %99, %103 : vector<2x8x8xf32>
    %105 = arith.truncf %104 : vector<2x8x8xf32> to vector<2x8x8xbf16>
    %106 = arith.truncf %86 : vector<2x8x64xf32> to vector<2x8x64xbf16>
    "tpu.trace_start"() <{level = 10 : i32, message = "bqk,bkd->bqd"}> : () -> ()
    %cst_59 = arith.constant dense<0.000000e+00> : vector<2x8x64xf32>
    %107 = tpu.matmul %105, %106, %cst_59 {dimension_numbers = #tpu.dot_dimension_numbers<[2], [1], [1], [2], [0, 0, 0, 1, 1, 2], [0], [0]>} : vector<2x8x8xbf16>, vector<2x8x64xbf16>, vector<2x8x64xf32> -> vector<2x8x64xf32>
    "tpu.trace_stop"() : () -> ()
    %108 = vector.shape_cast %107 : vector<2x8x64xf32> to vector<16x64xf32>
    %109 = arith.truncf %108 : vector<16x64xf32> to vector<16x64xbf16>
    %c0_60 = arith.constant 0 : index
    %c1_61 = arith.constant 1 : index
    %c0_62 = arith.constant 0 : index
    %c0_63 = arith.constant 0 : index
    %110 = vector.load %arg9[%c0_60, %c1_61, %c0_62, %c0_63] : memref<1x4x64x256xbf16, #tpu.memory_space<vmem>>, vector<1x1x64x256xbf16>
    %111 = vector.shape_cast %110 : vector<1x1x64x256xbf16> to vector<64x256xbf16>
    %cst_64 = arith.constant dense<0.000000e+00> : vector<16x256xf32>
    %112 = tpu.matmul %109, %111, %cst_64 {dimension_numbers = #tpu.dot_dimension_numbers<[1], [0], [0], [1], [0, 0, 1, 1], [], []>} : vector<16x64xbf16>, vector<64x256xbf16>, vector<16x256xf32> -> vector<16x256xf32>
    %113 = arith.addf %74, %112 : vector<16x256xf32>
    %c0_65 = arith.constant 0 : index
    %c2 = arith.constant 2 : index
    %c0_66 = arith.constant 0 : index
    %c0_67 = arith.constant 0 : index
    %114 = vector.load %arg6[%c0_65, %c2, %c0_66, %c0_67] : memref<1x4x256x64xbf16, #tpu.memory_space<vmem>>, vector<1x1x256x64xbf16>
    %115 = vector.shape_cast %114 : vector<1x1x256x64xbf16> to vector<256x64xbf16>
    %cst_68 = arith.constant dense<0.000000e+00> : vector<16x64xf32>
    %116 = tpu.matmul %34, %115, %cst_68 {dimension_numbers = #tpu.dot_dimension_numbers<[1], [0], [0], [1], [0, 0, 1, 1], [], []>} : vector<16x256xbf16>, vector<256x64xbf16>, vector<16x64xf32> -> vector<16x64xf32>
    %c0_69 = arith.constant 0 : index
    %c2_70 = arith.constant 2 : index
    %c0_71 = arith.constant 0 : index
    %c0_72 = arith.constant 0 : index
    %117 = vector.load %arg7[%c0_69, %c2_70, %c0_71, %c0_72] : memref<1x4x256x64xbf16, #tpu.memory_space<vmem>>, vector<1x1x256x64xbf16>
    %118 = vector.shape_cast %117 : vector<1x1x256x64xbf16> to vector<256x64xbf16>
    %cst_73 = arith.constant dense<0.000000e+00> : vector<16x64xf32>
    %119 = tpu.matmul %34, %118, %cst_73 {dimension_numbers = #tpu.dot_dimension_numbers<[1], [0], [0], [1], [0, 0, 1, 1], [], []>} : vector<16x256xbf16>, vector<256x64xbf16>, vector<16x64xf32> -> vector<16x64xf32>
    %c0_74 = arith.constant 0 : index
    %c2_75 = arith.constant 2 : index
    %c0_76 = arith.constant 0 : index
    %c0_77 = arith.constant 0 : index
    %120 = vector.load %arg8[%c0_74, %c2_75, %c0_76, %c0_77] : memref<1x4x256x64xbf16, #tpu.memory_space<vmem>>, vector<1x1x256x64xbf16>
    %121 = vector.shape_cast %120 : vector<1x1x256x64xbf16> to vector<256x64xbf16>
    %cst_78 = arith.constant dense<0.000000e+00> : vector<16x64xf32>
    %122 = tpu.matmul %34, %121, %cst_78 {dimension_numbers = #tpu.dot_dimension_numbers<[1], [0], [0], [1], [0, 0, 1, 1], [], []>} : vector<16x256xbf16>, vector<256x64xbf16>, vector<16x64xf32> -> vector<16x64xf32>
    %123 = vector.shape_cast %116 : vector<16x64xf32> to vector<2x8x64xf32>
    %124 = vector.shape_cast %119 : vector<16x64xf32> to vector<2x8x64xf32>
    %125 = vector.shape_cast %122 : vector<16x64xf32> to vector<2x8x64xf32>
    %126 = arith.truncf %123 : vector<2x8x64xf32> to vector<2x8x64xbf16>
    %127 = arith.truncf %124 : vector<2x8x64xf32> to vector<2x8x64xbf16>
    "tpu.trace_start"() <{level = 10 : i32, message = "bqd,bkd->bqk"}> : () -> ()
    %cst_79 = arith.constant dense<0.000000e+00> : vector<2x8x8xf32>
    %128 = tpu.matmul %126, %127, %cst_79 {dimension_numbers = #tpu.dot_dimension_numbers<[2], [2], [1], [1], [0, 0, 0, 1, 1, 1], [0], [0]>} : vector<2x8x64xbf16>, vector<2x8x64xbf16>, vector<2x8x8xf32> -> vector<2x8x8xf32>
    "tpu.trace_stop"() : () -> ()
    %cst_80 = arith.constant 1.250000e-01 : f32
    %129 = vector.broadcast %cst_80 : f32 to vector<2x8x8xf32>
    %130 = arith.mulf %128, %129 : vector<2x8x8xf32>
    %131 = vector.shape_cast %4 : vector<8x8xf32> to vector<1x8x8xf32>
    %132 = vector.broadcast %131 : vector<1x8x8xf32> to vector<2x8x8xf32>
    %133 = arith.addf %130, %132 : vector<2x8x8xf32>
    %cst_81 = arith.constant dense<0xFF800000> : vector<2x8xf32>
    %134 = vector.multi_reduction <maximumf>, %133, %cst_81 [2] : vector<2x8x8xf32> to vector<2x8xf32>
    %135 = vector.shape_cast %134 : vector<2x8xf32> to vector<2x8x1xf32>
    %136 = vector.broadcast %135 : vector<2x8x1xf32> to vector<2x8x8xf32>
    %137 = arith.subf %133, %136 : vector<2x8x8xf32>
    %138 = math.exp %137 : vector<2x8x8xf32>
    %cst_82 = arith.constant dense<0.000000e+00> : vector<2x8xf32>
    %139 = vector.multi_reduction <add>, %138, %cst_82 [2] : vector<2x8x8xf32> to vector<2x8xf32>
    %140 = vector.shape_cast %139 : vector<2x8xf32> to vector<2x8x1xf32>
    %141 = tpu.reciprocal %140 {approx = true} : vector<2x8x1xf32> -> vector<2x8x1xf32>
    %142 = vector.broadcast %141 : vector<2x8x1xf32> to vector<2x8x8xf32>
    %143 = arith.mulf %138, %142 : vector<2x8x8xf32>
    %144 = arith.truncf %143 : vector<2x8x8xf32> to vector<2x8x8xbf16>
    %145 = arith.truncf %125 : vector<2x8x64xf32> to vector<2x8x64xbf16>
    "tpu.trace_start"() <{level = 10 : i32, message = "bqk,bkd->bqd"}> : () -> ()
    %cst_83 = arith.constant dense<0.000000e+00> : vector<2x8x64xf32>
    %146 = tpu.matmul %144, %145, %cst_83 {dimension_numbers = #tpu.dot_dimension_numbers<[2], [1], [1], [2], [0, 0, 0, 1, 1, 2], [0], [0]>} : vector<2x8x8xbf16>, vector<2x8x64xbf16>, vector<2x8x64xf32> -> vector<2x8x64xf32>
    "tpu.trace_stop"() : () -> ()
    %147 = vector.shape_cast %146 : vector<2x8x64xf32> to vector<16x64xf32>
    %148 = arith.truncf %147 : vector<16x64xf32> to vector<16x64xbf16>
    %c0_84 = arith.constant 0 : index
    %c2_85 = arith.constant 2 : index
    %c0_86 = arith.constant 0 : index
    %c0_87 = arith.constant 0 : index
    %149 = vector.load %arg9[%c0_84, %c2_85, %c0_86, %c0_87] : memref<1x4x64x256xbf16, #tpu.memory_space<vmem>>, vector<1x1x64x256xbf16>
    %150 = vector.shape_cast %149 : vector<1x1x64x256xbf16> to vector<64x256xbf16>
    %cst_88 = arith.constant dense<0.000000e+00> : vector<16x256xf32>
    %151 = tpu.matmul %148, %150, %cst_88 {dimension_numbers = #tpu.dot_dimension_numbers<[1], [0], [0], [1], [0, 0, 1, 1], [], []>} : vector<16x64xbf16>, vector<64x256xbf16>, vector<16x256xf32> -> vector<16x256xf32>
    %152 = arith.addf %113, %151 : vector<16x256xf32>
    %c0_89 = arith.constant 0 : index
    %c3 = arith.constant 3 : index
    %c0_90 = arith.constant 0 : index
    %c0_91 = arith.constant 0 : index
    %153 = vector.load %arg6[%c0_89, %c3, %c0_90, %c0_91] : memref<1x4x256x64xbf16, #tpu.memory_space<vmem>>, vector<1x1x256x64xbf16>
    %154 = vector.shape_cast %153 : vector<1x1x256x64xbf16> to vector<256x64xbf16>
    %cst_92 = arith.constant dense<0.000000e+00> : vector<16x64xf32>
    %155 = tpu.matmul %34, %154, %cst_92 {dimension_numbers = #tpu.dot_dimension_numbers<[1], [0], [0], [1], [0, 0, 1, 1], [], []>} : vector<16x256xbf16>, vector<256x64xbf16>, vector<16x64xf32> -> vector<16x64xf32>
    %c0_93 = arith.constant 0 : index
    %c3_94 = arith.constant 3 : index
    %c0_95 = arith.constant 0 : index
    %c0_96 = arith.constant 0 : index
    %156 = vector.load %arg7[%c0_93, %c3_94, %c0_95, %c0_96] : memref<1x4x256x64xbf16, #tpu.memory_space<vmem>>, vector<1x1x256x64xbf16>
    %157 = vector.shape_cast %156 : vector<1x1x256x64xbf16> to vector<256x64xbf16>
    %cst_97 = arith.constant dense<0.000000e+00> : vector<16x64xf32>
    %158 = tpu.matmul %34, %157, %cst_97 {dimension_numbers = #tpu.dot_dimension_numbers<[1], [0], [0], [1], [0, 0, 1, 1], [], []>} : vector<16x256xbf16>, vector<256x64xbf16>, vector<16x64xf32> -> vector<16x64xf32>
    %c0_98 = arith.constant 0 : index
    %c3_99 = arith.constant 3 : index
    %c0_100 = arith.constant 0 : index
    %c0_101 = arith.constant 0 : index
    %159 = vector.load %arg8[%c0_98, %c3_99, %c0_100, %c0_101] : memref<1x4x256x64xbf16, #tpu.memory_space<vmem>>, vector<1x1x256x64xbf16>
    %160 = vector.shape_cast %159 : vector<1x1x256x64xbf16> to vector<256x64xbf16>
    %cst_102 = arith.constant dense<0.000000e+00> : vector<16x64xf32>
    %161 = tpu.matmul %34, %160, %cst_102 {dimension_numbers = #tpu.dot_dimension_numbers<[1], [0], [0], [1], [0, 0, 1, 1], [], []>} : vector<16x256xbf16>, vector<256x64xbf16>, vector<16x64xf32> -> vector<16x64xf32>
    %162 = vector.shape_cast %155 : vector<16x64xf32> to vector<2x8x64xf32>
    %163 = vector.shape_cast %158 : vector<16x64xf32> to vector<2x8x64xf32>
    %164 = vector.shape_cast %161 : vector<16x64xf32> to vector<2x8x64xf32>
    %165 = arith.truncf %162 : vector<2x8x64xf32> to vector<2x8x64xbf16>
    %166 = arith.truncf %163 : vector<2x8x64xf32> to vector<2x8x64xbf16>
    "tpu.trace_start"() <{level = 10 : i32, message = "bqd,bkd->bqk"}> : () -> ()
    %cst_103 = arith.constant dense<0.000000e+00> : vector<2x8x8xf32>
    %167 = tpu.matmul %165, %166, %cst_103 {dimension_numbers = #tpu.dot_dimension_numbers<[2], [2], [1], [1], [0, 0, 0, 1, 1, 1], [0], [0]>} : vector<2x8x64xbf16>, vector<2x8x64xbf16>, vector<2x8x8xf32> -> vector<2x8x8xf32>
    "tpu.trace_stop"() : () -> ()
    %cst_104 = arith.constant 1.250000e-01 : f32
    %168 = vector.broadcast %cst_104 : f32 to vector<2x8x8xf32>
    %169 = arith.mulf %167, %168 : vector<2x8x8xf32>
    %170 = vector.shape_cast %4 : vector<8x8xf32> to vector<1x8x8xf32>
    %171 = vector.broadcast %170 : vector<1x8x8xf32> to vector<2x8x8xf32>
    %172 = arith.addf %169, %171 : vector<2x8x8xf32>
    %cst_105 = arith.constant dense<0xFF800000> : vector<2x8xf32>
    %173 = vector.multi_reduction <maximumf>, %172, %cst_105 [2] : vector<2x8x8xf32> to vector<2x8xf32>
    %174 = vector.shape_cast %173 : vector<2x8xf32> to vector<2x8x1xf32>
    %175 = vector.broadcast %174 : vector<2x8x1xf32> to vector<2x8x8xf32>
    %176 = arith.subf %172, %175 : vector<2x8x8xf32>
    %177 = math.exp %176 : vector<2x8x8xf32>
    %cst_106 = arith.constant dense<0.000000e+00> : vector<2x8xf32>
    %178 = vector.multi_reduction <add>, %177, %cst_106 [2] : vector<2x8x8xf32> to vector<2x8xf32>
    %179 = vector.shape_cast %178 : vector<2x8xf32> to vector<2x8x1xf32>
    %180 = tpu.reciprocal %179 {approx = true} : vector<2x8x1xf32> -> vector<2x8x1xf32>
    %181 = vector.broadcast %180 : vector<2x8x1xf32> to vector<2x8x8xf32>
    %182 = arith.mulf %177, %181 : vector<2x8x8xf32>
    %183 = arith.truncf %182 : vector<2x8x8xf32> to vector<2x8x8xbf16>
    %184 = arith.truncf %164 : vector<2x8x64xf32> to vector<2x8x64xbf16>
    "tpu.trace_start"() <{level = 10 : i32, message = "bqk,bkd->bqd"}> : () -> ()
    %cst_107 = arith.constant dense<0.000000e+00> : vector<2x8x64xf32>
    %185 = tpu.matmul %183, %184, %cst_107 {dimension_numbers = #tpu.dot_dimension_numbers<[2], [1], [1], [2], [0, 0, 0, 1, 1, 2], [0], [0]>} : vector<2x8x8xbf16>, vector<2x8x64xbf16>, vector<2x8x64xf32> -> vector<2x8x64xf32>
    "tpu.trace_stop"() : () -> ()
    %186 = vector.shape_cast %185 : vector<2x8x64xf32> to vector<16x64xf32>
    %187 = arith.truncf %186 : vector<16x64xf32> to vector<16x64xbf16>
    %c0_108 = arith.constant 0 : index
    %c3_109 = arith.constant 3 : index
    %c0_110 = arith.constant 0 : index
    %c0_111 = arith.constant 0 : index
    %188 = vector.load %arg9[%c0_108, %c3_109, %c0_110, %c0_111] : memref<1x4x64x256xbf16, #tpu.memory_space<vmem>>, vector<1x1x64x256xbf16>
    %189 = vector.shape_cast %188 : vector<1x1x64x256xbf16> to vector<64x256xbf16>
    %cst_112 = arith.constant dense<0.000000e+00> : vector<16x256xf32>
    %190 = tpu.matmul %187, %189, %cst_112 {dimension_numbers = #tpu.dot_dimension_numbers<[1], [0], [0], [1], [0, 0, 1, 1], [], []>} : vector<16x64xbf16>, vector<64x256xbf16>, vector<16x256xf32> -> vector<16x256xf32>
    %191 = arith.addf %152, %190 : vector<16x256xf32>
    %c0_113 = arith.constant 0 : index
    %c0_114 = arith.constant 0 : index
    %c0_115 = arith.constant 0 : index
    %192 = vector.load %arg10[%c0_113, %c0_114, %c0_115] : memref<1x1x256xf32, #tpu.memory_space<vmem>>, vector<1x1x256xf32>
    %193 = vector.shape_cast %192 : vector<1x1x256xf32> to vector<1x256xf32>
    %194 = vector.broadcast %193 : vector<1x256xf32> to vector<16x256xf32>
    %195 = arith.addf %191, %194 : vector<16x256xf32>
    %196 = vector.shape_cast %195 : vector<16x256xf32> to vector<2x8x256xf32>
    %197 = arith.addf %3, %196 : vector<2x8x256xf32>
    %c0_116 = arith.constant 0 : index
    %c0_117 = arith.constant 0 : index
    %c0_118 = arith.constant 0 : index
    %198 = vector.load %arg11[%c0_116, %c0_117, %c0_118] : memref<1x1x256xf32, #tpu.memory_space<vmem>>, vector<1x1x256xf32>
    %199 = vector.shape_cast %198 : vector<1x1x256xf32> to vector<1x256xf32>
    %c0_119 = arith.constant 0 : index
    %c0_120 = arith.constant 0 : index
    %c0_121 = arith.constant 0 : index
    %200 = vector.load %arg12[%c0_119, %c0_120, %c0_121] : memref<1x1x256xf32, #tpu.memory_space<vmem>>, vector<1x1x256xf32>
    %201 = vector.shape_cast %200 : vector<1x1x256xf32> to vector<1x256xf32>
    %cst_122 = arith.constant dense<0.000000e+00> : vector<2x8xf32>
    %202 = vector.multi_reduction <add>, %197, %cst_122 [2] : vector<2x8x256xf32> to vector<2x8xf32>
    %203 = vector.shape_cast %202 : vector<2x8xf32> to vector<2x8x1xf32>
    %cst_123 = arith.constant 2.560000e+02 : f32
    %204 = vector.broadcast %cst_123 : f32 to vector<2x8x1xf32>
    %205 = arith.divf %203, %204 : vector<2x8x1xf32>
    %206 = vector.broadcast %205 : vector<2x8x1xf32> to vector<2x8x256xf32>
    %207 = arith.subf %197, %206 : vector<2x8x256xf32>
    %208 = arith.mulf %207, %207 : vector<2x8x256xf32>
    %cst_124 = arith.constant dense<0.000000e+00> : vector<2x8xf32>
    %209 = vector.multi_reduction <add>, %208, %cst_124 [2] : vector<2x8x256xf32> to vector<2x8xf32>
    %210 = vector.shape_cast %209 : vector<2x8xf32> to vector<2x8x1xf32>
    %cst_125 = arith.constant 2.560000e+02 : f32
    %211 = vector.broadcast %cst_125 : f32 to vector<2x8x1xf32>
    %212 = arith.divf %210, %211 : vector<2x8x1xf32>
    %213 = vector.broadcast %205 : vector<2x8x1xf32> to vector<2x8x256xf32>
    %214 = arith.subf %197, %213 : vector<2x8x256xf32>
    %cst_126 = arith.constant 9.99999974E-6 : f32
    %215 = vector.broadcast %cst_126 : f32 to vector<2x8x1xf32>
    %216 = arith.addf %212, %215 : vector<2x8x1xf32>
    %217 = math.rsqrt %216 : vector<2x8x1xf32>
    %218 = vector.broadcast %217 : vector<2x8x1xf32> to vector<2x8x256xf32>
    %219 = arith.mulf %214, %218 : vector<2x8x256xf32>
    %220 = vector.shape_cast %199 : vector<1x256xf32> to vector<1x1x256xf32>
    %221 = vector.broadcast %220 : vector<1x1x256xf32> to vector<2x8x256xf32>
    %222 = arith.mulf %219, %221 : vector<2x8x256xf32>
    %223 = vector.shape_cast %201 : vector<1x256xf32> to vector<1x1x256xf32>
    %224 = vector.broadcast %223 : vector<1x1x256xf32> to vector<2x8x256xf32>
    %225 = arith.addf %222, %224 : vector<2x8x256xf32>
    %226 = vector.shape_cast %225 : vector<2x8x256xf32> to vector<16x256xf32>
    %227 = arith.truncf %226 : vector<16x256xf32> to vector<16x256xbf16>
    %c0_127 = arith.constant 0 : index
    %c0_128 = arith.constant 0 : index
    %c0_129 = arith.constant 0 : index
    %228 = vector.load %arg13[%c0_127, %c0_128, %c0_129] : memref<1x256x1024xbf16, #tpu.memory_space<vmem>>, vector<1x256x1024xbf16>
    %229 = vector.shape_cast %228 : vector<1x256x1024xbf16> to vector<256x1024xbf16>
    %cst_130 = arith.constant dense<0.000000e+00> : vector<16x1024xf32>
    %230 = tpu.matmul %227, %229, %cst_130 {dimension_numbers = #tpu.dot_dimension_numbers<[1], [0], [0], [1], [0, 0, 1, 1], [], []>} : vector<16x256xbf16>, vector<256x1024xbf16>, vector<16x1024xf32> -> vector<16x1024xf32>
    %c0_131 = arith.constant 0 : index
    %c0_132 = arith.constant 0 : index
    %c0_133 = arith.constant 0 : index
    %231 = vector.load %arg14[%c0_131, %c0_132, %c0_133] : memref<1x1x1024xf32, #tpu.memory_space<vmem>>, vector<1x1x1024xf32>
    %232 = vector.shape_cast %231 : vector<1x1x1024xf32> to vector<1x1024xf32>
    %233 = vector.broadcast %232 : vector<1x1024xf32> to vector<16x1024xf32>
    %234 = arith.addf %230, %233 : vector<16x1024xf32>
    %cst_134 = arith.constant 0.000000e+00 : f32
    %235 = vector.broadcast %cst_134 : f32 to vector<16x1024xf32>
    %236 = arith.maximumf %234, %235 : vector<16x1024xf32>
    %237 = arith.truncf %236 : vector<16x1024xf32> to vector<16x1024xbf16>
    %c0_135 = arith.constant 0 : index
    %c0_136 = arith.constant 0 : index
    %c0_137 = arith.constant 0 : index
    %238 = vector.load %arg15[%c0_135, %c0_136, %c0_137] : memref<1x1024x256xbf16, #tpu.memory_space<vmem>>, vector<1x1024x256xbf16>
    %239 = vector.shape_cast %238 : vector<1x1024x256xbf16> to vector<1024x256xbf16>
    %cst_138 = arith.constant dense<0.000000e+00> : vector<16x256xf32>
    %240 = tpu.matmul %237, %239, %cst_138 {dimension_numbers = #tpu.dot_dimension_numbers<[1], [0], [0], [1], [0, 0, 1, 1], [], []>} : vector<16x1024xbf16>, vector<1024x256xbf16>, vector<16x256xf32> -> vector<16x256xf32>
    %c0_139 = arith.constant 0 : index
    %c0_140 = arith.constant 0 : index
    %c0_141 = arith.constant 0 : index
    %241 = vector.load %arg16[%c0_139, %c0_140, %c0_141] : memref<1x1x256xf32, #tpu.memory_space<vmem>>, vector<1x1x256xf32>
    %242 = vector.shape_cast %241 : vector<1x1x256xf32> to vector<1x256xf32>
    %243 = vector.broadcast %242 : vector<1x256xf32> to vector<16x256xf32>
    %244 = arith.addf %240, %243 : vector<16x256xf32>
    %245 = vector.shape_cast %244 : vector<16x256xf32> to vector<2x8x256xf32>
    %246 = arith.addf %197, %245 : vector<2x8x256xf32>
    %c0_142 = arith.constant 0 : index
    %c0_143 = arith.constant 0 : index
    %c0_144 = arith.constant 0 : index
    %247 = vector.load %arg22[%c0_142, %c0_143, %c0_144] : memref<2x8x256xf32, #tpu.memory_space<vmem>>, vector<2x8x256xf32>
    tpu.vector_store %arg22[%c0_142, %c0_143, %c0_144], %246 {strides = array<i32>} : memref<2x8x256xf32, #tpu.memory_space<vmem>>, vector<2x8x256xf32>,
    %c5_i32 = arith.constant 5 : i32
    %248 = arith.cmpi eq, %arg1, %c5_i32 : i32
    %249 = arith.extui %248 : i1 to i32
    %c0_i32_145 = arith.constant 0 : i32
    %250 = arith.cmpi ne, %249, %c0_i32_145 : i32
    scf.if %250 {
      %c0_146 = arith.constant 0 : index
      %c0_147 = arith.constant 0 : index
      %251 = vector.load %arg17[%c0_146, %c0_147] : memref<1x256xf32, #tpu.memory_space<vmem>>, vector<1x256xf32>
      %c0_148 = arith.constant 0 : index
      %c0_149 = arith.constant 0 : index
      %252 = vector.load %arg18[%c0_148, %c0_149] : memref<1x256xf32, #tpu.memory_space<vmem>>, vector<1x256xf32>
      %cst_150 = arith.constant dense<0.000000e+00> : vector<2x8xf32>
      %253 = vector.multi_reduction <add>, %246, %cst_150 [2] : vector<2x8x256xf32> to vector<2x8xf32>
      %254 = vector.shape_cast %253 : vector<2x8xf32> to vector<2x8x1xf32>
      %cst_151 = arith.constant 2.560000e+02 : f32
      %255 = vector.broadcast %cst_151 : f32 to vector<2x8x1xf32>
      %256 = arith.divf %254, %255 : vector<2x8x1xf32>
      %257 = vector.broadcast %256 : vector<2x8x1xf32> to vector<2x8x256xf32>
      %258 = arith.subf %246, %257 : vector<2x8x256xf32>
      %259 = arith.mulf %258, %258 : vector<2x8x256xf32>
      %cst_152 = arith.constant dense<0.000000e+00> : vector<2x8xf32>
      %260 = vector.multi_reduction <add>, %259, %cst_152 [2] : vector<2x8x256xf32> to vector<2x8xf32>
      %261 = vector.shape_cast %260 : vector<2x8xf32> to vector<2x8x1xf32>
      %cst_153 = arith.constant 2.560000e+02 : f32
      %262 = vector.broadcast %cst_153 : f32 to vector<2x8x1xf32>
      %263 = arith.divf %261, %262 : vector<2x8x1xf32>
      %264 = vector.broadcast %256 : vector<2x8x1xf32> to vector<2x8x256xf32>
      %265 = arith.subf %246, %264 : vector<2x8x256xf32>
      %cst_154 = arith.constant 9.99999974E-6 : f32
      %266 = vector.broadcast %cst_154 : f32 to vector<2x8x1xf32>
      %267 = arith.addf %263, %266 : vector<2x8x1xf32>
      %268 = math.rsqrt %267 : vector<2x8x1xf32>
      %269 = vector.broadcast %268 : vector<2x8x1xf32> to vector<2x8x256xf32>
      %270 = arith.mulf %265, %269 : vector<2x8x256xf32>
      %271 = vector.shape_cast %251 : vector<1x256xf32> to vector<1x1x256xf32>
      %272 = vector.broadcast %271 : vector<1x1x256xf32> to vector<2x8x256xf32>
      %273 = arith.mulf %270, %272 : vector<2x8x256xf32>
      %274 = vector.shape_cast %252 : vector<1x256xf32> to vector<1x1x256xf32>
      %275 = vector.broadcast %274 : vector<1x1x256xf32> to vector<2x8x256xf32>
      %276 = arith.addf %273, %275 : vector<2x8x256xf32>
      %277 = vector.shape_cast %276 : vector<2x8x256xf32> to vector<16x256xf32>
      %278 = arith.truncf %277 : vector<16x256xf32> to vector<16x256xbf16>
      %c0_155 = arith.constant 0 : index
      %c0_156 = arith.constant 0 : index
      %279 = vector.load %arg19[%c0_155, %c0_156] : memref<256x256xbf16, #tpu.memory_space<vmem>>, vector<256x256xbf16>
      %cst_157 = arith.constant dense<0.000000e+00> : vector<16x256xf32>
      %280 = tpu.matmul %278, %279, %cst_157 {dimension_numbers = #tpu.dot_dimension_numbers<[1], [0], [0], [1], [0, 0, 1, 1], [], []>} : vector<16x256xbf16>, vector<256x256xbf16>, vector<16x256xf32> -> vector<16x256xf32>
      %c0_158 = arith.constant 0 : index
      %c0_159 = arith.constant 0 : index
      %281 = vector.load %arg20[%c0_158, %c0_159] : memref<1x256xf32, #tpu.memory_space<vmem>>, vector<1x256xf32>
      %282 = vector.broadcast %281 : vector<1x256xf32> to vector<16x256xf32>
      %283 = arith.addf %280, %282 : vector<16x256xf32>
      %284 = vector.shape_cast %283 : vector<16x256xf32> to vector<2x8x256xf32>
      %c0_160 = arith.constant 0 : index
      %c0_161 = arith.constant 0 : index
      %c0_162 = arith.constant 0 : index
      %285 = vector.load %arg21[%c0_160, %c0_161, %c0_162] : memref<2x8x256xf32, #tpu.memory_space<vmem>>, vector<2x8x256xf32>
      tpu.vector_store %arg21[%c0_160, %c0_161, %c0_162], %284 {strides = array<i32>} : memref<2x8x256xf32, #tpu.memory_space<vmem>>, vector<2x8x256xf32>,
    } else {
    }
    return
  }
  func.func @transform_0(%arg0: i32, %arg1: i32) -> (i32, i32, i32) {
    %c0_i32 = arith.constant 0 : i32
    %c0_i32_0 = arith.constant 0 : i32
    %c0_i32_1 = arith.constant 0 : i32
    return %arg0, %c0_i32, %c0_i32_0 : i32, i32, i32
  }
  func.func @transform_1(%arg0: i32, %arg1: i32) -> (i32, i32) {
    %c0_i32 = arith.constant 0 : i32
    %c0_i32_0 = arith.constant 0 : i32
    %c0_i32_1 = arith.constant 0 : i32
    return %c0_i32, %c0_i32_0 : i32, i32
  }
  func.func @transform_2(%arg0: i32, %arg1: i32) -> (i32, i32, i32) {
    %c0_i32 = arith.constant 0 : i32
    %c0_i32_0 = arith.constant 0 : i32
    %c0_i32_1 = arith.constant 0 : i32
    return %arg1, %c0_i32, %c0_i32_0 : i32, i32, i32
  }
  func.func @transform_3(%arg0: i32, %arg1: i32) -> (i32, i32, i32) {
    %c0_i32 = arith.constant 0 : i32
    %c0_i32_0 = arith.constant 0 : i32
    %c0_i32_1 = arith.constant 0 : i32
    return %arg1, %c0_i32, %c0_i32_0 : i32, i32, i32
  }
  func.func @transform_4(%arg0: i32, %arg1: i32) -> (i32, i32, i32, i32) {
    %c0_i32 = arith.constant 0 : i32
    %c0_i32_0 = arith.constant 0 : i32
    %c0_i32_1 = arith.constant 0 : i32
    %c0_i32_2 = arith.constant 0 : i32
    return %arg1, %c0_i32, %c0_i32_0, %c0_i32_1 : i32, i32, i32, i32
  }
  func.func @transform_5(%arg0: i32, %arg1: i32) -> (i32, i32, i32, i32) {
    %c0_i32 = arith.constant 0 : i32
    %c0_i32_0 = arith.constant 0 : i32
    %c0_i32_1 = arith.constant 0 : i32
    %c0_i32_2 = arith.constant 0 : i32
    return %arg1, %c0_i32, %c0_i32_0, %c0_i32_1 : i32, i32, i32, i32
  }
  func.func @transform_6(%arg0: i32, %arg1: i32) -> (i32, i32, i32, i32) {
    %c0_i32 = arith.constant 0 : i32
    %c0_i32_0 = arith.constant 0 : i32
    %c0_i32_1 = arith.constant 0 : i32
    %c0_i32_2 = arith.constant 0 : i32
    return %arg1, %c0_i32, %c0_i32_0, %c0_i32_1 : i32, i32, i32, i32
  }
  func.func @transform_7(%arg0: i32, %arg1: i32) -> (i32, i32, i32, i32) {
    %c0_i32 = arith.constant 0 : i32
    %c0_i32_0 = arith.constant 0 : i32
    %c0_i32_1 = arith.constant 0 : i32
    %c0_i32_2 = arith.constant 0 : i32
    return %arg1, %c0_i32, %c0_i32_0, %c0_i32_1 : i32, i32, i32, i32
  }
  func.func @transform_8(%arg0: i32, %arg1: i32) -> (i32, i32, i32) {
    %c0_i32 = arith.constant 0 : i32
    %c0_i32_0 = arith.constant 0 : i32
    %c0_i32_1 = arith.constant 0 : i32
    return %arg1, %c0_i32, %c0_i32_0 : i32, i32, i32
  }
  func.func @transform_9(%arg0: i32, %arg1: i32) -> (i32, i32, i32) {
    %c0_i32 = arith.constant 0 : i32
    %c0_i32_0 = arith.constant 0 : i32
    %c0_i32_1 = arith.constant 0 : i32
    return %arg1, %c0_i32, %c0_i32_0 : i32, i32, i32
  }
  func.func @transform_10(%arg0: i32, %arg1: i32) -> (i32, i32, i32) {
    %c0_i32 = arith.constant 0 : i32
    %c0_i32_0 = arith.constant 0 : i32
    %c0_i32_1 = arith.constant 0 : i32
    return %arg1, %c0_i32, %c0_i32_0 : i32, i32, i32
  }
  func.func @transform_11(%arg0: i32, %arg1: i32) -> (i32, i32, i32) {
    %c0_i32 = arith.constant 0 : i32
    %c0_i32_0 = arith.constant 0 : i32
    %c0_i32_1 = arith.constant 0 : i32
    return %arg1, %c0_i32, %c0_i32_0 : i32, i32, i32
  }
  func.func @transform_12(%arg0: i32, %arg1: i32) -> (i32, i32, i32) {
    %c0_i32 = arith.constant 0 : i32
    %c0_i32_0 = arith.constant 0 : i32
    %c0_i32_1 = arith.constant 0 : i32
    return %arg1, %c0_i32, %c0_i32_0 : i32, i32, i32
  }
  func.func @transform_13(%arg0: i32, %arg1: i32) -> (i32, i32, i32) {
    %c0_i32 = arith.constant 0 : i32
    %c0_i32_0 = arith.constant 0 : i32
    %c0_i32_1 = arith.constant 0 : i32
    return %arg1, %c0_i32, %c0_i32_0 : i32, i32, i32
  }
  func.func @transform_14(%arg0: i32, %arg1: i32) -> (i32, i32, i32) {
    %c0_i32 = arith.constant 0 : i32
    %c0_i32_0 = arith.constant 0 : i32
    %c0_i32_1 = arith.constant 0 : i32
    return %arg1, %c0_i32, %c0_i32_0 : i32, i32, i32
  }
  func.func @transform_15(%arg0: i32, %arg1: i32) -> (i32, i32) {
    %c0_i32 = arith.constant 0 : i32
    %c0_i32_0 = arith.constant 0 : i32
    %c0_i32_1 = arith.constant 0 : i32
    return %c0_i32, %c0_i32_0 : i32, i32
  }
  func.func @transform_16(%arg0: i32, %arg1: i32) -> (i32, i32) {
    %c0_i32 = arith.constant 0 : i32
    %c0_i32_0 = arith.constant 0 : i32
    %c0_i32_1 = arith.constant 0 : i32
    return %c0_i32, %c0_i32_0 : i32, i32
  }
  func.func @transform_17(%arg0: i32, %arg1: i32) -> (i32, i32) {
    %c0_i32 = arith.constant 0 : i32
    %c0_i32_0 = arith.constant 0 : i32
    %c0_i32_1 = arith.constant 0 : i32
    return %c0_i32, %c0_i32_0 : i32, i32
  }
  func.func @transform_18(%arg0: i32, %arg1: i32) -> (i32, i32) {
    %c0_i32 = arith.constant 0 : i32
    %c0_i32_0 = arith.constant 0 : i32
    %c0_i32_1 = arith.constant 0 : i32
    return %c0_i32, %c0_i32_0 : i32, i32
  }
  func.func @transform_19(%arg0: i32, %arg1: i32) -> (i32, i32, i32) {
    %c0_i32 = arith.constant 0 : i32
    %c0_i32_0 = arith.constant 0 : i32
    %c0_i32_1 = arith.constant 0 : i32
    return %arg0, %c0_i32, %c0_i32_0 : i32, i32, i32
  }
}

</mosaic_0001>

<bundles_post_ra>
// kernel: gpt_forward.1
= control target key start
LH: loop header
LB: loop body
LE: loop exit
PB: predicated region body
PF: predicated region fallthrough
CT: control target
= control target key end

     0   :  { %s10112_s0 = inlined_call_operand.vmem [shape: f32[2,8,256], index: 0, kind: input, shape index: {}]   ;;  %s10113_s1 = inlined_call_operand.vmem [shape: f32[8,8], index: 1, kind: input, shape index: {}]   ;;  %s10114_s2 = inlined_call_operand.vmem [shape: f32[6,1,256], index: 2, kind: input, shape index: {}]   ;;  %s10115_s3 = inlined_call_operand.vmem [shape: f32[6,1,256], index: 3, kind: input, shape index: {}]   ;;  %s10116_s4 = inlined_call_operand.vmem [shape: bf16[6,4,256,64], index: 4, kind: input, shape index: {}]   ;;  %s10117_s5 = inlined_call_operand.vmem [shape: bf16[6,4,256,64], index: 5, kind: input, shape index: {}]   ;;  %s10118_s6 = inlined_call_operand.vmem [shape: bf16[6,4,256,64], index: 6, kind: input, shape index: {}]   ;;  %s10119_s7 = inlined_call_operand.hbm [shape: bf16[6,4,64,256], index: 7, kind: input, shape index: {}]   ;;  %s10120_s8 = inlined_call_operand.vmem [shape: f32[6,1,256], index: 8, kind: input, shape index: {}]   ;;  %s10121_s9 = inlined_call_operand.vmem [shape: f32[6,1,256], index: 9, kind: input, shape index: {}]   ;;  %s10122_s10 = inlined_call_operand.vmem [shape: f32[6,1,256], index: 10, kind: input, shape index: {}]   ;;  %s10123_s11 = inlined_call_operand.vmem [shape: bf16[6,256,1024], index: 11, kind: input, shape index: {}]   ;;  %s10124_s12 = inlined_call_operand.vmem [shape: f32[6,1,1024], index: 12, kind: input, shape index: {}]   ;;  %s10125_s13 = inlined_call_operand.vmem [shape: bf16[6,1024,256], index: 13, kind: input, shape index: {}]   ;;  %s10126_s14 = inlined_call_operand.vmem [shape: f32[6,1,256], index: 14, kind: input, shape index: {}]   ;;  %s10127_s15 = inlined_call_operand.vmem [shape: f32[1,256], index: 15, kind: input, shape index: {}]   ;;  %s10128_s16 = inlined_call_operand.vmem [shape: f32[1,256], index: 16, kind: input, shape index: {}]   ;;  %s10129_s17 = inlined_call_operand.vmem [shape: bf16[256,256], index: 17, kind: input, shape index: {}]   ;;  %s10130_s18 = inlined_call_operand.vmem [shape: f32[1,256], index: 18, kind: input, shape index: {}]   ;;  %s10131_s19 = inlined_call_operand.hbm [shape: f32[2,8,256], index: 19, kind: output, shape index: {}]  }
   0x1   :  { %10143 = sst [smem:[#allocation16_spill]] %s10112_s0 }
   0x2   :  { %10144 = sst [smem:[#allocation17_spill]] %s10113_s1 }
   0x3   :  { %10145 = sst [smem:[#allocation18_spill]] %s10114_s2 }
   0x4   :  { %10146 = sst [smem:[#allocation19_spill]] %s10115_s3 }
   0x5   :  { %10147 = sst [smem:[#allocation20_spill]] %s10116_s4 }
   0x6   :  { %10148 = sst [smem:[#allocation21_spill]] %s10119_s7 }
   0x7   :  { %10149 = sst [smem:[#allocation22_spill]] %s10127_s15 }
   0x8   :  { %10150 = sst [smem:[#allocation23_spill]] %s10128_s16 }
   0x9   :  { %10151 = sst [smem:[#allocation24_spill]] %s10129_s17 }
   0xa   :  { %10152 = sst [smem:[#allocation25_spill]] %s10130_s18 }
   0xb   :  { %10153 = sst [smem:[#allocation26_spill]] %s10131_s19 }
   0xc   :  { %24 = vsyncpa [#allocation4], 0 }
   0xd   :  { %26 = vsyncpa [#allocation4 + $0x1], 0 }
   0xe   :  { %27 = vsyncpa [#allocation5], 0  ;;  %s8986_s0 = smov 0   ;;  %s8988_s30 = smov 0  }
   0xf   :  { %s8990_s20 = smov 0   ;;  %s8992_s21 = smov 0  }
  0x10   :  { %s8994_s1 = smov 0   ;;  %s8996_s22 = smov 0  }
  0x11 LB: > { %10154 = sst [smem:[#allocation9_spill]] %s8859_s30  ;;  %s10135_s2 = sadd.s32 4294967295, %s8875_s22   ;;  %s8875_s22 = sphi %s8996_s22, %s33_s22   ;;  %s8871_s1 = sphi %s8994_s1, %s10193_s1   ;;  %s8867_s21 = sphi %s8992_s21, %s10192_s21   ;;  %s8863_s20 = sphi %s8990_s20, %s10191_s20   ;;  %s8859_s30 = sphi %s8988_s30, %s10190_s30   ;;  %s8855_s0 = sphi %s8986_s0, %s10189_s0  }
  0x12   : > { %10155 = sst [smem:[#allocation10_spill]] %s8863_s20  ;;  %s42_s23 = sadd.s32 1, %s8871_s1 }
  0x13   : > { %10156 = sst [smem:[#allocation11_spill]] %s8871_s1  ;;  %p43_p0 = scmp.ge.s32.totalorder %s42_s23, 6 }
  0x14   : > { %10157 = sst [smem:[#allocation12_spill]] %s8875_s22  ;;  %s229_s24 = sadd.s32 1, %s8863_s20 }
  0x15   : > { %p236_p1 = scmp.ne.s32.totalorder %s8863_s20, %s8859_s30  ;;  %p237_p2 = scmp.eq.s32.totalorder %s8875_s22, 0 }
  0x16   : > { %s10195_s23 = smov (%p43_p0, %s42_s23), 0  ;;  %p242_p4 = scmp.ne.s32.totalorder %s8859_s30, %s8855_s0 }
  0x17   : > { %10158 = sst [smem:[#allocation13_spill]] %s10195_s23  ;;  %p9022_p3 = por %p237_p2, %p236_p1 }
  0x18   : > { %s226_s3 = ssub.s32 %s8871_s1, %s10195_s23  ;;  %p243_p5 = scmp.eq.s32.totalorder %s10135_s2, 0 }
  0x19   : > { %p227_p6 = scmp.eq.s32.totalorder %s226_s3, 0  ;;  %p8177_p8 = scmp.lt.s32.totalorder %s8875_s22, 6 }
  0x1a   : > { %p9031_p7 = por %p243_p5, %p242_p4  ;;  %s621_s28 = sand.u32 1, %s8863_s20  }
  0x1b   : > { %s9037_s27 = scalar_select %p227_p6, %s8863_s20, %s229_s24  }
  0x1c   : > { %s7741_s29 = sshll.u32 %s8871_s1, 12  ;;  %s6869_s19 = sshll.u32 %s621_s28, 8 }
  0x1d   : > { %10161 = sst [smem:[#allocation14_spill]] %s9037_s27  ;;  %s10162_s7 = sld [smem:[#allocation21_spill]] }
  0x1e   : > { %s625_s0 = scalar_lea.vmem [#allocation3], %s6869_s19  ;;  %p9048_p9 = pnand %p8177_p8, %p9022_p3 }
  0x1f   : > { %s632_s3 = sshll.u32 %s625_s0, 4  ;;  %s9054_s24 = scalar_lea.sflag [#allocation4], %s621_s28  ;;  %s9052_s3 = int_to_ptr.vmem [resolvable:$true] %s632_s3 }
  0x20   : > { %p8767_p11 = pneg %p9048_p9 }
  0x23   : > { %s9044_s15 = scalar_lea.hbm %s10162_s7, %s7741_s29  ;;  %s8770_s25 = scalar_lea.hbm %s10162_s7, 24576 }
  0x24   : > { %s8765_s16 = scalar_lea.hbm %s9044_s15, 4096  ;;  %p8771_p0 = scmp.lt.u32.totalorder %s9044_s15, %s10162_s7 }
  0x25   : > { %p8766_p10 = scmp.ne.s32.totalorder %s9044_s15, %s8765_s16  ;;  %p8772_p1 = scmp.lt.u32.totalorder %s8770_s25, %s8765_s16 }
  0x26   : > { %p8774_p3 = scmp.lt.u32.totalorder %s8765_s16, %s9044_s15 }
  0x27   : > { %p8768_p12 = pnand %p8767_p11, %p8766_p10  ;;  %p8773_p2 = por %p8772_p1, %p8771_p0 }
  0x29   : > { %p8769_p13 = pneg %p8768_p12  ;;  %p8775_p4 = por %p8774_p3, %p8773_p2 }
  0x2b   : > { %p8776_p5 = pnand %p8775_p4, %p8769_p13 }
  0x2d   : > { %8779 = shalt.err (!%p8776_p5)
}
  0x2e   : > { %s8780_s28 = scalar_lea.vmem %s9052_s3, 4096  ;;  %s8877_s18 = smov [#allocation3]  }
  0x2f   : > { %p8781_p6 = scmp.ne.s32.totalorder %s9052_s3, %s8780_s28  ;;  %s8785_s19 = sshll.u32 %s8877_s18, 4  ;;  %s8786_s19 = int_to_ptr.vmem [resolvable:$false] %s8785_s19 }
  0x30   : > { %s8787_s29 = scalar_lea.vmem %s8786_s19, 8192  ;;  %p8788_p12 = scmp.lt.s32.totalorder %s9052_s3, %s8786_s19 }
  0x31   : > { %p8783_p8 = pnand %p8781_p6, %p8767_p11  ;;  %p8789_p0 = scmp.lt.s32.totalorder %s8787_s29, %s8780_s28 }
  0x33   : > { %p8784_p10 = pneg %p8783_p8  ;;  %p8790_p1 = por %p8789_p0, %p8788_p12 }
  0x35   : > { %p8791_p2 = pnand %p8790_p1, %p8784_p10 }
  0x37   : > { %8794 = shalt.err (!%p8791_p2)
}
  0x38   : > { %s8878_s16 = smov 128   ;;  %s8879_s25 = smov 8  }
  0x39   : > { %8176 = dma.hbm_to_vmem [thread:$0]  (!%p9048_p9), %s9044_s15, 4096, %s9052_s3, %s9054_s24, %s8878_s16, %s8878_s16, %s8879_s25  }
  0x3a   : > { %p6872_p11 = scmp.ge.s32.totalorder %s8875_s22, 1  ;;  %p691_p13 = scmp.lt.s32.totalorder %s8875_s22, 7 }
  0x3c   : > { %p692_p3 = pnand %p6872_p11, %p691_p13 }
  0x3e   : > { %695 = sbr.rel (%p692_p3) target bundleno = 5974 (0x1756), region = 96 }
  0x45   : > { %s697_s0 = sand.u32 1, %s8859_s30  }
  0x46   : > { %s6873_s28 = sshll.u32 %s697_s0, 8  ;;  %s698_s18 = scalar_lea.sflag [#allocation4], %s697_s0 }
  0x47   : > { %s9085_s19 = scalar_lea.vmem [#allocation3], %s6873_s28 }
  0x48   : > { %10164 = sst [smem:[#allocation15_spill]] %s9085_s19 }
  0x49   : > { %8846 = dma.done.wait (%p9031_p7), %s698_s18, 4096  }
  0x4a   : > { %8848 = vsyncadd (%p9031_p7), %s698_s18, 4294963200  ;;  %p817_p4 = scmp.lt.s32.totalorder %s8867_s21, 5  ;;  %s10167_s4 = sld [smem:[#allocation20_spill]] }
  0x4b   : > { %p6891_p7 = scmp.ne.s32.totalorder %s8867_s21, 0 }
  0x4c   : > { %s818_s15 = scalar_select %p817_p4, %s8867_s21, 5 }
  0x4d   : > { %875 = sbr.rel (%p6891_p7) target bundleno = 86 (0x56), region = 104  ;;  %s10168_s25 = sld [smem:[#allocation16_spill]] (!%p6891_p7) }
  0x4e   : > { %s9093_s2 = sshll.u32 %s818_s15, 1  ;;  %s7742_s3 = sshll.u32 %s818_s15, 9 }
  0x4f   : > { %s9111_s30 = scalar_lea.vmem %s10117_s5, %s7742_s3  ;;  %s9116_s19 = scalar_lea.vmem %s10118_s6, %s7742_s3 }
  0x50   : > { %s9106_s1 = scalar_lea.vmem %s10167_s4, %s7742_s3  ;;  %s847_s7 = scalar_lea.vmem %s10121_s9, %s9093_s2 }
  0x51   : > { %s7745_s20 = sshll.u32 %s818_s15, 10  ;;  %s6887_s27 = sshll.u32 %s818_s15, 3 }
  0x52   : > { %s9133_s17 = scalar_lea.vmem %s10123_s11, %s7745_s20  ;;  %s9138_s24 = scalar_lea.vmem %s10124_s12, %s6887_s27 }
  0x53   : > { %s9143_s0 = scalar_lea.vmem %s10125_s13, %s7745_s20  ;;  %s869_s28 = scalar_lea.vmem %s10126_s14, %s9093_s2  ;;  %v876_v0 = vld [vmem:[%s10168_s25] sm:$0xff] (!%p6891_p7)  ;;  %v877_v1 = vld [vmem:[%s10168_s25 + $0x8] sm:$0xff] (!%p6891_p7)  ;;  %v878_v2 = vld [vmem:[%s10168_s25 + $0x10] sm:$0xff] (!%p6891_p7) }
  0x54   : > { %880 = vst [vmem:[#allocation2] sm:$0xff] %v876_v0  ;;  %881 = vst [vmem:[#allocation2 + $0x8] sm:$0xff] %v877_v1  ;;  %v879_v3 = vld [vmem:[%s10168_s25 + $0x18] sm:$0xff] }
  0x55   : > { %882 = vst [vmem:[#allocation2 + $0x10] sm:$0xff] %v878_v2  ;;  %883 = vst [vmem:[#allocation2 + $0x18] sm:$0xff] %v879_v3 }
  0x56 PF: > { %v8236_v10 = vld [vmem:[%s9106_s1 + $0x40] sm:$0xff]   ;;  %v8240_v14 = vld [vmem:[%s9106_s1 + $0x48] sm:$0xff]   ;;  %v8244_v32 = vld [vmem:[%s9106_s1 + $0x50] sm:$0xff]   ;;  %v925_v60 = vlaneseq  ;;  %s10169_s26 = sld [smem:[#allocation18_spill]]  ;;  %s10171_s22 = sld [smem:[#allocation19_spill]]  ;;  %vm8881_vm0 = vmmov 0  }
  0x57   : > { %v8237_v11 = vld [vmem:[%s9106_s1] sm:$0xff]   ;;  %7747 = vmatprep.subr.bf16.mxu0 %v8236_v10  ;;  %v8241_v29 = vld [vmem:[%s9106_s1 + $0x8] sm:$0xff]   ;;  %v8245_v33 = vld [vmem:[%s9106_s1 + $0x10] sm:$0xff]   ;;  %vm1467_vm1 = vcmask 523264   ;;  %vm1594_vm2 = vcmask 1043456   ;;  %s10173_s20 = sld [smem:[#allocation17_spill]]  ;;  %s10177_s3 = scalar_lea.vmem %s10122_s10, %s9093_s2 }
  0x58   : > { %v8238_v12 = vld [vmem:[%s9111_s30 + $0x40] sm:$0xff]   ;;  %7748 = vmatpush3.bf16.msra.mxu0 %v8237_v11  ;;  %v8242_v30 = vld [vmem:[%s9111_s30 + $0x48] sm:$0xff]   ;;  %v8246_v34 = vld [vmem:[%s9111_s30 + $0x50] sm:$0xff]   ;;  %v9211_v0 = vshrl.u32 %v925_v60, 7  ;;  %vm1564_vm3 = vcmask 64512   ;;  %s10175_s29 = sld [smem:[#allocation15_spill]] }
  0x59   : > { %v8239_v13 = vld [vmem:[%s9111_s30] sm:$0xff]   ;;  %7769 = vmatprep.subr.bf16.mxu1 %v8238_v12  ;;  %7749 = vmatprep.subr.bf16.mxu0 %v8240_v14  ;;  %v8243_v31 = vld [vmem:[%s9111_s30 + $0x8] sm:$0xff]   ;;  %v8247_v35 = vld [vmem:[%s9111_s30 + $0x10] sm:$0xff]   ;;  %p7704_p9 = scmp.ne.s32.totalorder %s8867_s21, 5 }
  0x5a   : > { %7770 = vmatpush3.bf16.msra.mxu1 %v8239_v13  ;;  %v8248_v36 = vld [vmem:[%s9106_s1 + $0x58] sm:$0xff]   ;;  %v8252_v40 = vld [vmem:[%s9106_s1 + $0x60] sm:$0xff]   ;;  %v8256_v44 = vld [vmem:[%s9106_s1 + $0x68] sm:$0xff]   ;;  %v9214_v1 = vsub.s32 0, %v9211_v0  ;;  %v9217_v2 = vsub.s32 1, %v9211_v0  ;;  %s10181_s15 = sld [smem:[#allocation23_spill]] (!%p7704_p9) }
  0x5b   : > { %7771 = vmatprep.subr.bf16.mxu1 %v8242_v30  ;;  %v8249_v37 = vld [vmem:[%s9106_s1 + $0x18] sm:$0xff]   ;;  %v8253_v41 = vld [vmem:[%s9106_s1 + $0x20] sm:$0xff]   ;;  %v8257_v45 = vld [vmem:[%s9106_s1 + $0x28] sm:$0xff]  }
  0x5c   : > { %v886_v6 = vld [vmem:[#allocation2 + $0x10] sm:$0xff]  ;;  %v887_v8 = vld [vmem:[#allocation2 + $0x18] sm:$0xff]  ;;  %7750 = vmatpush3.bf16.msra.mxu0 %v8241_v29  ;;  %v8254_v42 = vld [vmem:[%s9111_s30 + $0x60] sm:$0xff]   ;;  %s10170_s23 = scalar_lea.vmem %s10169_s26, %s9093_s2  ;;  %s10172_s27 = scalar_lea.vmem %s10171_s22, %s9093_s2 }
  0x5d   : > { %v884_v4 = vld [vmem:[#allocation2] sm:$0xff]  ;;  %v885_v5 = vld [vmem:[#allocation2 + $0x8] sm:$0xff]  ;;  %v894_v9 = vadd.f32 %v887_v8, %v886_v6  ;;  %7751 = vmatprep.subr.bf16.mxu0 %v8244_v32  ;;  %v8250_v38 = vld [vmem:[%s9111_s30 + $0x58] sm:$0xff]   ;;  %s10174_s18 = smov %s10173_s20  ;;  %s10180_s26 = sld [smem:[#allocation22_spill]] (!%p7704_p9) }
  0x5e   : > { %v891_v7 = vadd.f32 %v885_v5, %v884_v4  ;;  %7772 = vmatpush3.bf16.msra.mxu1 %v8243_v31  ;;  %v8251_v39 = vld [vmem:[%s9111_s30 + $0x18] sm:$0xff]   ;;  %v8255_v43 = vld [vmem:[%s9111_s30 + $0x20] sm:$0xff]   ;;  %v8258_v46 = vld [vmem:[%s9111_s30 + $0x68] sm:$0xff]  }
  0x5f   : > { %7773 = vmatprep.subr.bf16.mxu1 %v8246_v34  ;;  %v8259_v47 = vld [vmem:[%s9111_s30 + $0x28] sm:$0xff]   ;;  %v8260_v48 = vld [vmem:[%s9106_s1 + $0x70] sm:$0xff]   ;;  %v8264_v52 = vld [vmem:[%s9106_s1 + $0x78] sm:$0xff]  }
  0x60   : > { %892 = vadd.xlane.f32.xlu0 %v891_v7  ;;  %7752 = vmatpush3.bf16.msra.mxu0 %v8245_v33  ;;  %v8261_v49 = vld [vmem:[%s9106_s1 + $0x30] sm:$0xff]   ;;  %v8265_v53 = vld [vmem:[%s9106_s1 + $0x38] sm:$0xff]   ;;  %v8268_v56 = vld [vmem:[%s9116_s19 + $0x40] sm:$0xff]  }
  0x61   : > { %7753 = vmatprep.subr.bf16.mxu0 %v8248_v36  ;;  %v8262_v50 = vld [vmem:[%s9111_s30 + $0x70] sm:$0xff]   ;;  %v8266_v54 = vld [vmem:[%s9111_s30 + $0x78] sm:$0xff]   ;;  %v889_v3 = vld [vmem:[%s10170_s23] sm:$0x3]  ;;  %s10176_s23 = scalar_lea.vmem %s10120_s8, %s9093_s2 }
  0x62   : > { %7774 = vmatpush3.bf16.msra.mxu1 %v8247_v35  ;;  %v8263_v51 = vld [vmem:[%s9111_s30 + $0x30] sm:$0xff]   ;;  %v8267_v55 = vld [vmem:[%s9111_s30 + $0x38] sm:$0xff]   ;;  %v932_v7 = vrot.slane %v889_v3, %v9217_v2  ;;  %v8276_v32 = vld [vmem:[%s9116_s19 + $0x60] sm:$0xff]  }
  0x63   : > { %7775 = vmatprep.subr.bf16.mxu1 %v8250_v38  ;;  %v8273_v29 = vld [vmem:[%s9116_s19 + $0x10] sm:$0xff]   ;;  %v8274_v30 = vld [vmem:[%s9116_s19 + $0x58] sm:$0xff]   ;;  %v8277_v33 = vld [vmem:[%s9116_s19 + $0x20] sm:$0xff]  }
  0x64   : > { %895 = vadd.xlane.f32.xlu0 %v894_v9  ;;  %7754 = vmatpush3.bf16.msra.mxu0 %v8249_v37  ;;  %v8275_v31 = vld [vmem:[%s9116_s19 + $0x18] sm:$0xff]   ;;  %v8278_v34 = vld [vmem:[%s9116_s19 + $0x68] sm:$0xff]   ;;  %v8280_v36 = vld [vmem:[%s9116_s19 + $0x70] sm:$0xff]  }
  0x65   : > { %7755 = vmatprep.subr.bf16.mxu0 %v8252_v40  ;;  %v8279_v35 = vld [vmem:[%s9116_s19 + $0x28] sm:$0xff]   ;;  %v8281_v37 = vld [vmem:[%s9116_s19 + $0x30] sm:$0xff]   ;;  %v8282_v38 = vld [vmem:[%s9116_s19 + $0x78] sm:$0xff]  }
  0x66   : > { %7776 = vmatpush3.bf16.msra.mxu1 %v8251_v39  ;;  %v8283_v39 = vld [vmem:[%s9116_s19 + $0x38] sm:$0xff]   ;;  %v8284_v40 = vld [vmem:[%s9106_s1 + $0xc0] sm:$0xff]   ;;  %v8304_v60 = vld [vmem:[%s9116_s19 + $0xd0] sm:$0xff]  }
  0x67   : > { %7777 = vmatprep.subr.bf16.mxu1 %v8254_v42  ;;  %v8286_v42 = vld [vmem:[%s9106_s1 + $0xc8] sm:$0xff]  }
  0x68   : > { %7756 = vmatpush3.bf16.msra.mxu0 %v8253_v41  ;;  %v8285_v41 = vld [vmem:[%s9106_s1 + $0x80] sm:$0xff]  }
  0x69   : > { %7757 = vmatprep.subr.bf16.mxu0 %v8256_v44  ;;  %v8288_v44 = vld [vmem:[%s9106_s1 + $0xd0] sm:$0xff]  }
  0x6a   : > { %7778 = vmatpush3.bf16.msra.mxu1 %v8255_v43  ;;  %v8287_v43 = vld [vmem:[%s9106_s1 + $0x88] sm:$0xff]  }
  0x6b   : > { %7779 = vmatprep.subr.bf16.mxu1 %v8258_v46  ;;  %v8290_v46 = vld [vmem:[%s9106_s1 + $0xd8] sm:$0xff]  }
  0x6c   : > { %7758 = vmatpush3.bf16.msra.mxu0 %v8257_v45  ;;  %v8289_v45 = vld [vmem:[%s9106_s1 + $0x90] sm:$0xff]  }
  0x6d   : > { %7759 = vmatprep.subr.bf16.mxu0 %v8260_v48  ;;  %v8292_v48 = vld [vmem:[%s9106_s1 + $0xe0] sm:$0xff]  }
  0x6e   : > { %7780 = vmatpush3.bf16.msra.mxu1 %v8259_v47  ;;  %v8291_v47 = vld [vmem:[%s9106_s1 + $0x98] sm:$0xff]  }
  0x6f   : > { %7781 = vmatprep.subr.bf16.mxu1 %v8262_v50  ;;  %v8294_v50 = vld [vmem:[%s9106_s1 + $0xe8] sm:$0xff]  }
  0x70   : > { %7760 = vmatpush3.bf16.msra.mxu0 %v8261_v49  ;;  %v8293_v49 = vld [vmem:[%s9106_s1 + $0xa0] sm:$0xff]  }
  0x71   : > { %7761 = vmatprep.subr.bf16.mxu0 %v8264_v52  ;;  %v8296_v52 = vld [vmem:[%s9106_s1 + $0xf0] sm:$0xff]  }
  0x72   : > { %7782 = vmatpush3.bf16.msra.mxu1 %v8263_v51  ;;  %v8295_v51 = vld [vmem:[%s9106_s1 + $0xa8] sm:$0xff]  }
  0x73   : > { %7783 = vmatprep.subr.bf16.mxu1 %v8266_v54  ;;  %v8298_v54 = vld [vmem:[%s9106_s1 + $0xf8] sm:$0xff]  }
  0x74   : > { %7762 = vmatpush3.bf16.msra.mxu0 %v8265_v53  ;;  %v8297_v53 = vld [vmem:[%s9106_s1 + $0xb0] sm:$0xff]  }
  0x75   : > { %7791 = vmatprep.subr.bf16.mxu0 %v8268_v56  ;;  %v8300_v56 = vld [vmem:[%s9116_s19 + $0xc0] sm:$0xff]  }
  0x76   : > { %7784 = vmatpush3.bf16.msra.mxu1 %v8267_v55  ;;  %v8299_v55 = vld [vmem:[%s9106_s1 + $0xb8] sm:$0xff]  }
  0xed   : > { %v893_v15 = vpop.xlane.xlu0 %892 }
  0xee   : > { %v898_v16 = vmul.f32 0.00390625, %v893_v15 }
  0xf0   : > { %v9167_v17 = vsub.f32 %v884_v4, %v898_v16  ;;  %v9169_v18 = vsub.f32 %v885_v5, %v898_v16  ;;  %v890_v5 = vld [vmem:[%s10172_s27] sm:$0x3] }
  0xf1   : > { %v896_v19 = vpop.xlane.xlu0 %895  ;;  %v943_v11 = vrot.slane %v890_v5, %v9214_v1  ;;  %v947_v12 = vrot.slane %v890_v5, %v9217_v2  ;;  %v8310_v5 = vld [vmem:[%s9116_s19 + $0xe8] sm:$0xff]  }
  0xf2   : > { %v899_v20 = vmul.f32 0.00390625, %v896_v19  ;;  %v904_v21 = vmul.f32 %v9167_v17, %v9167_v17  ;;  %v905_v22 = vmul.f32 %v9169_v18, %v9169_v18 }
  0xf4   : > { %v9175_v23 = vsub.f32 %v886_v6, %v899_v20  ;;  %v9177_v24 = vsub.f32 %v887_v8, %v899_v20  ;;  %v908_v25 = vadd.f32 %v905_v22, %v904_v21  ;;  %v928_v6 = vrot.slane %v889_v3, %v9214_v1  ;;  %v8308_v3 = vld [vmem:[%s9116_s19 + $0xe0] sm:$0xff]  }
  0xf6   : > { %909 = vadd.xlane.f32.xlu1 %v908_v25  ;;  %v906_v26 = vmul.f32 %v9175_v23, %v9175_v23  ;;  %v907_v27 = vmul.f32 %v9177_v24, %v9177_v24 }
  0xf8   : > { %v911_v28 = vadd.f32 %v907_v27, %v906_v26  ;;  %v8269_v27 = vld [vmem:[%s9116_s19] sm:$0xff]  }
  0xfa   : > { %912 = vadd.xlane.f32.xlu1 %v911_v28  ;;  %v8270_v28 = vld [vmem:[%s9116_s19 + $0x48] sm:$0xff]  }
 0x183   : > { %v910_v57 = vpop.xlane.xlu1 %909 }
 0x184   : > { %v914_v58 = vmul.f32 0.00390625, %v910_v57  ;;  %v8301_v57 = vld [vmem:[%s9116_s19 + $0x80] sm:$0xff]  }
 0x186   : > { %v916_v59 = vadd.f32 1e-05, %v914_v58  ;;  %v8302_v58 = vld [vmem:[%s9116_s19 + $0xc8] sm:$0xff]  }
 0x187   : > { %v913_v61 = vpop.xlane.xlu1 %912 }
 0x188   : > { %8668 = vrsqrt.f32 %v916_v59  ;;  %v915_v62 = vmul.f32 0.00390625, %v913_v61  ;;  %v8303_v59 = vld [vmem:[%s9116_s19 + $0x88] sm:$0xff]   ;;  %v8305_v61 = vld [vmem:[%s9116_s19 + $0x90] sm:$0xff]  }
 0x18a   : > { %v917_v63 = vadd.f32 1e-05, %v915_v62  ;;  %v8306_v62 = vld [vmem:[%s9116_s19 + $0xd8] sm:$0xff]  }
 0x18c   : > { %8670 = vrsqrt.f32 %v917_v63  ;;  %v8307_v63 = vld [vmem:[%s9116_s19 + $0x98] sm:$0xff]  }
 0x192   : > { %v8669_v4 = vpop.eup %8668 }
 0x193   : > { %v920_v8 = vmul.f32 %v8669_v4, %v9167_v17  ;;  %v921_v9 = vmul.f32 %v8669_v4, %v9169_v18  ;;  %v8309_v4 = vld [vmem:[%s9116_s19 + $0xa0] sm:$0xff]  }
 0x195   : > { %v935_v13 = vmul.f32 %v928_v6, %v920_v8  ;;  %v936_v14 = vmul.f32 %v932_v7, %v921_v9  ;;  %v8313_v8 = vld [vmem:[%s9116_s19 + $0xb0] sm:$0xff]   ;;  %v8314_v9 = vld [vmem:[%s9116_s19 + $0xf8] sm:$0xff]  }
 0x196   : > { %v8671_v10 = vpop.eup %8670 }
 0x197   : > { %v922_v15 = vmul.f32 %v8671_v10, %v9175_v23  ;;  %v923_v16 = vmul.f32 %v8671_v10, %v9177_v24  ;;  %v950_v21 = vadd.f32 %v943_v11, %v935_v13  ;;  %v951_v17 = vadd.f32 %v947_v12, %v936_v14  ;;  %v8271_v23 = vld [vmem:[%s9116_s19 + $0x8] sm:$0xff]   ;;  %v8272_v24 = vld [vmem:[%s9116_s19 + $0x50] sm:$0xff]   ;;  %v8315_v10 = vld [vmem:[%s9116_s19 + $0xb8] sm:$0xff]  }
 0x199   : > { %v937_v19 = vmul.f32 %v928_v6, %v922_v15  ;;  %v938_v20 = vmul.f32 %v932_v7, %v923_v16  ;;  %v8311_v6 = vld [vmem:[%s9116_s19 + $0xa8] sm:$0xff]   ;;  %v8312_v7 = vld [vmem:[%s9116_s19 + $0xf0] sm:$0xff]  }
 0x19b   : > { %v952_v18 = vadd.f32 %v943_v11, %v937_v19  ;;  %v953_v22 = vadd.f32 %v947_v12, %v938_v20  ;;  %v8880_v11 = vmov 0.0  }
 0x19c   : > { %8043 = vmatprep.subr.bf16.mxu1 %v8880_v11 }
 0x19d   : > { %v9237_v25 = vpack.c.bf16 %v952_v18, %v950_v21  ;;  %v9239_v26 = vpack.c.bf16 %v953_v22, %v951_v17 }
 0x19f   : > { %1116 = vmatprep.mubr.bf16.mxu0 %v9239_v26  ;;  %1285 = vmatprep.mubr.bf16.mxu1 %v9239_v26 }
 0x1a0   : > { %1117 = vmatmul.mubr.bf16.vlgmr.msra.gmra.mrb[0].mxu0 %v9237_v25  ;;  %1286 = vmatmul.mubr.bf16.vlgmr.msra.gmra.mrb[0].mxu1 %v9237_v25 }
 0x1a1   : > { %7792 = vmatpush3.bf16.msra.mxu0 %v8269_v27  ;;  %1454 = vmatprep.mubr.bf16.mxu0 %v9239_v26 }
 0x1a2   : > { %7793 = vmatprep.subr.bf16.mxu0 %v8270_v28  ;;  %8045 = vmatprep.mubr.msk.bf16.mxu1 %vm8881_vm0, %v8880_v11 }
 0x1a5   : > { %7794 = vmatpush3.bf16.msra.mxu0 %v8271_v23 }
 0x1a6   : > { %7795 = vmatprep.subr.bf16.mxu0 %v8272_v24 }
 0x1a9   : > { %7796 = vmatpush3.bf16.msra.mxu0 %v8273_v29 }
 0x1aa   : > { %7797 = vmatprep.subr.bf16.mxu0 %v8274_v30 }
 0x1ad   : > { %7798 = vmatpush3.bf16.msra.mxu0 %v8275_v31 }
 0x1ae   : > { %7799 = vmatprep.subr.bf16.mxu0 %v8276_v32 }
 0x1b1   : > { %7800 = vmatpush3.bf16.msra.mxu0 %v8277_v33 }
 0x1b2   : > { %7801 = vmatprep.subr.bf16.mxu0 %v8278_v34 }
 0x1b5   : > { %7802 = vmatpush3.bf16.msra.mxu0 %v8279_v35 }
 0x1b6   : > { %7803 = vmatprep.subr.bf16.mxu0 %v8280_v36 }
 0x1b9   : > { %7804 = vmatpush3.bf16.msra.mxu0 %v8281_v37 }
 0x1ba   : > { %7805 = vmatprep.subr.bf16.mxu0 %v8282_v38 }
 0x1bd   : > { %7806 = vmatpush3.bf16.msra.mxu0 %v8283_v39 }
 0x1be   : > { %7821 = vmatprep.subr.bf16.mxu0 %v8284_v40 }
 0x1c0   : > { %1455 = vmatmul.mubr.bf16.vlgmr.msra.gmra.mrb[4].mxu0 %v9237_v25 }
 0x1c1   : > { %7822 = vmatpush3.bf16.msra.mxu0 %v8285_v41  ;;  %1854 = vmatprep.mubr.bf16.mxu0 %v9239_v26 }
 0x1c2   : > { %7823 = vmatprep.subr.bf16.mxu0 %v8286_v42 }
 0x1c5   : > { %7824 = vmatpush3.bf16.msra.mxu0 %v8287_v43 }
 0x1c6   : > { %7825 = vmatprep.subr.bf16.mxu0 %v8288_v44 }
 0x1c9   : > { %7826 = vmatpush3.bf16.msra.mxu0 %v8289_v45 }
 0x1ca   : > { %7827 = vmatprep.subr.bf16.mxu0 %v8290_v46 }
 0x1cd   : > { %7828 = vmatpush3.bf16.msra.mxu0 %v8291_v47 }
 0x1ce   : > { %7829 = vmatprep.subr.bf16.mxu0 %v8292_v48 }
 0x1d1   : > { %7830 = vmatpush3.bf16.msra.mxu0 %v8293_v49 }
 0x1d2   : > { %7831 = vmatprep.subr.bf16.mxu0 %v8294_v50 }
 0x1d5   : > { %7832 = vmatpush3.bf16.msra.mxu0 %v8295_v51 }
 0x1d6   : > { %7833 = vmatprep.subr.bf16.mxu0 %v8296_v52 }
 0x1d9   : > { %7834 = vmatpush3.bf16.msra.mxu0 %v8297_v53  ;;  %v9324_v53 = vld [vmem:[%s10173_s20] sm:$0xff] }
 0x1da   : > { %7835 = vmatprep.subr.bf16.mxu0 %v8298_v54 }
 0x1dd   : > { %7836 = vmatpush3.bf16.msra.mxu0 %v8299_v55 }
 0x1de   : > { %7865 = vmatprep.subr.bf16.mxu0 %v8300_v56 }
 0x1e0   : > { %1855 = vmatmul.mubr.bf16.vlgmr.msra.gmra.mrb[8].mxu0 %v9237_v25 }
 0x1e1   : > { %7866 = vmatpush3.bf16.msra.mxu0 %v8301_v57  ;;  %2194 = vmatprep.mubr.bf16.mxu0 %v9239_v26 }
 0x1e2   : > { %7867 = vmatprep.subr.bf16.mxu0 %v8302_v58 }
 0x1e5   : > { %7868 = vmatpush3.bf16.msra.mxu0 %v8303_v59 }
 0x1e6   : > { %7869 = vmatprep.subr.bf16.mxu0 %v8304_v60 }
 0x1e9   : > { %7870 = vmatpush3.bf16.msra.mxu0 %v8305_v61 }
 0x1ea   : > { %7871 = vmatprep.subr.bf16.mxu0 %v8306_v62 }
 0x1ed   : > { %7872 = vmatpush3.bf16.msra.mxu0 %v8307_v63 }
 0x1ee   : > { %7873 = vmatprep.subr.bf16.mxu0 %v8308_v3 }
 0x1f1   : > { %7874 = vmatpush3.bf16.msra.mxu0 %v8309_v4 }
 0x1f2   : > { %7875 = vmatprep.subr.bf16.mxu0 %v8310_v5 }
 0x1f5   : > { %7876 = vmatpush3.bf16.msra.mxu0 %v8311_v6 }
 0x1f6   : > { %7877 = vmatprep.subr.bf16.mxu0 %v8312_v7 }
 0x1f9   : > { %7878 = vmatpush3.bf16.msra.mxu0 %v8313_v8 }
 0x1fa   : > { %7879 = vmatprep.subr.bf16.mxu0 %v8314_v9 }
 0x1fd   : > { %7880 = vmatpush3.bf16.msra.mxu0 %v8315_v10 }
 0x200   : > { %2195 = vmatmul.mubr.bf16.vlgmr.msra.gmra.mrb[12].mxu0 %v9237_v25 }
 0x273   : > { %v7763_v12 = vpop.f32.mrb[0].mxu0  ;;  %v7785_v13 = vpop.f32.mrb[0].mxu1 }
 0x274   : > { %v7764_v14 = vpop.f32.mrb[1].mxu0  ;;  %v7786_v15 = vpop.f32.mrb[1].mxu1 }
 0x275   : > { %v7765_v16 = vadd.f32 %v7764_v14, %v7763_v12  ;;  %v7787_v19 = vadd.f32 %v7786_v15, %v7785_v13  ;;  %v7766_v20 = vpop.f32.mrb[2].mxu0  ;;  %v7788_v21 = vpop.f32.mrb[2].mxu1 }
 0x276   : > { %v7767_v17 = vpop.f32.mrb[3].mxu0  ;;  %v7789_v18 = vpop.f32.mrb[3].mxu1 }
 0x277   : > { %v1465_v22 = vpack.c.bf16 %v7787_v19, %v7787_v19  ;;  %v7768_v27 = vadd.f32 %v7767_v17, %v7766_v20  ;;  %v7790_v28 = vadd.f32 %v7789_v18, %v7788_v21  ;;  %v1463_v29 = vpack.c.bf16 %v7765_v16, %v7765_v16 }
 0x279   : > { %v1472_v23 = vsel %vm1467_vm1, %v1465_v22, 0  ;;  %v1466_v24 = vpack.c.bf16 %v7790_v28, %v7790_v28  ;;  %v1464_v31 = vpack.c.bf16 %v7768_v27, %v7768_v27  ;;  %v8316_v27 = vld [vmem:[%s9111_s30 + $0xc0] sm:$0xff]  }
 0x27a   : > { %8044 = vmatpush3.bf16.xpose.msra.mxu1 %v1472_v23 }
 0x27b   : > { %8049 = vmatprep.subr.bf16.mxu1 %v8880_v11  ;;  %v1518_v30 = vsel %vm1467_vm1, %v1466_v24, 0 }
 0x281   : > { %8046 = vmatmul.mubr.msk.bf16.vlgmr.msra.gmra.mrb[4].mxu1 %vm1467_vm1, %v1463_v29  ;;  %v8317_v29 = vld [vmem:[%s9111_s30 + $0x80] sm:$0xff]  }
 0x282   : > { %8050 = vmatpush3.bf16.xpose.msra.mxu1 %v1518_v30  ;;  %8051 = vmatprep.mubr.msk.bf16.mxu1 %vm8881_vm0, %v8880_v11 }
 0x283   : > { %8055 = vmatprep.subr.bf16.mxu1 %v8880_v11 }
 0x289   : > { %8052 = vmatmul.mubr.msk.bf16.vlgmr.msra.gmra.mrb[8].mxu1 %vm1467_vm1, %v1464_v31  ;;  %v8318_v31 = vld [vmem:[%s9111_s30 + $0xc8] sm:$0xff]  }
 0x28a   : > { %8057 = vmatprep.mubr.msk.bf16.mxu1 %vm8881_vm0, %v8880_v11 }
 0x293   : > { %v7807_v32 = vpop.f32.mrb[4].mxu0 }
 0x294   : > { %v7808_v33 = vpop.f32.mrb[5].mxu0 }
 0x295   : > { %v7809_v34 = vadd.f32 %v7808_v33, %v7807_v32  ;;  %v7810_v35 = vpop.f32.mrb[6].mxu0  ;;  %v8319_v32 = vld [vmem:[%s9111_s30 + $0x88] sm:$0xff]   ;;  %v8320_v33 = vld [vmem:[%s9111_s30 + $0xd0] sm:$0xff]  }
 0x296   : > { %v7811_v36 = vpop.f32.mrb[7].mxu0 }
 0x297   : > { %v1589_v37 = vpack.c.bf16 %v7809_v34, %v7809_v34  ;;  %v7812_v38 = vadd.f32 %v7811_v36, %v7810_v35  ;;  %v8321_v34 = vld [vmem:[%s9111_s30 + $0x90] sm:$0xff]   ;;  %v8322_v35 = vld [vmem:[%s9111_s30 + $0xd8] sm:$0xff]  }
 0x298   : > { %v8323_v36 = vld [vmem:[%s9111_s30 + $0x98] sm:$0xff]  }
 0x299   : > { %v1596_v39 = vsel %vm1594_vm2, %v1589_v37, 0  ;;  %v1590_v17 = vpack.c.bf16 %v7812_v38, %v7812_v38  ;;  %v8324_v37 = vld [vmem:[%s9111_s30 + $0xe0] sm:$0xff]  }
 0x29a   : > { %8056 = vmatpush3.bf16.msra.mxu1 %v1596_v39  ;;  %v8325_v38 = vld [vmem:[%s9111_s30 + $0xa0] sm:$0xff]   ;;  %v8326_v39 = vld [vmem:[%s9111_s30 + $0xe8] sm:$0xff]  }
 0x29b   : > { %8061 = vmatprep.subr.bf16.mxu1 %v8880_v11  ;;  %v1642_v28 = vsel %vm1594_vm2, %v1590_v17, 0 }
 0x2b3   : > { %v7837_v40 = vpop.f32.mrb[8].mxu0 }
 0x2b4   : > { %v7838_v41 = vpop.f32.mrb[9].mxu0 }
 0x2b5   : > { %v9313_v42 = vadd.f32 %v7838_v41, %v7837_v40  ;;  %v7840_v43 = vpop.f32.mrb[10].mxu0  ;;  %v8327_v40 = vld [vmem:[%s9111_s30 + $0xa8] sm:$0xff]   ;;  %v8328_v41 = vld [vmem:[%s9111_s30 + $0xf0] sm:$0xff]  }
 0x2b6   : > { %v7841_v44 = vpop.f32.mrb[11].mxu0 }
 0x2b7   : > { %v9315_v45 = vadd.f32 %v7841_v44, %v7840_v43  ;;  %v8329_v43 = vld [vmem:[%s9111_s30 + $0xb0] sm:$0xff]   ;;  %v8330_v44 = vld [vmem:[%s9111_s30 + $0xf8] sm:$0xff]  }
 0x2d3   : > { %v7881_v46 = vpop.f32.mrb[12].mxu0 }
 0x2d4   : > { %v7882_v47 = vpop.f32.mrb[13].mxu0 }
 0x2d5   : > { %v9317_v48 = vadd.f32 %v7882_v47, %v7881_v46  ;;  %v7884_v49 = vpop.f32.mrb[14].mxu0  ;;  %v8331_v46 = vld [vmem:[%s9111_s30 + $0xb8] sm:$0xff]  }
 0x2d6   : > { %v7885_v50 = vpop.f32.mrb[15].mxu0 }
 0x2d7   : > { %v9319_v51 = vadd.f32 %v7885_v50, %v7884_v49 }
 0x354   : > { %v1508_v52 = vpop.f32.mrb[4].mxu1 }
 0x355   : > { %v1560_v54 = vmul.f32 0.125, %v1508_v52  ;;  %v8047_v55 = vpop.f32.mrb[5].mxu1 }
 0x356   : > { %v1511_v56 = vpop.f32.mrb[6].mxu1 }
 0x357   : > { %v8048_v57 = vpop.f32.mrb[7].mxu1  ;;  %v1562_v58 = vadd.f32 %v1560_v54, %v9324_v53 }
 0x359   : > { %v1565_v59 = vsel %vm1564_vm3, %v1562_v58, -inf }
 0x35a   : > { %1566 = vmax.xlane.f32.xlu0 %v1565_v59 }
 0x35c   : > { %v1554_v60 = vpop.f32.mrb[8].mxu1 }
 0x35d   : > { %v1561_v61 = vmul.f32 0.125, %v1554_v60  ;;  %v8053_v62 = vpop.f32.mrb[9].mxu1 }
 0x35e   : > { %v1557_v63 = vpop.f32.mrb[10].mxu1 }
 0x35f   : > { %v8054_v3 = vpop.f32.mrb[11].mxu1  ;;  %v1563_v4 = vadd.f32 %v1561_v61, %v9324_v53 }
 0x361   : > { %v1568_v5 = vsel %vm1564_vm3, %v1563_v4, -inf }
 0x362   : > { %1569 = vmax.xlane.f32.xlu1 %v1568_v5 }
 0x3e7   : > { %v1567_v6 = vpop.xlane.xlu0 %1566 }
 0x3e8   : > { %v1571_v7 = vsub.f32 %v1562_v58, %v1567_v6 }
 0x3ea   : > { %v1573_v8 = vmul.f32 1.442695, %v1571_v7  ;;  %v2203_v7 = vpack.c.bf16 %v9313_v42, %v9313_v42 }
 0x3ec   : > { %8672 = vpow2.f32 %v1573_v8 }
 0x3ef   : > { %v1570_v9 = vpop.xlane.xlu1 %1569 }
 0x3f0   : > { %v1572_v10 = vsub.f32 %v1563_v4, %v1570_v9  ;;  %v2327_v9 = vpack.c.bf16 %v9317_v48, %v9317_v48 }
 0x3f2   : > { %v1575_v12 = vmul.f32 1.442695, %v1572_v10  ;;  %v2204_v10 = vpack.c.bf16 %v9315_v45, %v9315_v45 }
 0x3f4   : > { %8674 = vpow2.f32 %v1575_v12  ;;  %v2333_v12 = vsel %vm1594_vm2, %v2327_v9, 0  ;;  %v8345_v9 = vld [vmem:[%s9106_s1 + $0x130] sm:$0xff]  }
 0x3f6   : > { %v8673_v13 = vpop.eup %8672 }
 0x3f7   : > { %v1577_v14 = vsel %vm1564_vm3, %v8673_v13, 0.0 }
 0x3f8   : > { %1578 = vadd.xlane.f32.xlu0 %v1577_v14 }
 0x3fe   : > { %v8675_v15 = vpop.eup %8674 }
 0x3ff   : > { %v1580_v16 = vsel %vm1564_vm3, %v8675_v15, 0.0 }
 0x400   : > { %1581 = vadd.xlane.f32.xlu1 %v1580_v16 }
 0x485   : > { %v1579_v19 = vpop.xlane.xlu0 %1578 }
 0x486   : > { %8676 = vrcp.f32 %v1579_v19 }
 0x48d   : > { %v1582_v20 = vpop.xlane.xlu1 %1581 }
 0x48e   : > { %8678 = vrcp.f32 %v1582_v20 }
 0x490   : > { %v8677_v21 = vpop.eup %8676 }
 0x491   : > { %v1585_v18 = vmul.f32 %v8677_v21, %v8673_v13 }
 0x493   : > { %v1587_v22 = vpack.c.bf16 %v1585_v18, %v1585_v18 }
 0x495   : > { %8058 = vmatmul.mubr.msk.bf16.vlgmr.msra.gmra.mrb[12].mxu1 %vm1564_vm3, %v1587_v22 }
 0x496   : > { %8062 = vmatpush3.bf16.msra.mxu1 %v1642_v28  ;;  %8063 = vmatprep.mubr.msk.bf16.mxu1 %vm8881_vm0, %v8880_v11 }
 0x497   : > { %7843 = vmatprep.subr.bf16.mxu1 %v8316_v27 }
 0x498   : > { %v8679_v23 = vpop.eup %8678 }
 0x499   : > { %v1586_v24 = vmul.f32 %v8679_v23, %v8675_v15 }
 0x49b   : > { %v1588_v30 = vpack.c.bf16 %v1586_v24, %v1586_v24 }
 0x49d   : > { %8064 = vmatmul.mubr.msk.bf16.vlgmr.msra.gmra.mrb[16].mxu1 %vm1564_vm3, %v1588_v30 }
 0x49e   : > { %7844 = vmatpush3.bf16.msra.mxu1 %v8317_v29  ;;  %2024 = vmatprep.mubr.bf16.mxu1 %v9239_v26 }
 0x49f   : > { %7845 = vmatprep.subr.bf16.mxu1 %v8318_v31 }
 0x4a2   : > { %7846 = vmatpush3.bf16.msra.mxu1 %v8319_v32 }
 0x4a3   : > { %7847 = vmatprep.subr.bf16.mxu1 %v8320_v33 }
 0x4a6   : > { %7848 = vmatpush3.bf16.msra.mxu1 %v8321_v34 }
 0x4a7   : > { %7849 = vmatprep.subr.bf16.mxu1 %v8322_v35 }
 0x4aa   : > { %7850 = vmatpush3.bf16.msra.mxu1 %v8323_v36  ;;  %v8364_v36 = vld [vmem:[%s10175_s29 + $0x40] ss:$8 sps:$4 sm:$0xff]  }
 0x4ab   : > { %7851 = vmatprep.subr.bf16.mxu1 %v8324_v37  ;;  %v8366_v37 = vld [vmem:[%s10175_s29 + $0x44] ss:$8 sps:$4 sm:$0xff]  }
 0x4ac   : > { %2474 = vmatprep.subr.bf16.mxu0 %v8366_v37 }
 0x4ad   : > { %2475 = vmatpush1.bf16.msra.mxu0 %v8364_v36 }
 0x4ae   : > { %7852 = vmatpush3.bf16.msra.mxu1 %v8325_v38  ;;  %v8369_v38 = vld [vmem:[%s10175_s29 + $0x54] ss:$8 sps:$4 sm:$0xff]  }
 0x4af   : > { %7853 = vmatprep.subr.bf16.mxu1 %v8326_v39  ;;  %v8367_v39 = vld [vmem:[%s10175_s29 + $0x50] ss:$8 sps:$4 sm:$0xff]   ;;  %2476 = vmatprep.subr.bf16.mxu0 %v8369_v38 }
 0x4b1   : > { %2477 = vmatpush1.bf16.msra.mxu0 %v8367_v39  ;;  %v8376_v39 = vld [vmem:[%s10175_s29] ss:$8 sps:$4 sm:$0xff]  }
 0x4b2   : > { %7854 = vmatpush3.bf16.msra.mxu1 %v8327_v40 }
 0x4b3   : > { %7855 = vmatprep.subr.bf16.mxu1 %v8328_v41 }
 0x4b6   : > { %7856 = vmatpush3.bf16.msra.mxu1 %v8329_v43 }
 0x4b7   : > { %7857 = vmatprep.subr.bf16.mxu1 %v8330_v44  ;;  %v2328_v44 = vpack.c.bf16 %v9319_v51, %v9319_v51  ;;  %v8333_v51 = vld [vmem:[%s9106_s1 + $0x100] sm:$0xff]  }
 0x4ba   : > { %7858 = vmatpush3.bf16.msra.mxu1 %v8331_v46 }
 0x4bb   : > { %8067 = vmatprep.subr.bf16.mxu1 %v8880_v11 }
 0x4bd   : > { %2025 = vmatmul.mubr.bf16.vlgmr.msra.gmra.mrb[20].mxu1 %v9237_v25 }
 0x4be   : > { %8069 = vmatprep.mubr.msk.bf16.mxu1 %vm8881_vm0, %v8880_v11 }
 0x568   : > { %v9358_v47 = vpop.f32.mrb[12].mxu1 }
 0x569   : > { %v8059_v49 = vpop.f32.mrb[13].mxu1 }
 0x56a   : > { %v1635_v50 = vpop.f32.mrb[14].mxu1 }
 0x56b   : > { %v8060_v52 = vpop.f32.mrb[15].mxu1  ;;  %v8332_v50 = vld [vmem:[%s9106_s1 + $0x140] sm:$0xff]  }
 0x56c   : > { %v2379_v52 = vsel %vm1594_vm2, %v2328_v44, 0 }
 0x570   : > { %v9360_v54 = vpop.f32.mrb[16].mxu1 }
 0x571   : > { %v1684_v55 = vpack.c.bf16 %v9360_v54, %v9358_v47  ;;  %v8065_v56 = vpop.f32.mrb[17].mxu1  ;;  %v8396_v47 = vld [vmem:[%s9111_s30 + $0x160] sm:$0xff]  }
 0x572   : > { %v1681_v57 = vpop.f32.mrb[18].mxu1 }
 0x573   : > { %v8066_v58 = vpop.f32.mrb[19].mxu1 }
 0x590   : > { %v7859_v59 = vpop.f32.mrb[20].mxu1 }
 0x591   : > { %v7860_v60 = vpop.f32.mrb[21].mxu1 }
 0x592   : > { %v7861_v61 = vadd.f32 %v7860_v60, %v7859_v59  ;;  %v7862_v62 = vpop.f32.mrb[22].mxu1  ;;  %v8334_v59 = vld [vmem:[%s9106_s1 + $0x148] sm:$0xff]  }
 0x593   : > { %v7863_v63 = vpop.f32.mrb[23].mxu1  ;;  %v8335_v60 = vld [vmem:[%s9106_s1 + $0x108] sm:$0xff]  }
 0x594   : > { %v2205_v3 = vpack.c.bf16 %v7861_v61, %v7861_v61  ;;  %v7864_v4 = vadd.f32 %v7863_v63, %v7862_v62  ;;  %v8336_v61 = vld [vmem:[%s9106_s1 + $0x150] sm:$0xff]   ;;  %v8338_v63 = vld [vmem:[%s9106_s1 + $0x158] sm:$0xff]  }
 0x595   : > { %v8337_v62 = vld [vmem:[%s9106_s1 + $0x110] sm:$0xff]  }
 0x596   : > { %v2211_v5 = vsel %vm1467_vm1, %v2205_v3, 0  ;;  %v2206_v6 = vpack.c.bf16 %v7864_v4, %v7864_v4  ;;  %v8339_v3 = vld [vmem:[%s9106_s1 + $0x118] sm:$0xff]   ;;  %v8340_v4 = vld [vmem:[%s9106_s1 + $0x160] sm:$0xff]  }
 0x597   : > { %8068 = vmatpush3.bf16.xpose.msra.mxu1 %v2211_v5  ;;  %v8341_v5 = vld [vmem:[%s9106_s1 + $0x120] sm:$0xff]  }
 0x598   : > { %8073 = vmatprep.subr.bf16.mxu1 %v8880_v11  ;;  %v2257_v8 = vsel %vm1467_vm1, %v2206_v6, 0  ;;  %v8342_v6 = vld [vmem:[%s9106_s1 + $0x168] sm:$0xff]  }
 0x59e   : > { %8070 = vmatmul.mubr.msk.bf16.vlgmr.msra.gmra.mrb[24].mxu1 %vm1467_vm1, %v2203_v7  ;;  %v8343_v7 = vld [vmem:[%s9106_s1 + $0x128] sm:$0xff]  }
 0x59f   : > { %8074 = vmatpush3.bf16.xpose.msra.mxu1 %v2257_v8  ;;  %8075 = vmatprep.mubr.msk.bf16.mxu1 %vm8881_vm0, %v8880_v11  ;;  %v8344_v8 = vld [vmem:[%s9106_s1 + $0x170] sm:$0xff]  }
 0x5a0   : > { %8079 = vmatprep.subr.bf16.mxu1 %v8880_v11 }
 0x5a6   : > { %8076 = vmatmul.mubr.msk.bf16.vlgmr.msra.gmra.mrb[28].mxu1 %vm1467_vm1, %v2204_v10  ;;  %v8346_v10 = vld [vmem:[%s9106_s1 + $0x178] sm:$0xff]  }
 0x5a7   : > { %8080 = vmatpush3.bf16.msra.mxu1 %v2333_v12  ;;  %8081 = vmatprep.mubr.msk.bf16.mxu1 %vm8881_vm0, %v8880_v11  ;;  %v8347_v12 = vld [vmem:[%s9106_s1 + $0x138] sm:$0xff]  }
 0x5a8   : > { %8085 = vmatprep.subr.bf16.mxu1 %v8880_v11 }
 0x671   : > { %v2247_v42 = vpop.f32.mrb[24].mxu1 }
 0x672   : > { %v2299_v13 = vmul.f32 0.125, %v2247_v42  ;;  %v8071_v14 = vpop.f32.mrb[25].mxu1  ;;  %v8348_v42 = vld [vmem:[%s9116_s19 + $0x140] sm:$0xff]  }
 0x673   : > { %v2250_v15 = vpop.f32.mrb[26].mxu1  ;;  %v8350_v14 = vld [vmem:[%s9116_s19 + $0x148] sm:$0xff]  }
 0x674   : > { %v8072_v16 = vpop.f32.mrb[27].mxu1  ;;  %v2301_v48 = vadd.f32 %v2299_v13, %v9324_v53  ;;  %v8349_v13 = vld [vmem:[%s9116_s19 + $0x100] sm:$0xff]   ;;  %v8351_v15 = vld [vmem:[%s9116_s19 + $0x108] sm:$0xff]  }
 0x675   : > { %v8352_v16 = vld [vmem:[%s9116_s19 + $0x150] sm:$0xff]  }
 0x676   : > { %v2303_v19 = vsel %vm1564_vm3, %v2301_v48, -inf }
 0x677   : > { %2304 = vmax.xlane.f32.xlu0 %v2303_v19  ;;  %v8354_v19 = vld [vmem:[%s9116_s19 + $0x158] sm:$0xff]  }
 0x679   : > { %v2293_v45 = vpop.f32.mrb[28].mxu1 }
 0x67a   : > { %v2300_v20 = vmul.f32 0.125, %v2293_v45  ;;  %v8077_v21 = vpop.f32.mrb[29].mxu1  ;;  %v8355_v45 = vld [vmem:[%s9116_s19 + $0x118] sm:$0xff]  }
 0x67b   : > { %v2296_v17 = vpop.f32.mrb[30].mxu1  ;;  %v8357_v21 = vld [vmem:[%s9116_s19 + $0x120] sm:$0xff]  }
 0x67c   : > { %v8078_v18 = vpop.f32.mrb[31].mxu1  ;;  %v2302_v22 = vadd.f32 %v2300_v20, %v9324_v53  ;;  %v8356_v20 = vld [vmem:[%s9116_s19 + $0x160] sm:$0xff]   ;;  %v8358_v17 = vld [vmem:[%s9116_s19 + $0x168] sm:$0xff]  }
 0x67d   : > { %v8359_v18 = vld [vmem:[%s9116_s19 + $0x128] sm:$0xff]  }
 0x67e   : > { %v2306_v27 = vsel %vm1564_vm3, %v2302_v22, -inf }
 0x67f   : > { %2307 = vmax.xlane.f32.xlu1 %v2306_v27  ;;  %v8361_v27 = vld [vmem:[%s9116_s19 + $0x130] sm:$0xff]  }
 0x704   : > { %v2305_v28 = vpop.xlane.xlu0 %2304 }
 0x705   : > { %v2309_v23 = vsub.f32 %v2301_v48, %v2305_v28  ;;  %v8353_v48 = vld [vmem:[%s9116_s19 + $0x110] sm:$0xff]   ;;  %v8362_v28 = vld [vmem:[%s9116_s19 + $0x178] sm:$0xff]  }
 0x707   : > { %v2311_v24 = vmul.f32 1.442695, %v2309_v23  ;;  %v8363_v23 = vld [vmem:[%s9116_s19 + $0x138] sm:$0xff]  }
 0x709   : > { %8680 = vpow2.f32 %v2311_v24  ;;  %v8372_v24 = vld [vmem:[%s10175_s29 + $0x64] ss:$8 sps:$4 sm:$0xff]  }
 0x70a   : > { %2478 = vmatprep.subr.bf16.mxu0 %v8372_v24 }
 0x70c   : > { %v2308_v29 = vpop.xlane.xlu1 %2307 }
 0x70d   : > { %v2310_v30 = vsub.f32 %v2302_v22, %v2308_v29  ;;  %v8360_v22 = vld [vmem:[%s9116_s19 + $0x170] sm:$0xff]   ;;  %v8370_v29 = vld [vmem:[%s10175_s29 + $0x60] ss:$8 sps:$4 sm:$0xff]  }
 0x70e   : > { %2479 = vmatpush1.bf16.msra.mxu0 %v8370_v29 }
 0x70f   : > { %v2313_v31 = vmul.f32 1.442695, %v2310_v30  ;;  %v8375_v30 = vld [vmem:[%s10175_s29 + $0x74] ss:$8 sps:$4 sm:$0xff]  }
 0x710   : > { %2480 = vmatprep.subr.bf16.mxu0 %v8375_v30 }
 0x711   : > { %8682 = vpow2.f32 %v2313_v31  ;;  %v8373_v31 = vld [vmem:[%s10175_s29 + $0x70] ss:$8 sps:$4 sm:$0xff]  }
 0x712   : > { %2481 = vmatpush1.bf16.msra.mxu0 %v8373_v31 }
 0x713   : > { %v8681_v32 = vpop.eup %8680 }
 0x714   : > { %v2315_v33 = vsel %vm1564_vm3, %v8681_v32, 0.0 }
 0x715   : > { %2316 = vadd.xlane.f32.xlu0 %v2315_v33  ;;  %v8882_v33 = vmov 0  }
 0x716   : > { %2506 = vmatprep.mubr.bf16.mxu0 %v8882_v33 }
 0x71b   : > { %v8683_v34 = vpop.eup %8682 }
 0x71c   : > { %v2318_v35 = vsel %vm1564_vm3, %v8683_v34, 0.0 }
 0x71d   : > { %2319 = vadd.xlane.f32.xlu1 %v2318_v35 }
 0x7a2   : > { %v2317_v40 = vpop.xlane.xlu0 %2316 }
 0x7a3   : > { %8684 = vrcp.f32 %v2317_v40 }
 0x7aa   : > { %v2320_v41 = vpop.xlane.xlu1 %2319 }
 0x7ab   : > { %8686 = vrcp.f32 %v2320_v41 }
 0x7ad   : > { %v8685_v43 = vpop.eup %8684 }
 0x7ae   : > { %v2323_v46 = vmul.f32 %v8685_v43, %v8681_v32  ;;  %v8378_v32 = vld [vmem:[%s10175_s29 + $0x4] ss:$8 sps:$4 sm:$0xff]   ;;  %v8381_v43 = vld [vmem:[%s10175_s29 + $0x14] ss:$8 sps:$4 sm:$0xff]  }
 0x7af   : > { %2560 = vmatprep.subr.bf16.mxu0 %v8378_v32 }
 0x7b0   : > { %v2325_v49 = vpack.c.bf16 %v2323_v46, %v2323_v46 }
 0x7b2   : > { %8082 = vmatmul.mubr.msk.bf16.vlgmr.msra.gmra.mrb[32].mxu1 %vm1564_vm3, %v2325_v49  ;;  %v8379_v49 = vld [vmem:[%s10175_s29 + $0x10] ss:$8 sps:$4 sm:$0xff]  }
 0x7b3   : > { %8086 = vmatpush3.bf16.msra.mxu1 %v2379_v52  ;;  %8087 = vmatprep.mubr.msk.bf16.mxu1 %vm8881_vm0, %v8880_v11  ;;  %v8382_v52 = vld [vmem:[%s10175_s29 + $0x20] ss:$8 sps:$4 sm:$0xff]  }
 0x7b4   : > { %7895 = vmatprep.subr.bf16.mxu1 %v8332_v50  ;;  %v8384_v50 = vld [vmem:[%s10175_s29 + $0x24] ss:$8 sps:$4 sm:$0xff]  }
 0x7b5   : > { %v8687_v56 = vpop.eup %8686 }
 0x7b6   : > { %v2324_v57 = vmul.f32 %v8687_v56, %v8683_v34  ;;  %v8387_v56 = vld [vmem:[%s10175_s29 + $0x34] ss:$8 sps:$4 sm:$0xff]  }
 0x7b8   : > { %v2326_v58 = vpack.c.bf16 %v2324_v57, %v2324_v57  ;;  %v8385_v57 = vld [vmem:[%s10175_s29 + $0x30] ss:$8 sps:$4 sm:$0xff]  }
 0x7ba   : > { %8088 = vmatmul.mubr.msk.bf16.vlgmr.msra.gmra.mrb[36].mxu1 %vm1564_vm3, %v2326_v58  ;;  %v8389_v58 = vld [vmem:[%s9111_s30 + $0x100] sm:$0xff]  }
 0x7bb   : > { %7896 = vmatpush3.bf16.msra.mxu1 %v8333_v51  ;;  %2764 = vmatprep.mubr.bf16.mxu1 %v9239_v26  ;;  %v8388_v51 = vld [vmem:[%s9111_s30 + $0x140] sm:$0xff]  }
 0x7bc   : > { %7897 = vmatprep.subr.bf16.mxu1 %v8334_v59  ;;  %v8390_v59 = vld [vmem:[%s9111_s30 + $0x148] sm:$0xff]  }
 0x7bf   : > { %7898 = vmatpush3.bf16.msra.mxu1 %v8335_v60  ;;  %v8391_v60 = vld [vmem:[%s9111_s30 + $0x108] sm:$0xff]  }
 0x7c0   : > { %7899 = vmatprep.subr.bf16.mxu1 %v8336_v61  ;;  %v8392_v61 = vld [vmem:[%s9111_s30 + $0x150] sm:$0xff]  }
 0x7c3   : > { %7900 = vmatpush3.bf16.msra.mxu1 %v8337_v62  ;;  %v8393_v62 = vld [vmem:[%s9111_s30 + $0x110] sm:$0xff]  }
 0x7c4   : > { %7901 = vmatprep.subr.bf16.mxu1 %v8338_v63  ;;  %v8394_v63 = vld [vmem:[%s9111_s30 + $0x158] sm:$0xff]  }
 0x7c7   : > { %7902 = vmatpush3.bf16.msra.mxu1 %v8339_v3  ;;  %v8395_v3 = vld [vmem:[%s9111_s30 + $0x118] sm:$0xff]  }
 0x7c8   : > { %7903 = vmatprep.subr.bf16.mxu1 %v8340_v4 }
 0x7cb   : > { %7904 = vmatpush3.bf16.msra.mxu1 %v8341_v5  ;;  %v8398_v5 = vld [vmem:[%s9111_s30 + $0x168] sm:$0xff]  }
 0x7cc   : > { %7905 = vmatprep.subr.bf16.mxu1 %v8342_v6 }
 0x7cf   : > { %7906 = vmatpush3.bf16.msra.mxu1 %v8343_v7 }
 0x7d0   : > { %7907 = vmatprep.subr.bf16.mxu1 %v8344_v8 }
 0x7d3   : > { %7908 = vmatpush3.bf16.msra.mxu1 %v8345_v9 }
 0x7d4   : > { %7909 = vmatprep.subr.bf16.mxu1 %v8346_v10  ;;  %v8399_v10 = vld [vmem:[%s9111_s30 + $0x128] sm:$0xff]  }
 0x7d7   : > { %7910 = vmatpush3.bf16.msra.mxu1 %v8347_v12  ;;  %v8400_v12 = vld [vmem:[%s9111_s30 + $0x170] sm:$0xff]  }
 0x7d8   : > { %7939 = vmatprep.subr.bf16.mxu1 %v8348_v42  ;;  %v8401_v42 = vld [vmem:[%s9111_s30 + $0x130] sm:$0xff]  }
 0x7da   : > { %2765 = vmatmul.mubr.bf16.vlgmr.msra.gmra.mrb[40].mxu1 %v9237_v25 }
 0x7db   : > { %7940 = vmatpush3.bf16.msra.mxu1 %v8349_v13  ;;  %3104 = vmatprep.mubr.bf16.mxu1 %v9239_v26  ;;  %v8402_v13 = vld [vmem:[%s9111_s30 + $0x178] sm:$0xff]  }
 0x7dc   : > { %7941 = vmatprep.subr.bf16.mxu1 %v8350_v14  ;;  %v8403_v14 = vld [vmem:[%s9111_s30 + $0x138] sm:$0xff]  }
 0x7df   : > { %7942 = vmatpush3.bf16.msra.mxu1 %v8351_v15 }
 0x7e0   : > { %7943 = vmatprep.subr.bf16.mxu1 %v8352_v16 }
 0x7e3   : > { %7944 = vmatpush3.bf16.msra.mxu1 %v8353_v48 }
 0x7e4   : > { %7945 = vmatprep.subr.bf16.mxu1 %v8354_v19 }
 0x7e7   : > { %7946 = vmatpush3.bf16.msra.mxu1 %v8355_v45 }
 0x7e8   : > { %7947 = vmatprep.subr.bf16.mxu1 %v8356_v20 }
 0x7eb   : > { %7948 = vmatpush3.bf16.msra.mxu1 %v8357_v21 }
 0x7ec   : > { %7949 = vmatprep.subr.bf16.mxu1 %v8358_v17 }
 0x7ef   : > { %7950 = vmatpush3.bf16.msra.mxu1 %v8359_v18 }
 0x7f0   : > { %7951 = vmatprep.subr.bf16.mxu1 %v8360_v22 }
 0x7f3   : > { %7952 = vmatpush3.bf16.msra.mxu1 %v8361_v27 }
 0x7f4   : > { %7953 = vmatprep.subr.bf16.mxu1 %v8362_v28 }
 0x7f7   : > { %7954 = vmatpush3.bf16.msra.mxu1 %v8363_v23 }
 0x7f8   : > { %8091 = vmatprep.subr.bf16.mxu1 %v8880_v11 }
 0x7fa   : > { %3105 = vmatmul.mubr.bf16.vlgmr.msra.gmra.mrb[44].mxu1 %v9237_v25 }
 0x7fb   : > { %8093 = vmatprep.mubr.msk.bf16.mxu1 %vm8881_vm0, %v8880_v11 }
 0x885   : > { %v2369_v34 = vpop.f32.mrb[32].mxu1 }
 0x886   : > { %v8083_v35 = vpop.f32.mrb[33].mxu1 }
 0x887   : > { %v2372_v36 = vpop.f32.mrb[34].mxu1 }
 0x888   : > { %v8084_v37 = vpop.f32.mrb[35].mxu1 }
 0x88d   : > { %v2415_v38 = vpop.f32.mrb[36].mxu1 }
 0x88e   : > { %v2421_v40 = vpack.c.bf16 %v2415_v38, %v2369_v34  ;;  %v8089_v41 = vpop.f32.mrb[37].mxu1 }
 0x88f   : > { %v2418_v44 = vpop.f32.mrb[38].mxu1 }
 0x890   : > { %v8090_v46 = vpop.f32.mrb[39].mxu1  ;;  %7108 = vmatmul.mubr.msk.bf16.vlgmr.msra.gmra.mrb[16].mxu0 %vm1467_vm1, %v2421_v40 }
 0x891   : > { %2561 = vmatpush1.bf16.msra.mxu0 %v8376_v39  ;;  %2592 = vmatprep.mubr.bf16.mxu0 %v8882_v33 }
 0x892   : > { %2562 = vmatprep.subr.bf16.mxu0 %v8381_v43 }
 0x895   : > { %2563 = vmatpush1.bf16.msra.mxu0 %v8379_v49 }
 0x896   : > { %2564 = vmatprep.subr.bf16.mxu0 %v8384_v50 }
 0x899   : > { %2565 = vmatpush1.bf16.msra.mxu0 %v8382_v52 }
 0x89a   : > { %2566 = vmatprep.subr.bf16.mxu0 %v8387_v56 }
 0x89d   : > { %2567 = vmatpush1.bf16.msra.mxu0 %v8385_v57 }
 0x89e   : > { %7917 = vmatprep.subr.bf16.mxu0 %v8388_v51 }
 0x8a0   : > { %7117 = vmatmul.mubr.msk.bf16.vlgmr.msra.gmra.mrb[16].mxu0 %vm1467_vm1, %v1684_v55  ;;  %v8397_v55 = vld [vmem:[%s9111_s30 + $0x120] sm:$0xff]  }
 0x8a1   : > { %7918 = vmatpush3.bf16.msra.mxu0 %v8389_v58  ;;  %2934 = vmatprep.mubr.bf16.mxu0 %v9239_v26 }
 0x8a2   : > { %7919 = vmatprep.subr.bf16.mxu0 %v8390_v59 }
 0x8a5   : > { %7920 = vmatpush3.bf16.msra.mxu0 %v8391_v60 }
 0x8a6   : > { %7921 = vmatprep.subr.bf16.mxu0 %v8392_v61 }
 0x8a9   : > { %7922 = vmatpush3.bf16.msra.mxu0 %v8393_v62 }
 0x8aa   : > { %7923 = vmatprep.subr.bf16.mxu0 %v8394_v63 }
 0x8ad   : > { %v7911_v54 = vpop.f32.mrb[40].mxu1  ;;  %7924 = vmatpush3.bf16.msra.mxu0 %v8395_v3 }
 0x8ae   : > { %v7912_v4 = vpop.f32.mrb[41].mxu1  ;;  %7925 = vmatprep.subr.bf16.mxu0 %v8396_v47 }
 0x8af   : > { %v7913_v6 = vadd.f32 %v7912_v4, %v7911_v54  ;;  %v7914_v7 = vpop.f32.mrb[42].mxu1  ;;  %v8404_v4 = vld [vmem:[%s9106_s1 + $0x1c0] sm:$0xff]  }
 0x8b0   : > { %v7915_v8 = vpop.f32.mrb[43].mxu1 }
 0x8b1   : > { %v7916_v9 = vadd.f32 %v7915_v8, %v7914_v7  ;;  %7926 = vmatpush3.bf16.msra.mxu0 %v8397_v55  ;;  %v3113_v32 = vpack.c.bf16 %v7913_v6, %v7913_v6 }
 0x8b2   : > { %7927 = vmatprep.subr.bf16.mxu0 %v8398_v5  ;;  %v8438_v5 = vld [vmem:[%s10175_s29 + $0x84] ss:$8 sps:$4 sm:$0xff]  }
 0x8b3   : > { %v3114_v36 = vpack.c.bf16 %v7916_v9, %v7916_v9 }
 0x8b5   : > { %7928 = vmatpush3.bf16.msra.mxu0 %v8399_v10  ;;  %v8436_v10 = vld [vmem:[%s10175_s29 + $0x80] ss:$8 sps:$4 sm:$0xff]  }
 0x8b6   : > { %7929 = vmatprep.subr.bf16.mxu0 %v8400_v12 }
 0x8b9   : > { %7930 = vmatpush3.bf16.msra.mxu0 %v8401_v42  ;;  %v8441_v42 = vld [vmem:[%s10175_s29 + $0x94] ss:$8 sps:$4 sm:$0xff]  }
 0x8ba   : > { %7931 = vmatprep.subr.bf16.mxu0 %v8402_v13  ;;  %v8439_v13 = vld [vmem:[%s10175_s29 + $0x90] ss:$8 sps:$4 sm:$0xff]  }
 0x8bd   : > { %7932 = vmatpush3.bf16.msra.mxu0 %v8403_v14 }
 0x8be   : > { %8103 = vmatprep.subr.bf16.mxu0 %v8880_v11 }
 0x8c0   : > { %2935 = vmatmul.mubr.bf16.vlgmr.msra.gmra.mrb[20].mxu0 %v9237_v25 }
 0x8c1   : > { %8105 = vmatprep.mubr.msk.bf16.mxu0 %vm8881_vm0, %v8880_v11 }
 0x8cd   : > { %v7955_v15 = vpop.f32.mrb[44].mxu1 }
 0x8ce   : > { %v7956_v16 = vpop.f32.mrb[45].mxu1 }
 0x8cf   : > { %v7957_v48 = vadd.f32 %v7956_v16, %v7955_v15  ;;  %v7958_v19 = vpop.f32.mrb[46].mxu1  ;;  %v8405_v16 = vld [vmem:[%s9106_s1 + $0x180] sm:$0xff]  }
 0x8d0   : > { %v7959_v45 = vpop.f32.mrb[47].mxu1 }
 0x8d1   : > { %v3237_v20 = vpack.c.bf16 %v7957_v48, %v7957_v48  ;;  %v7960_v21 = vadd.f32 %v7959_v45, %v7958_v19  ;;  %v8406_v19 = vld [vmem:[%s9106_s1 + $0x1c8] sm:$0xff]  }
 0x8d2   : > { %v8407_v45 = vld [vmem:[%s9106_s1 + $0x188] sm:$0xff]  }
 0x8d3   : > { %v3243_v17 = vsel %vm1594_vm2, %v3237_v20, 0  ;;  %v3238_v35 = vpack.c.bf16 %v7960_v21, %v7960_v21  ;;  %v8408_v20 = vld [vmem:[%s9106_s1 + $0x1d0] sm:$0xff]  }
 0x8d4   : > { %8104 = vmatpush3.bf16.msra.mxu0 %v3243_v17  ;;  %v8409_v21 = vld [vmem:[%s9106_s1 + $0x190] sm:$0xff]   ;;  %v8410_v17 = vld [vmem:[%s9106_s1 + $0x1d8] sm:$0xff]  }
 0x8d5   : > { %v3289_v37 = vsel %vm1594_vm2, %v3238_v35, 0  ;;  %3384 = vmatprep.subr.bf16.mxu0 %v8438_v5  ;;  %v8422_v35 = vld [vmem:[%s9116_s19 + $0x1c8] sm:$0xff]  }
 0x993   : > { %v7933_v18 = vpop.f32.mrb[20].mxu0 }
 0x994   : > { %v7934_v22 = vpop.f32.mrb[21].mxu0 }
 0x995   : > { %v7935_v27 = vadd.f32 %v7934_v22, %v7933_v18  ;;  %v7936_v28 = vpop.f32.mrb[22].mxu0  ;;  %v8411_v18 = vld [vmem:[%s9106_s1 + $0x198] sm:$0xff]   ;;  %v8412_v22 = vld [vmem:[%s9106_s1 + $0x1e0] sm:$0xff]  }
 0x996   : > { %v7937_v23 = vpop.f32.mrb[23].mxu0 }
 0x997   : > { %v3115_v24 = vpack.c.bf16 %v7935_v27, %v7935_v27  ;;  %v7938_v29 = vadd.f32 %v7937_v23, %v7936_v28  ;;  %v8413_v27 = vld [vmem:[%s9106_s1 + $0x1a0] sm:$0xff]   ;;  %v8414_v28 = vld [vmem:[%s9106_s1 + $0x1e8] sm:$0xff]  }
 0x998   : > { %v8415_v23 = vld [vmem:[%s9106_s1 + $0x1a8] sm:$0xff]  }
 0x999   : > { %v3121_v30 = vsel %vm1467_vm1, %v3115_v24, 0  ;;  %v3116_v31 = vpack.c.bf16 %v7938_v29, %v7938_v29  ;;  %v8416_v24 = vld [vmem:[%s9106_s1 + $0x1f0] sm:$0xff]  }
 0x99a   : > { %8092 = vmatpush3.bf16.xpose.msra.mxu1 %v3121_v30  ;;  %v8417_v29 = vld [vmem:[%s9106_s1 + $0x1b0] sm:$0xff]   ;;  %v8418_v30 = vld [vmem:[%s9106_s1 + $0x1f8] sm:$0xff]  }
 0x99b   : > { %8097 = vmatprep.subr.bf16.mxu1 %v8880_v11  ;;  %v3167_v34 = vsel %vm1467_vm1, %v3116_v31, 0  ;;  %v8419_v31 = vld [vmem:[%s9106_s1 + $0x1b8] sm:$0xff]  }
 0x9a1   : > { %8094 = vmatmul.mubr.msk.bf16.vlgmr.msra.gmra.mrb[48].mxu1 %vm1467_vm1, %v3113_v32  ;;  %v8420_v32 = vld [vmem:[%s9116_s19 + $0x1c0] sm:$0xff]  }
 0x9a2   : > { %8098 = vmatpush3.bf16.xpose.msra.mxu1 %v3167_v34  ;;  %8099 = vmatprep.mubr.msk.bf16.mxu1 %vm8881_vm0, %v8880_v11  ;;  %v8421_v34 = vld [vmem:[%s9116_s19 + $0x180] sm:$0xff]  }
 0x9a3   : > { %8109 = vmatprep.subr.bf16.mxu1 %v8880_v11 }
 0x9a9   : > { %8100 = vmatmul.mubr.msk.bf16.vlgmr.msra.gmra.mrb[52].mxu1 %vm1467_vm1, %v3114_v36  ;;  %v8423_v36 = vld [vmem:[%s9116_s19 + $0x188] sm:$0xff]  }
 0x9aa   : > { %8110 = vmatpush3.bf16.msra.mxu1 %v3289_v37  ;;  %8111 = vmatprep.mubr.msk.bf16.mxu1 %vm8881_vm0, %v8880_v11  ;;  %v8424_v37 = vld [vmem:[%s9116_s19 + $0x1d0] sm:$0xff]  }
 0x9ab   : > { %7969 = vmatprep.subr.bf16.mxu1 %v8404_v4  ;;  %v8450_v4 = vld [vmem:[%s9111_s30 + $0x1c8] sm:$0xff]  }
 0xa74   : > { %v3157_v38 = vpop.f32.mrb[48].mxu1 }
 0xa75   : > { %v3209_v39 = vmul.f32 0.125, %v3157_v38  ;;  %v8095_v40 = vpop.f32.mrb[49].mxu1  ;;  %v8425_v38 = vld [vmem:[%s9116_s19 + $0x190] sm:$0xff]  }
 0xa76   : > { %v3160_v41 = vpop.f32.mrb[50].mxu1  ;;  %v8427_v40 = vld [vmem:[%s9116_s19 + $0x198] sm:$0xff]  }
 0xa77   : > { %v8096_v43 = vpop.f32.mrb[51].mxu1  ;;  %v3211_v44 = vadd.f32 %v3209_v39, %v9324_v53  ;;  %v8426_v39 = vld [vmem:[%s9116_s19 + $0x1d8] sm:$0xff]   ;;  %v8428_v41 = vld [vmem:[%s9116_s19 + $0x1e0] sm:$0xff]  }
 0xa78   : > { %v8429_v43 = vld [vmem:[%s9116_s19 + $0x1a0] sm:$0xff]  }
 0xa79   : > { %v3213_v46 = vsel %vm1564_vm3, %v3211_v44, -inf }
 0xa7a   : > { %3214 = vmax.xlane.f32.xlu0 %v3213_v46  ;;  %v8431_v46 = vld [vmem:[%s9116_s19 + $0x1a8] sm:$0xff]  }
 0xa7c   : > { %v3203_v49 = vpop.f32.mrb[52].mxu1 }
 0xa7d   : > { %v3210_v50 = vmul.f32 0.125, %v3203_v49  ;;  %v8101_v52 = vpop.f32.mrb[53].mxu1  ;;  %v8432_v49 = vld [vmem:[%s9116_s19 + $0x1f0] sm:$0xff]  }
 0xa7e   : > { %v3206_v56 = vpop.f32.mrb[54].mxu1  ;;  %v8434_v52 = vld [vmem:[%s9116_s19 + $0x1f8] sm:$0xff]  }
 0xa7f   : > { %v8102_v57 = vpop.f32.mrb[55].mxu1  ;;  %v3212_v51 = vadd.f32 %v3210_v50, %v9324_v53  ;;  %v8433_v50 = vld [vmem:[%s9116_s19 + $0x1b0] sm:$0xff]   ;;  %v8435_v56 = vld [vmem:[%s9116_s19 + $0x1b8] sm:$0xff]  }
 0xa80   : > { %v8444_v57 = vld [vmem:[%s10175_s29 + $0xa4] ss:$8 sps:$4 sm:$0xff]  }
 0xa81   : > { %v3216_v58 = vsel %vm1564_vm3, %v3212_v51, -inf }
 0xa82   : > { %3217 = vmax.xlane.f32.xlu1 %v3216_v58  ;;  %v8447_v58 = vld [vmem:[%s10175_s29 + $0xb4] ss:$8 sps:$4 sm:$0xff]  }
 0xb07   : > { %v3215_v59 = vpop.xlane.xlu0 %3214 }
 0xb08   : > { %v3219_v60 = vsub.f32 %v3211_v44, %v3215_v59  ;;  %v8430_v44 = vld [vmem:[%s9116_s19 + $0x1e8] sm:$0xff]   ;;  %v8445_v59 = vld [vmem:[%s10175_s29 + $0xb0] ss:$8 sps:$4 sm:$0xff]  }
 0xb0a   : > { %v3221_v61 = vmul.f32 1.442695, %v3219_v60  ;;  %v8448_v60 = vld [vmem:[%s9111_s30 + $0x1c0] sm:$0xff]  }
 0xb0c   : > { %8688 = vpow2.f32 %v3221_v61 }
 0xb0f   : > { %v3218_v62 = vpop.xlane.xlu1 %3217 }
 0xb10   : > { %v3220_v63 = vsub.f32 %v3212_v51, %v3218_v62  ;;  %v8442_v51 = vld [vmem:[%s10175_s29 + $0xa0] ss:$8 sps:$4 sm:$0xff]  }
 0xb12   : > { %v3223_v3 = vmul.f32 1.442695, %v3220_v63 }
 0xb14   : > { %8690 = vpow2.f32 %v3223_v3 }
 0xb16   : > { %v8689_v47 = vpop.eup %8688 }
 0xb17   : > { %v3225_v54 = vsel %vm1564_vm3, %v8689_v47, 0.0 }
 0xb18   : > { %3226 = vadd.xlane.f32.xlu0 %v3225_v54  ;;  %v8449_v54 = vld [vmem:[%s9111_s30 + $0x180] sm:$0xff]  }
 0xb1e   : > { %v8691_v53 = vpop.eup %8690 }
 0xb1f   : > { %v3228_v55 = vsel %vm1564_vm3, %v8691_v53, 0.0 }
 0xb20   : > { %3229 = vadd.xlane.f32.xlu1 %v3228_v55 }
 0xba5   : > { %v3227_v6 = vpop.xlane.xlu0 %3226 }
 0xba6   : > { %8692 = vrcp.f32 %v3227_v6 }
 0xbad   : > { %v3230_v7 = vpop.xlane.xlu1 %3229 }
 0xbae   : > { %8694 = vrcp.f32 %v3230_v7  ;;  %v8451_v7 = vld [vmem:[%s9111_s30 + $0x188] sm:$0xff]  }
 0xbb0   : > { %v8693_v8 = vpop.eup %8692 }
 0xbb1   : > { %v3233_v9 = vmul.f32 %v8693_v8, %v8689_v47  ;;  %v8452_v8 = vld [vmem:[%s9111_s30 + $0x1d0] sm:$0xff]  }
 0xbb3   : > { %v3235_v12 = vpack.c.bf16 %v3233_v9, %v3233_v9  ;;  %v8453_v9 = vld [vmem:[%s9111_s30 + $0x190] sm:$0xff]  }
 0xbb5   : > { %8106 = vmatmul.mubr.msk.bf16.vlgmr.msra.gmra.mrb[24].mxu0 %vm1564_vm3, %v3235_v12  ;;  %v8455_v12 = vld [vmem:[%s9111_s30 + $0x198] sm:$0xff]  }
 0xbb6   : > { %3385 = vmatpush1.bf16.msra.mxu0 %v8436_v10  ;;  %3416 = vmatprep.mubr.bf16.mxu0 %v8882_v33  ;;  %v8454_v10 = vld [vmem:[%s9111_s30 + $0x1d8] sm:$0xff]  }
 0xbb7   : > { %3386 = vmatprep.subr.bf16.mxu0 %v8441_v42  ;;  %v8456_v42 = vld [vmem:[%s9111_s30 + $0x1e0] sm:$0xff]  }
 0xbb8   : > { %v8695_v14 = vpop.eup %8694 }
 0xbb9   : > { %v3234_v15 = vmul.f32 %v8695_v14, %v8691_v53  ;;  %v8459_v14 = vld [vmem:[%s9111_s30 + $0x1a8] sm:$0xff]  }
 0xbba   : > { %3387 = vmatpush1.bf16.msra.mxu0 %v8439_v13  ;;  %v8457_v13 = vld [vmem:[%s9111_s30 + $0x1a0] sm:$0xff]  }
 0xbbb   : > { %v3236_v48 = vpack.c.bf16 %v3234_v15, %v3234_v15  ;;  %3388 = vmatprep.subr.bf16.mxu0 %v8444_v57  ;;  %v8460_v15 = vld [vmem:[%s9111_s30 + $0x1f0] sm:$0xff]  }
 0xbbd   : > { %8112 = vmatmul.mubr.msk.bf16.vlgmr.msra.gmra.mrb[56].mxu1 %vm1564_vm3, %v3236_v48  ;;  %v8462_v48 = vld [vmem:[%s9111_s30 + $0x1f8] sm:$0xff]  }
 0xbbe   : > { %7970 = vmatpush3.bf16.msra.mxu1 %v8405_v16  ;;  %3592 = vmatprep.mubr.bf16.mxu1 %v9239_v26  ;;  %v8461_v16 = vld [vmem:[%s9111_s30 + $0x1b0] sm:$0xff]  }
 0xbbf   : > { %7971 = vmatprep.subr.bf16.mxu1 %v8406_v19  ;;  %3389 = vmatpush1.bf16.msra.mxu0 %v8442_v51  ;;  %v8463_v19 = vld [vmem:[%s9111_s30 + $0x1b8] sm:$0xff]  }
 0xbc0   : > { %3390 = vmatprep.subr.bf16.mxu0 %v8447_v58 }
 0xbc2   : > { %7972 = vmatpush3.bf16.msra.mxu1 %v8407_v45 }
 0xbc3   : > { %7973 = vmatprep.subr.bf16.mxu1 %v8408_v20  ;;  %3391 = vmatpush1.bf16.msra.mxu0 %v8445_v59  ;;  %v8708_v59 = vld [vmem:[%s10174_s18] sm:$0xff] }
 0xbc4   : > { %7991 = vmatprep.subr.bf16.mxu0 %v8448_v60 }
 0xbc6   : > { %7974 = vmatpush3.bf16.msra.mxu1 %v8409_v21 }
 0xbc7   : > { %7975 = vmatprep.subr.bf16.mxu1 %v8410_v17 }
 0xbca   : > { %7976 = vmatpush3.bf16.msra.mxu1 %v8411_v18 }
 0xbcb   : > { %7977 = vmatprep.subr.bf16.mxu1 %v8412_v22 }
 0xbce   : > { %7978 = vmatpush3.bf16.msra.mxu1 %v8413_v27 }
 0xbcf   : > { %7979 = vmatprep.subr.bf16.mxu1 %v8414_v28 }
 0xbd2   : > { %7980 = vmatpush3.bf16.msra.mxu1 %v8415_v23 }
 0xbd3   : > { %7981 = vmatprep.subr.bf16.mxu1 %v8416_v24 }
 0xbd6   : > { %7982 = vmatpush3.bf16.msra.mxu1 %v8417_v29 }
 0xbd7   : > { %7983 = vmatprep.subr.bf16.mxu1 %v8418_v30 }
 0xbda   : > { %7984 = vmatpush3.bf16.msra.mxu1 %v8419_v31 }
 0xbdb   : > { %8013 = vmatprep.subr.bf16.mxu1 %v8420_v32 }
 0xbdd   : > { %3593 = vmatmul.mubr.bf16.vlgmr.msra.gmra.mrb[60].mxu1 %v9237_v25 }
 0xbde   : > { %8014 = vmatpush3.bf16.msra.mxu1 %v8421_v34  ;;  %3932 = vmatprep.mubr.bf16.mxu1 %v9239_v26 }
 0xbdf   : > { %8015 = vmatprep.subr.bf16.mxu1 %v8422_v35 }
 0xbe2   : > { %8016 = vmatpush3.bf16.msra.mxu1 %v8423_v36 }
 0xbe3   : > { %8017 = vmatprep.subr.bf16.mxu1 %v8424_v37 }
 0xbe6   : > { %8018 = vmatpush3.bf16.msra.mxu1 %v8425_v38 }
 0xbe7   : > { %8019 = vmatprep.subr.bf16.mxu1 %v8426_v39 }
 0xbea   : > { %8020 = vmatpush3.bf16.msra.mxu1 %v8427_v40 }
 0xbeb   : > { %8021 = vmatprep.subr.bf16.mxu1 %v8428_v41 }
 0xbee   : > { %8022 = vmatpush3.bf16.msra.mxu1 %v8429_v43 }
 0xbef   : > { %8023 = vmatprep.subr.bf16.mxu1 %v8430_v44 }
 0xbf2   : > { %8024 = vmatpush3.bf16.msra.mxu1 %v8431_v46 }
 0xbf3   : > { %8025 = vmatprep.subr.bf16.mxu1 %v8432_v49 }
 0xbf6   : > { %8026 = vmatpush3.bf16.msra.mxu1 %v8433_v50 }
 0xbf7   : > { %8027 = vmatprep.subr.bf16.mxu1 %v8434_v52 }
 0xbfa   : > { %8028 = vmatpush3.bf16.msra.mxu1 %v8435_v56 }
 0xbfb   : > { %8133 = vmatprep.subr.bf16.mxu1 %v8880_v11 }
 0xbfd   : > { %3933 = vmatmul.mubr.bf16.vlgmr.msra.gmra.mrb[64].mxu1 %v9237_v25 }
 0xbfe   : > { %8135 = vmatprep.mubr.msk.bf16.mxu1 %vm8881_vm0, %v8880_v11 }
 0xc88   : > { %v3279_v61 = vpop.f32.mrb[24].mxu0 }
 0xc89   : > { %v8107_v62 = vpop.f32.mrb[25].mxu0 }
 0xc8a   : > { %v3282_v63 = vpop.f32.mrb[26].mxu0 }
 0xc8b   : > { %v8108_v3 = vpop.f32.mrb[27].mxu0 }
 0xc90   : > { %v3325_v47 = vpop.f32.mrb[56].mxu1 }
 0xc91   : > { %v3331_v53 = vpack.c.bf16 %v3325_v47, %v3279_v61  ;;  %v8113_v55 = vpop.f32.mrb[57].mxu1 }
 0xc92   : > { %v3328_v5 = vpop.f32.mrb[58].mxu1 }
 0xc93   : > { %v8114_v6 = vpop.f32.mrb[59].mxu1  ;;  %7282 = vmatmul.mubr.msk.bf16.vlgmr.msra.gmra.mrb[16].mxu0 %vm1467_vm1, %v3331_v53 }
 0xc94   : > { %7992 = vmatpush3.bf16.msra.mxu0 %v8449_v54  ;;  %3762 = vmatprep.mubr.bf16.mxu0 %v9239_v26  ;;  %v8458_v26 = vld [vmem:[%s9111_s30 + $0x1e8] sm:$0xff]  }
 0xc95   : > { %7993 = vmatprep.subr.bf16.mxu0 %v8450_v4 }
 0xc98   : > { %7994 = vmatpush3.bf16.msra.mxu0 %v8451_v7 }
 0xc99   : > { %7995 = vmatprep.subr.bf16.mxu0 %v8452_v8 }
 0xc9c   : > { %7996 = vmatpush3.bf16.msra.mxu0 %v8453_v9 }
 0xc9d   : > { %7997 = vmatprep.subr.bf16.mxu0 %v8454_v10 }
 0xca0   : > { %7998 = vmatpush3.bf16.msra.mxu0 %v8455_v12 }
 0xca1   : > { %7999 = vmatprep.subr.bf16.mxu0 %v8456_v42 }
 0xca4   : > { %8000 = vmatpush3.bf16.msra.mxu0 %v8457_v13  ;;  %v8466_v13 = vld [vmem:[%s10175_s29 + $0xc4] ss:$8 sps:$4 sm:$0xff]  }
 0xca5   : > { %8001 = vmatprep.subr.bf16.mxu0 %v8458_v26 }
 0xca8   : > { %8002 = vmatpush3.bf16.msra.mxu0 %v8459_v14 }
 0xca9   : > { %8003 = vmatprep.subr.bf16.mxu0 %v8460_v15 }
 0xcac   : > { %8004 = vmatpush3.bf16.msra.mxu0 %v8461_v16 }
 0xcad   : > { %8005 = vmatprep.subr.bf16.mxu0 %v8462_v48  ;;  %v8464_v48 = vld [vmem:[%s10175_s29 + $0xc0] ss:$8 sps:$4 sm:$0xff]  }
 0xcb0   : > { %v7985_v45 = vpop.f32.mrb[60].mxu1  ;;  %8006 = vmatpush3.bf16.msra.mxu0 %v8463_v19 }
 0xcb1   : > { %v7986_v20 = vpop.f32.mrb[61].mxu1  ;;  %8115 = vmatprep.subr.bf16.mxu0 %v8880_v11 }
 0xcb2   : > { %v7987_v21 = vadd.f32 %v7986_v20, %v7985_v45  ;;  %v7988_v17 = vpop.f32.mrb[62].mxu1  ;;  %v8469_v45 = vld [vmem:[%s10175_s29 + $0xd4] ss:$8 sps:$4 sm:$0xff]   ;;  %v8467_v20 = vld [vmem:[%s10175_s29 + $0xd0] ss:$8 sps:$4 sm:$0xff]  }
 0xcb3   : > { %v7989_v18 = vpop.f32.mrb[63].mxu1  ;;  %3763 = vmatmul.mubr.bf16.vlgmr.msra.gmra.mrb[28].mxu0 %v9237_v25 }
 0xcb4   : > { %v7990_v22 = vadd.f32 %v7989_v18, %v7988_v17  ;;  %8117 = vmatprep.mubr.msk.bf16.mxu0 %vm8881_vm0, %v8880_v11  ;;  %v3941_v43 = vpack.c.bf16 %v7987_v21, %v7987_v21 }
 0xcb6   : > { %v3942_v49 = vpack.c.bf16 %v7990_v22, %v7990_v22  ;;  %v8472_v22 = vld [vmem:[%s10175_s29 + $0xe4] ss:$8 sps:$4 sm:$0xff]  }
 0xcd0   : > { %v8029_v27 = vpop.f32.mrb[64].mxu1 }
 0xcd1   : > { %v8030_v28 = vpop.f32.mrb[65].mxu1 }
 0xcd2   : > { %v8031_v23 = vadd.f32 %v8030_v28, %v8029_v27  ;;  %v8032_v24 = vpop.f32.mrb[66].mxu1  ;;  %v8470_v27 = vld [vmem:[%s10175_s29 + $0xe0] ss:$8 sps:$4 sm:$0xff]   ;;  %v8475_v28 = vld [vmem:[%s10175_s29 + $0xf4] ss:$8 sps:$4 sm:$0xff]  }
 0xcd3   : > { %v8033_v29 = vpop.f32.mrb[67].mxu1 }
 0xcd4   : > { %v8034_v30 = vadd.f32 %v8033_v29, %v8032_v24  ;;  %v4065_v46 = vpack.c.bf16 %v8031_v23, %v8031_v23  ;;  %v8473_v23 = vld [vmem:[%s10175_s29 + $0xf0] ss:$8 sps:$4 sm:$0xff]  }
 0xcd6   : > { %v4066_v31 = vpack.c.bf16 %v8034_v30, %v8034_v30  ;;  %v4071_v50 = vsel %vm1594_vm2, %v4065_v46, 0  ;;  %v8709_v46 = vld [vmem:[#allocation2] sm:$0xff] }
 0xcd8   : > { %v4117_v32 = vsel %vm1594_vm2, %v4066_v31, 0 }
 0xcd9   : > { %8134 = vmatpush3.bf16.msra.mxu1 %v4117_v32 }
 0xd86   : > { %v8007_v34 = vpop.f32.mrb[28].mxu0 }
 0xd87   : > { %v8008_v35 = vpop.f32.mrb[29].mxu0 }
 0xd88   : > { %v8009_v36 = vadd.f32 %v8008_v35, %v8007_v34  ;;  %v8010_v37 = vpop.f32.mrb[30].mxu0 }
 0xd89   : > { %v8011_v38 = vpop.f32.mrb[31].mxu0 }
 0xd8a   : > { %v3943_v25 = vpack.c.bf16 %v8009_v36, %v8009_v36  ;;  %v8012_v39 = vadd.f32 %v8011_v38, %v8010_v37  ;;  %v4259_v37 = vld [vmem:[%s10176_s23] sm:$0x3] }
 0xd8b   : > { %v4264_v38 = vrot.slane %v4259_v37, %v9214_v1 }
 0xd8c   : > { %v3949_v40 = vsel %vm1467_vm1, %v3943_v25, 0  ;;  %v3944_v41 = vpack.c.bf16 %v8012_v39, %v8012_v39  ;;  %v4268_v25 = vrot.slane %v4259_v37, %v9217_v2 }
 0xd8d   : > { %8116 = vmatpush3.bf16.xpose.msra.mxu0 %v3949_v40 }
 0xd8e   : > { %8121 = vmatprep.subr.bf16.mxu0 %v8880_v11  ;;  %v3995_v44 = vsel %vm1467_vm1, %v3944_v41, 0 }
 0xd94   : > { %8118 = vmatmul.mubr.msk.bf16.vlgmr.msra.gmra.mrb[32].mxu0 %vm1467_vm1, %v3941_v43 }
 0xd95   : > { %8122 = vmatpush3.bf16.xpose.msra.mxu0 %v3995_v44  ;;  %8123 = vmatprep.mubr.msk.bf16.mxu0 %vm8881_vm0, %v8880_v11 }
 0xd96   : > { %8127 = vmatprep.subr.bf16.mxu0 %v8880_v11 }
 0xd9c   : > { %8124 = vmatmul.mubr.msk.bf16.vlgmr.msra.gmra.mrb[36].mxu0 %vm1467_vm1, %v3942_v49 }
 0xd9d   : > { %8128 = vmatpush3.bf16.msra.mxu0 %v4071_v50  ;;  %8129 = vmatprep.mubr.msk.bf16.mxu0 %vm8881_vm0, %v8880_v11 }
 0xd9e   : > { %4212 = vmatprep.subr.bf16.mxu0 %v8466_v13  ;;  %v4377_v13 = vld [vmem:[%s9133_s17 + $0x100] sm:$0xff] }
 0xe67   : > { %v3985_v52 = vpop.f32.mrb[32].mxu0 }
 0xe68   : > { %v4037_v56 = vmul.f32 0.125, %v3985_v52  ;;  %v8119_v57 = vpop.f32.mrb[33].mxu0 }
 0xe69   : > { %v3988_v51 = vpop.f32.mrb[34].mxu0 }
 0xe6a   : > { %v8120_v58 = vpop.f32.mrb[35].mxu0  ;;  %v4039_v60 = vadd.f32 %v8708_v59, %v4037_v56  ;;  %v8710_v56 = vld [vmem:[#allocation2 + $0x8] sm:$0xff] }
 0xe6b   : > { %v8711_v58 = vld [vmem:[#allocation2 + $0x10] sm:$0xff] }
 0xe6c   : > { %v4041_v61 = vsel %vm1564_vm3, %v4039_v60, -inf }
 0xe6d   : > { %4042 = vmax.xlane.f32.xlu0 %v4041_v61 }
 0xe6f   : > { %v4031_v62 = vpop.f32.mrb[36].mxu0 }
 0xe70   : > { %v4038_v63 = vmul.f32 0.125, %v4031_v62  ;;  %v8125_v3 = vpop.f32.mrb[37].mxu0 }
 0xe71   : > { %v4034_v47 = vpop.f32.mrb[38].mxu0  ;;  %v4345_v3 = vld [vmem:[%s9133_s17] sm:$0xff] }
 0xe72   : > { %v8126_v54 = vpop.f32.mrb[39].mxu0  ;;  %v4040_v53 = vadd.f32 %v8708_v59, %v4038_v63  ;;  %v4349_v47 = vld [vmem:[%s9133_s17 + $0x20] sm:$0xff] }
 0xe73   : > { %v4353_v54 = vld [vmem:[%s9133_s17 + $0x40] sm:$0xff] }
 0xe74   : > { %v4044_v11 = vsel %vm1564_vm3, %v4040_v53, -inf }
 0xe75   : > { %4045 = vmax.xlane.f32.xlu1 %v4044_v11  ;;  %v7449_v11 = vcombine.high %v4345_v3, %v4349_v47 }
 0xefa   : > { %v4043_v55 = vpop.xlane.xlu0 %4042 }
 0xefb   : > { %v4047_v4 = vsub.f32 %v4039_v60, %v4043_v55  ;;  %v8712_v60 = vld [vmem:[#allocation2 + $0x18] sm:$0xff]  ;;  %v4357_v55 = vld [vmem:[%s9133_s17 + $0x60] sm:$0xff] }
 0xefd   : > { %v4049_v5 = vmul.f32 1.442695, %v4047_v4  ;;  %v7457_v4 = vcombine.high %v4353_v54, %v4357_v55 }
 0xeff   : > { %8696 = vpow2.f32 %v4049_v5  ;;  %v4361_v5 = vld [vmem:[%s9133_s17 + $0x80] sm:$0xff] }
 0xf02   : > { %v4046_v6 = vpop.xlane.xlu1 %4045 }
 0xf03   : > { %v4048_v7 = vsub.f32 %v4040_v53, %v4046_v6  ;;  %v7448_v53 = vcombine.low %v4345_v3, %v4349_v47  ;;  %v4365_v6 = vld [vmem:[%s9133_s17 + $0xa0] sm:$0xff] }
 0xf04   : > { %v4433_v47 = vld [vmem:[%s9133_s17 + $0x2c0] sm:$0xff] }
 0xf05   : > { %v4051_v8 = vmul.f32 1.442695, %v4048_v7  ;;  %v7456_v7 = vcombine.low %v4353_v54, %v4357_v55  ;;  %v4437_v54 = vld [vmem:[%s9133_s17 + $0x2e0] sm:$0xff] }
 0xf06   : > { %v4441_v55 = vld [vmem:[%s9133_s17 + $0x300] sm:$0xff] }
 0xf07   : > { %8698 = vpow2.f32 %v4051_v8  ;;  %v7465_v8 = vcombine.high %v4361_v5, %v4365_v6 }
 0xf09   : > { %v8697_v9 = vpop.eup %8696 }
 0xf0a   : > { %v4053_v10 = vsel %vm1564_vm3, %v8697_v9, 0.0 }
 0xf0b   : > { %4054 = vadd.xlane.f32.xlu0 %v4053_v10  ;;  %v4373_v10 = vld [vmem:[%s9133_s17 + $0xe0] sm:$0xff] }
 0xf11   : > { %v8699_v12 = vpop.eup %8698 }
 0xf12   : > { %v4056_v42 = vsel %vm1564_vm3, %v8699_v12, 0.0 }
 0xf13   : > { %4057 = vadd.xlane.f32.xlu1 %v4056_v42 }
 0xf98   : > { %v4055_v26 = vpop.xlane.xlu0 %4054 }
 0xf99   : > { %8700 = vrcp.f32 %v4055_v26  ;;  %v4381_v26 = vld [vmem:[%s9133_s17 + $0x120] sm:$0xff] }
 0xfa0   : > { %v4058_v14 = vpop.xlane.xlu1 %4057 }
 0xfa1   : > { %8702 = vrcp.f32 %v4058_v14 }
 0xfa3   : > { %v8701_v15 = vpop.eup %8700 }
 0xfa4   : > { %v4061_v16 = vmul.f32 %v8701_v15, %v8697_v9  ;;  %v4369_v9 = vld [vmem:[%s9133_s17 + $0xc0] sm:$0xff]  ;;  %v7481_v15 = vcombine.high %v4377_v13, %v4381_v26 }
 0xfa5   : > { %v7473_v42 = vcombine.high %v4369_v9, %v4373_v10  ;;  %v7472_v14 = vcombine.low %v4369_v9, %v4373_v10 }
 0xfa6   : > { %v4063_v19 = vpack.c.bf16 %v4061_v16, %v4061_v16  ;;  %v4385_v16 = vld [vmem:[%s9133_s17 + $0x140] sm:$0xff] }
 0xfa8   : > { %8130 = vmatmul.mubr.msk.bf16.vlgmr.msra.gmra.mrb[40].mxu0 %vm1564_vm3, %v4063_v19  ;;  %v7480_v19 = vcombine.low %v4377_v13, %v4381_v26 }
 0xfa9   : > { %4213 = vmatpush1.bf16.msra.mxu0 %v8464_v48  ;;  %4244 = vmatprep.mubr.bf16.mxu0 %v8882_v33  ;;  %v4389_v48 = vld [vmem:[%s9133_s17 + $0x160] sm:$0xff] }
 0xfaa   : > { %4214 = vmatprep.subr.bf16.mxu0 %v8469_v45  ;;  %v7489_v45 = vcombine.high %v4385_v16, %v4389_v48 }
 0xfab   : > { %v8703_v21 = vpop.eup %8702 }
 0xfac   : > { %v4062_v17 = vmul.f32 %v8703_v21, %v8699_v12  ;;  %v7464_v12 = vcombine.low %v4361_v5, %v4365_v6  ;;  %v4397_v21 = vld [vmem:[%s9133_s17 + $0x1a0] sm:$0xff] }
 0xfad   : > { %4215 = vmatpush1.bf16.msra.mxu0 %v8467_v20  ;;  %v4393_v20 = vld [vmem:[%s9133_s17 + $0x180] sm:$0xff] }
 0xfae   : > { %v4064_v18 = vpack.c.bf16 %v4062_v17, %v4062_v17  ;;  %4216 = vmatprep.subr.bf16.mxu0 %v8472_v22  ;;  %v7488_v17 = vcombine.low %v4385_v16, %v4389_v48  ;;  %v4401_v22 = vld [vmem:[%s9133_s17 + $0x1c0] sm:$0xff] }
 0xfb0   : > { %8136 = vmatmul.mubr.msk.bf16.vlgmr.msra.gmra.mrb[68].mxu1 %vm1564_vm3, %v4064_v18  ;;  %v7497_v18 = vcombine.high %v4393_v20, %v4397_v21 }
 0xfb1   : > { %4217 = vmatpush1.bf16.msra.mxu0 %v8470_v27  ;;  %v4405_v27 = vld [vmem:[%s9133_s17 + $0x1e0] sm:$0xff] }
 0xfb2   : > { %4218 = vmatprep.subr.bf16.mxu0 %v8475_v28  ;;  %v7496_v28 = vcombine.low %v4393_v20, %v4397_v21 }
 0xfb5   : > { %4219 = vmatpush1.bf16.msra.mxu0 %v8473_v23  ;;  %v7505_v23 = vcombine.high %v4401_v22, %v4405_v27 }
 0xfb6   : > { %5155 = vmatprep.subr.bf16.mxu0 %v7449_v11  ;;  %v7536_v11 = vcombine.low %v4433_v47, %v4437_v54 }
0x107b   : > { %v4107_v24 = vpop.f32.mrb[40].mxu0 }
0x107c   : > { %v8131_v29 = vpop.f32.mrb[41].mxu0 }
0x107d   : > { %v4110_v30 = vpop.f32.mrb[42].mxu0  ;;  %v4413_v29 = vld [vmem:[%s9133_s17 + $0x220] sm:$0xff] }
0x107e   : > { %v8132_v33 = vpop.f32.mrb[43].mxu0  ;;  %v7504_v30 = vcombine.low %v4401_v22, %v4405_v27 }
0x1083   : > { %v4153_v31 = vpop.f32.mrb[68].mxu1 }
0x1084   : > { %v4159_v32 = vpack.c.bf16 %v4153_v31, %v4107_v24  ;;  %v8137_v34 = vpop.f32.mrb[69].mxu1  ;;  %v4409_v24 = vld [vmem:[%s9133_s17 + $0x200] sm:$0xff] }
0x1085   : > { %v4156_v35 = vpop.f32.mrb[70].mxu1  ;;  %v7513_v33 = vcombine.high %v4409_v24, %v4413_v29  ;;  %v4417_v31 = vld [vmem:[%s9133_s17 + $0x240] sm:$0xff]  ;;  %v7512_v34 = vcombine.low %v4409_v24, %v4413_v29 }
0x1086   : > { %v8138_v36 = vpop.f32.mrb[71].mxu1  ;;  %7447 = vmatmul.mubr.msk.bf16.vlgmr.msra.gmra.mrb[16].mxu0 %vm1467_vm1, %v4159_v32  ;;  %v4421_v32 = vld [vmem:[%s9133_s17 + $0x260] sm:$0xff] }
0x1087   : > { %5156 = vmatpush1.bf16.msra.mxu0 %v7448_v53  ;;  %v7521_v35 = vcombine.high %v4417_v31, %v4421_v32  ;;  %v7520_v36 = vcombine.low %v4417_v31, %v4421_v32  ;;  %v7537_v53 = vcombine.high %v4433_v47, %v4437_v54  ;;  %v4279_v24 = vld [vmem:[%s847_s7] sm:$0x3] }
0x1088   : > { %5157 = vmatprep.subr.bf16.mxu0 %v7457_v4  ;;  %v4445_v4 = vld [vmem:[%s9133_s17 + $0x320] sm:$0xff] }
0x1089   : > { %v7545_v5 = vcombine.high %v4441_v55, %v4445_v4  ;;  %v7544_v6 = vcombine.low %v4441_v55, %v4445_v4  ;;  %v4280_v29 = vld [vmem:[%s10177_s3] sm:$0x3]  ;;  %s10182_s3 = sld [smem:[#allocation25_spill]] (!%p7704_p9) }
0x108b   : > { %5158 = vmatpush1.bf16.msra.mxu0 %v7456_v7  ;;  %v4449_v7 = vld [vmem:[%s9133_s17 + $0x340] sm:$0xff] }
0x108c   : > { %5159 = vmatprep.subr.bf16.mxu0 %v7465_v8  ;;  %v4453_v8 = vld [vmem:[%s9133_s17 + $0x360] sm:$0xff] }
0x108d   : > { %v7553_v9 = vcombine.high %v4449_v7, %v4453_v8  ;;  %v7552_v10 = vcombine.low %v4449_v7, %v4453_v8 }
0x108f   : > { %5160 = vmatpush1.bf16.msra.mxu0 %v7464_v12  ;;  %v4457_v12 = vld [vmem:[%s9133_s17 + $0x380] sm:$0xff] }
0x1090   : > { %5161 = vmatprep.subr.bf16.mxu0 %v7473_v42  ;;  %v4461_v42 = vld [vmem:[%s9133_s17 + $0x3a0] sm:$0xff] }
0x1091   : > { %v7561_v13 = vcombine.high %v4457_v12, %v4461_v42  ;;  %v7560_v26 = vcombine.low %v4457_v12, %v4461_v42 }
0x1093   : > { %5162 = vmatpush1.bf16.msra.mxu0 %v7472_v14  ;;  %v4465_v14 = vld [vmem:[%s9133_s17 + $0x3c0] sm:$0xff] }
0x1094   : > { %5163 = vmatprep.subr.bf16.mxu0 %v7481_v15  ;;  %v4469_v15 = vld [vmem:[%s9133_s17 + $0x3e0] sm:$0xff] }
0x1095   : > { %v7568_v16 = vcombine.low %v4465_v14, %v4469_v15  ;;  %v7569_v48 = vcombine.high %v4465_v14, %v4469_v15 }
0x1097   : > { %5164 = vmatpush1.bf16.msra.mxu0 %v7480_v19  ;;  %v4346_v19 = vld [vmem:[%s9133_s17 + $0x8] sm:$0xff] }
0x1098   : > { %5165 = vmatprep.subr.bf16.mxu0 %v7489_v45  ;;  %v4350_v45 = vld [vmem:[%s9133_s17 + $0x28] sm:$0xff] }
0x1099   : > { %v7451_v20 = vcombine.high %v4346_v19, %v4350_v45  ;;  %v7450_v21 = vcombine.low %v4346_v19, %v4350_v45 }
0x109b   : > { %5166 = vmatpush1.bf16.msra.mxu0 %v7488_v17 }
0x109c   : > { %5167 = vmatprep.subr.bf16.mxu0 %v7497_v18 }
0x109f   : > { %5168 = vmatpush1.bf16.msra.mxu0 %v7496_v28 }
0x10a0   : > { %5169 = vmatprep.subr.bf16.mxu0 %v7505_v23 }
0x10a3   : > { %5170 = vmatpush1.bf16.msra.mxu0 %v7504_v30  ;;  %v4321_v30 = vrot.slane %v4279_v24, %v9217_v2 }
0x10a4   : > { %5171 = vmatprep.subr.bf16.mxu0 %v7513_v33  ;;  %v4317_v33 = vrot.slane %v4279_v24, %v9214_v1  ;;  %v8476_v24 = vld [vmem:[%s9143_s0] ss:$8 sps:$4 sm:$0xff]  }
0x10a7   : > { %5172 = vmatpush1.bf16.msra.mxu0 %v7512_v34 }
0x10a8   : > { %5173 = vmatprep.subr.bf16.mxu0 %v7521_v35 }
0x10ab   : > { %5174 = vmatpush1.bf16.msra.mxu0 %v7520_v36  ;;  %v4336_v36 = vrot.slane %v4280_v29, %v9217_v2 }
0x1159   : > { %v4246_v39 = vpop.f32.mrb[16].mxu0 }
0x115a   : > { %v4271_v40 = vadd.f32 %v4264_v38, %v4246_v39  ;;  %v4248_v41 = vpop.f32.mrb[17].mxu0 }
0x115b   : > { %v4272_v43 = vadd.f32 %v4268_v25, %v4248_v41  ;;  %v4250_v44 = vpop.f32.mrb[18].mxu0 }
0x115c   : > { %v9606_v49 = vadd.f32 %v8709_v46, %v4271_v40  ;;  %v4273_v50 = vadd.f32 %v4264_v38, %v4250_v44  ;;  %v4252_v52 = vpop.f32.mrb[19].mxu0 }
0x115d   : > { %v9608_v57 = vadd.f32 %v8710_v56, %v4272_v43  ;;  %v4274_v51 = vadd.f32 %v4268_v25, %v4252_v52 }
0x115e   : > { %v9610_v59 = vadd.f32 %v8711_v58, %v4273_v50 }
0x115f   : > { %v9612_v61 = vadd.f32 %v8712_v60, %v4274_v51  ;;  %v4281_v62 = vadd.f32 %v9608_v57, %v9606_v49  ;;  %v4425_v60 = vld [vmem:[%s9133_s17 + $0x280] sm:$0xff] }
0x1161   : > { %4282 = vadd.xlane.f32.xlu0 %v4281_v62  ;;  %v4284_v63 = vadd.f32 %v9612_v61, %v9610_v59  ;;  %v4429_v62 = vld [vmem:[%s9133_s17 + $0x2a0] sm:$0xff] }
0x1162   : > { %v7528_v3 = vcombine.low %v4425_v60, %v4429_v62 }
0x1163   : > { %4285 = vadd.xlane.f32.xlu1 %v4284_v63  ;;  %v7529_v63 = vcombine.high %v4425_v60, %v4429_v62  ;;  %v4358_v60 = vld [vmem:[%s9133_s17 + $0x68] sm:$0xff] }
0x1165   : > { %5175 = vmatprep.subr.bf16.mxu0 %v7529_v63 }
0x1166   : > { %5176 = vmatpush1.bf16.msra.mxu0 %v7528_v3  ;;  %v4366_v3 = vld [vmem:[%s9133_s17 + $0xa8] sm:$0xff] }
0x1167   : > { %5177 = vmatprep.subr.bf16.mxu0 %v7537_v53  ;;  %v4370_v53 = vld [vmem:[%s9133_s17 + $0xc8] sm:$0xff] }
0x116a   : > { %5178 = vmatpush1.bf16.msra.mxu0 %v7536_v11  ;;  %v4374_v11 = vld [vmem:[%s9133_s17 + $0xe8] sm:$0xff] }
0x116b   : > { %5179 = vmatprep.subr.bf16.mxu0 %v7545_v5  ;;  %v7475_v4 = vcombine.high %v4370_v53, %v4374_v11  ;;  %v4378_v5 = vld [vmem:[%s9133_s17 + $0x108] sm:$0xff]  ;;  %v7474_v7 = vcombine.low %v4370_v53, %v4374_v11  ;;  %v8493_v11 = vld [vmem:[%s9143_s0 + $0x54] ss:$8 sps:$4 sm:$0xff]  }
0x116c   : > { %v4462_v53 = vld [vmem:[%s9133_s17 + $0x3a8] sm:$0xff] }
0x116e   : > { %5180 = vmatpush1.bf16.msra.mxu0 %v7544_v6  ;;  %v4382_v6 = vld [vmem:[%s9133_s17 + $0x128] sm:$0xff] }
0x116f   : > { %5181 = vmatprep.subr.bf16.mxu0 %v7553_v9  ;;  %v7483_v8 = vcombine.high %v4378_v5, %v4382_v6  ;;  %v4386_v9 = vld [vmem:[%s9133_s17 + $0x148] sm:$0xff]  ;;  %v7482_v12 = vcombine.low %v4378_v5, %v4382_v6 }
0x1170   : > { %v4466_v6 = vld [vmem:[%s9133_s17 + $0x3c8] sm:$0xff] }
0x1172   : > { %5182 = vmatpush1.bf16.msra.mxu0 %v7552_v10  ;;  %v4390_v10 = vld [vmem:[%s9133_s17 + $0x168] sm:$0xff] }
0x1173   : > { %5183 = vmatprep.subr.bf16.mxu0 %v7561_v13  ;;  %v7491_v42 = vcombine.high %v4386_v9, %v4390_v10  ;;  %v4394_v13 = vld [vmem:[%s9133_s17 + $0x188] sm:$0xff]  ;;  %v7490_v14 = vcombine.low %v4386_v9, %v4390_v10 }
0x1174   : > { %v8494_v10 = vld [vmem:[%s9143_s0 + $0x60] ss:$8 sps:$4 sm:$0xff]  }
0x1176   : > { %5184 = vmatpush1.bf16.msra.mxu0 %v7560_v26  ;;  %v4398_v26 = vld [vmem:[%s9133_s17 + $0x1a8] sm:$0xff] }
0x1177   : > { %5185 = vmatprep.subr.bf16.mxu0 %v7569_v48  ;;  %v7499_v15 = vcombine.high %v4394_v13, %v4398_v26  ;;  %v4406_v48 = vld [vmem:[%s9133_s17 + $0x1e8] sm:$0xff]  ;;  %v7498_v19 = vcombine.low %v4394_v13, %v4398_v26  ;;  %v4351_v13 = vld [vmem:[%s9133_s17 + $0x30] sm:$0xff] }
0x1178   : > { %v8499_v26 = vld [vmem:[%s9143_s0 + $0x74] ss:$8 sps:$4 sm:$0xff]  }
0x117a   : > { %5186 = vmatpush1.bf16.msra.mxu0 %v7568_v16  ;;  %v4402_v16 = vld [vmem:[%s9133_s17 + $0x1c8] sm:$0xff] }
0x117b   : > { %5198 = vmatprep.subr.bf16.mxu0 %v7451_v20  ;;  %v7507_v45 = vcombine.high %v4402_v16, %v4406_v48  ;;  %v4410_v20 = vld [vmem:[%s9133_s17 + $0x208] sm:$0xff] }
0x11ee   : > { %v4283_v37 = vpop.xlane.xlu0 %4282 }
0x11ef   : > { %v4287_v38 = vmul.f32 0.00390625, %v4283_v37  ;;  %v4332_v37 = vrot.slane %v4280_v29, %v9214_v1 }
0x11f0   : > { %v4286_v25 = vpop.xlane.xlu1 %4285 }
0x11f1   : > { %v9639_v39 = vsub.f32 %v9606_v49, %v4287_v38  ;;  %v9642_v40 = vsub.f32 %v9608_v57, %v4287_v38  ;;  %v4288_v41 = vmul.f32 0.00390625, %v4286_v25 }
0x11f3   : > { %v9645_v43 = vsub.f32 %v9610_v59, %v4288_v41  ;;  %v9648_v44 = vsub.f32 %v9612_v61, %v4288_v41  ;;  %v4293_v46 = vmul.f32 %v9639_v39, %v9639_v39  ;;  %v4294_v50 = vmul.f32 %v9642_v40, %v9642_v40 }
0x11f5   : > { %v4297_v52 = vadd.f32 %v4294_v50, %v4293_v46  ;;  %v4295_v56 = vmul.f32 %v9645_v43, %v9645_v43  ;;  %v4296_v51 = vmul.f32 %v9648_v44, %v9648_v44 }
0x11f7   : > { %4298 = vadd.xlane.f32.xlu0 %v4297_v52  ;;  %v4300_v58 = vadd.f32 %v4296_v51, %v4295_v56 }
0x11f9   : > { %4301 = vadd.xlane.f32.xlu1 %v4300_v58  ;;  %v4354_v58 = vld [vmem:[%s9133_s17 + $0x48] sm:$0xff] }
0x11fa   : > { %v7458_v47 = vcombine.low %v4354_v58, %v4358_v60 }
0x1284   : > { %v4299_v17 = vpop.xlane.xlu0 %4298 }
0x1285   : > { %v4303_v18 = vmul.f32 0.00390625, %v4299_v17  ;;  %v7506_v17 = vcombine.low %v4402_v16, %v4406_v48  ;;  %v4355_v48 = vld [vmem:[%s9133_s17 + $0x50] sm:$0xff] }
0x1286   : > { %v4302_v22 = vpop.xlane.xlu1 %4301 }
0x1287   : > { %v4305_v27 = vadd.f32 1e-05, %v4303_v18  ;;  %v4304_v28 = vmul.f32 0.00390625, %v4302_v22  ;;  %v4418_v22 = vld [vmem:[%s9133_s17 + $0x248] sm:$0xff] }
0x1289   : > { %8704 = vrsqrt.f32 %v4305_v27  ;;  %v4306_v23 = vadd.f32 1e-05, %v4304_v28  ;;  %v4422_v27 = vld [vmem:[%s9133_s17 + $0x268] sm:$0xff] }
0x128a   : > { %v8478_v28 = vld [vmem:[%s9143_s0 + $0x4] ss:$8 sps:$4 sm:$0xff]   ;;  %v7523_v29 = vcombine.high %v4418_v22, %v4422_v27 }
0x128b   : > { %8706 = vrsqrt.f32 %v4306_v23  ;;  %6131 = vmatprep.subr.bf16.mxu1 %v8478_v28  ;;  %v8505_v28 = vld [vmem:[%s9143_s0 + $0x94] ss:$8 sps:$4 sm:$0xff]  }
0x128c   : > { %6132 = vmatpush1.bf16.msra.mxu1 %v8476_v24  ;;  %v8508_v24 = vld [vmem:[%s9143_s0 + $0xa4] ss:$8 sps:$4 sm:$0xff]  }
0x1293   : > { %v8705_v31 = vpop.eup %8704 }
0x1294   : > { %v4309_v32 = vmul.f32 %v8705_v31, %v9639_v39  ;;  %v4310_v34 = vmul.f32 %v8705_v31, %v9642_v40  ;;  %v8481_v31 = vld [vmem:[%s9143_s0 + $0x14] ss:$8 sps:$4 sm:$0xff]  }
0x1295   : > { %v8707_v35 = vpop.eup %8706  ;;  %6133 = vmatprep.subr.bf16.mxu1 %v8481_v31  ;;  %v8506_v31 = vld [vmem:[%s9143_s0 + $0xa0] ss:$8 sps:$4 sm:$0xff]  }
0x1296   : > { %v4311_v38 = vmul.f32 %v8707_v35, %v9645_v43  ;;  %v4312_v25 = vmul.f32 %v8707_v35, %v9648_v44  ;;  %v4325_v41 = vmul.f32 %v4321_v30, %v4310_v34  ;;  %v4324_v46 = vmul.f32 %v4317_v33, %v4309_v32  ;;  %v4362_v44 = vld [vmem:[%s9133_s17 + $0x88] sm:$0xff]  ;;  %v8479_v34 = vld [vmem:[%s9143_s0 + $0x10] ss:$8 sps:$4 sm:$0xff]  }
0x1297   : > { %v7459_v43 = vcombine.high %v4354_v58, %v4358_v60  ;;  %v7467_v54 = vcombine.high %v4362_v44, %v4366_v3  ;;  %v7466_v55 = vcombine.low %v4362_v44, %v4366_v3  ;;  %v7522_v32 = vcombine.low %v4418_v22, %v4422_v27  ;;  %6134 = vmatpush1.bf16.msra.mxu1 %v8479_v34  ;;  %v4450_v58 = vld [vmem:[%s9133_s17 + $0x348] sm:$0xff]  ;;  %v4367_v22 = vld [vmem:[%s9133_s17 + $0xb0] sm:$0xff] }
0x1298   : > { %v4327_v50 = vmul.f32 %v4321_v30, %v4312_v25  ;;  %v4326_v52 = vmul.f32 %v4317_v33, %v4311_v38  ;;  %v4340_v56 = vadd.f32 %v4336_v36, %v4325_v41  ;;  %v4339_v51 = vadd.f32 %v4332_v37, %v4324_v46  ;;  %v4426_v30 = vld [vmem:[%s9133_s17 + $0x288] sm:$0xff]  ;;  %v8503_v27 = vld [vmem:[%s9143_s0 + $0x90] ss:$8 sps:$4 sm:$0xff]  }
0x1299   : > { %v4430_v33 = vld [vmem:[%s9133_s17 + $0x2a8] sm:$0xff] }
0x129a   : > { %v4342_v39 = vadd.f32 %v4336_v36, %v4327_v50  ;;  %v4341_v40 = vadd.f32 %v4332_v37, %v4326_v52  ;;  %v7531_v35 = vcombine.high %v4426_v30, %v4430_v33  ;;  %v4434_v36 = vld [vmem:[%s9133_s17 + $0x2c8] sm:$0xff]  ;;  %v7530_v25 = vcombine.low %v4426_v30, %v4430_v33  ;;  %v4371_v30 = vld [vmem:[%s9133_s17 + $0xd0] sm:$0xff] }
0x129b   : > { %v4438_v37 = vld [vmem:[%s9133_s17 + $0x2e8] sm:$0xff]  ;;  %v4375_v33 = vld [vmem:[%s9133_s17 + $0xf0] sm:$0xff] }
0x129c   : > { %v9692_v62 = vpack.c.bf16 %v4342_v39, %v4340_v56  ;;  %v9694_v63 = vpack.c.bf16 %v4341_v40, %v4339_v51  ;;  %v8484_v38 = vld [vmem:[%s9143_s0 + $0x24] ss:$8 sps:$4 sm:$0xff]   ;;  %v8482_v41 = vld [vmem:[%s9143_s0 + $0x20] ss:$8 sps:$4 sm:$0xff]   ;;  %v7539_v46 = vcombine.high %v4434_v36, %v4438_v37  ;;  %v8487_v56 = vld [vmem:[%s9143_s0 + $0x34] ss:$8 sps:$4 sm:$0xff]   ;;  %v7538_v39 = vcombine.low %v4434_v36, %v4438_v37 }
0x129d   : > { %6135 = vmatprep.subr.bf16.mxu1 %v8484_v38  ;;  %v4442_v50 = vld [vmem:[%s9133_s17 + $0x308] sm:$0xff]  ;;  %v8485_v51 = vld [vmem:[%s9143_s0 + $0x30] ss:$8 sps:$4 sm:$0xff]  }
0x129e   : > { %5187 = vmatprep.mubr.bf16.mxu0 %v9692_v62  ;;  %v4446_v52 = vld [vmem:[%s9133_s17 + $0x328] sm:$0xff]  ;;  %6136 = vmatpush1.bf16.msra.mxu1 %v8482_v41  ;;  %v4379_v36 = vld [vmem:[%s9133_s17 + $0x110] sm:$0xff]  ;;  %v7476_v41 = vcombine.low %v4371_v30, %v4375_v33 }
0x129f   : > { %5188 = vmatmul.mubr.bf16.vlgmr.msra.gmra.mrb[44].mxu0 %v9694_v63  ;;  %v7547_v40 = vcombine.high %v4442_v50, %v4446_v52  ;;  %6137 = vmatprep.subr.bf16.mxu1 %v8487_v56  ;;  %v4454_v60 = vld [vmem:[%s9133_s17 + $0x368] sm:$0xff]  ;;  %v7546_v44 = vcombine.low %v4442_v50, %v4446_v52  ;;  %v4383_v37 = vld [vmem:[%s9133_s17 + $0x130] sm:$0xff] }
0x12a0   : > { %5199 = vmatpush1.bf16.msra.mxu0 %v7450_v21  ;;  %5230 = vmatprep.mubr.bf16.mxu0 %v9692_v62  ;;  %v4414_v21 = vld [vmem:[%s9133_s17 + $0x228] sm:$0xff]  ;;  %v8509_v38 = vld [vmem:[%s9143_s0 + $0xb0] ss:$8 sps:$4 sm:$0xff]  }
0x12a1   : > { %5200 = vmatprep.subr.bf16.mxu0 %v7459_v43  ;;  %v7515_v18 = vcombine.high %v4410_v20, %v4414_v21  ;;  %v7514_v23 = vcombine.low %v4410_v20, %v4414_v21  ;;  %v8490_v43 = vld [vmem:[%s9143_s0 + $0x44] ss:$8 sps:$4 sm:$0xff]   ;;  %v8488_v3 = vld [vmem:[%s9143_s0 + $0x40] ss:$8 sps:$4 sm:$0xff]   ;;  %v4387_v50 = vld [vmem:[%s9133_s17 + $0x150] sm:$0xff] }
0x12a2   : > { %6138 = vmatpush1.bf16.msra.mxu1 %v8485_v51  ;;  %v8500_v21 = vld [vmem:[%s9143_s0 + $0x80] ss:$8 sps:$4 sm:$0xff]   ;;  %v4391_v52 = vld [vmem:[%s9133_s17 + $0x170] sm:$0xff]  ;;  %v7484_v51 = vcombine.low %v4379_v36, %v4383_v37 }
0x12a3   : > { %6139 = vmatprep.subr.bf16.mxu1 %v8490_v43  ;;  %v8512_v56 = vld [vmem:[%s9143_s0 + $0xc0] ss:$8 sps:$4 sm:$0xff]   ;;  %v8515_v43 = vld [vmem:[%s9143_s0 + $0xd0] ss:$8 sps:$4 sm:$0xff]  }
0x12a4   : > { %5201 = vmatpush1.bf16.msra.mxu0 %v7458_v47  ;;  %v7555_v47 = vcombine.high %v4450_v58, %v4454_v60 }
0x12a5   : > { %5202 = vmatprep.subr.bf16.mxu0 %v7467_v54  ;;  %v4458_v54 = vld [vmem:[%s9133_s17 + $0x388] sm:$0xff] }
0x12a6   : > { %6140 = vmatpush1.bf16.msra.mxu1 %v8488_v3  ;;  %v7563_v5 = vcombine.high %v4458_v54, %v4462_v53  ;;  %v7562_v9 = vcombine.low %v4458_v54, %v4462_v53  ;;  %v4407_v54 = vld [vmem:[%s9133_s17 + $0x1f0] sm:$0xff]  ;;  %v8520_v53 = vld [vmem:[%s9143_s0 + $0xe4] ss:$8 sps:$4 sm:$0xff]  }
0x12a7   : > { %6141 = vmatprep.subr.bf16.mxu1 %v8493_v11 }
0x12a8   : > { %5203 = vmatpush1.bf16.msra.mxu0 %v7466_v55  ;;  %v7554_v55 = vcombine.low %v4450_v58, %v4454_v60  ;;  %v4395_v58 = vld [vmem:[%s9133_s17 + $0x190] sm:$0xff] }
0x12a9   : > { %5204 = vmatprep.subr.bf16.mxu0 %v7475_v4  ;;  %v8491_v4 = vld [vmem:[%s9143_s0 + $0x50] ss:$8 sps:$4 sm:$0xff]  }
0x12aa   : > { %6142 = vmatpush1.bf16.msra.mxu1 %v8491_v4  ;;  %v4399_v60 = vld [vmem:[%s9133_s17 + $0x1b0] sm:$0xff] }
0x12ab   : > { %v7501_v3 = vcombine.high %v4395_v58, %v4399_v60  ;;  %v7500_v11 = vcombine.low %v4395_v58, %v4399_v60  ;;  %v4368_v58 = vld [vmem:[%s9133_s17 + $0xb8] sm:$0xff] }
0x12ac   : > { %5205 = vmatpush1.bf16.msra.mxu0 %v7474_v7  ;;  %v4470_v7 = vld [vmem:[%s9133_s17 + $0x3e8] sm:$0xff] }
0x12ad   : > { %5206 = vmatprep.subr.bf16.mxu0 %v7483_v8  ;;  %v8496_v8 = vld [vmem:[%s9143_s0 + $0x64] ss:$8 sps:$4 sm:$0xff]  }
0x12ae   : > { %6143 = vmatprep.subr.bf16.mxu1 %v8496_v8 }
0x12af   : > { %6144 = vmatpush1.bf16.msra.mxu1 %v8494_v10 }
0x12b0   : > { %5207 = vmatpush1.bf16.msra.mxu0 %v7482_v12  ;;  %v7571_v12 = vcombine.high %v4466_v6, %v4470_v7  ;;  %6145 = vmatprep.subr.bf16.mxu1 %v8499_v26 }
0x12b1   : > { %5208 = vmatprep.subr.bf16.mxu0 %v7491_v42  ;;  %v4347_v42 = vld [vmem:[%s9133_s17 + $0x10] sm:$0xff] }
0x12b2   : > { %v7453_v16 = vcombine.high %v4347_v42, %v4351_v13  ;;  %v7452_v20 = vcombine.low %v4347_v42, %v4351_v13  ;;  %v4423_v42 = vld [vmem:[%s9133_s17 + $0x270] sm:$0xff]  ;;  %v8526_v13 = vld [vmem:[%s9143_s0 + $0x104] ss:$8 sps:$4 sm:$0xff]  }
0x12b4   : > { %5209 = vmatpush1.bf16.msra.mxu0 %v7490_v14  ;;  %v7570_v14 = vcombine.low %v4466_v6, %v4470_v7  ;;  %v4415_v6 = vld [vmem:[%s9133_s17 + $0x230] sm:$0xff] }
0x12b5   : > { %5210 = vmatprep.subr.bf16.mxu0 %v7499_v15  ;;  %v8497_v15 = vld [vmem:[%s9143_s0 + $0x70] ss:$8 sps:$4 sm:$0xff]   ;;  %v8523_v7 = vld [vmem:[%s9143_s0 + $0xf4] ss:$8 sps:$4 sm:$0xff]  }
0x12b6   : > { %6146 = vmatpush1.bf16.msra.mxu1 %v8497_v15  ;;  %v4427_v15 = vld [vmem:[%s9133_s17 + $0x290] sm:$0xff] }
0x12b8   : > { %5211 = vmatpush1.bf16.msra.mxu0 %v7498_v19  ;;  %v4359_v19 = vld [vmem:[%s9133_s17 + $0x70] sm:$0xff] }
0x12b9   : > { %5212 = vmatprep.subr.bf16.mxu0 %v7507_v45  ;;  %v8502_v45 = vld [vmem:[%s9143_s0 + $0x84] ss:$8 sps:$4 sm:$0xff]  }
0x12ba   : > { %6147 = vmatprep.subr.bf16.mxu1 %v8502_v45  ;;  %v4435_v45 = vld [vmem:[%s9133_s17 + $0x2d0] sm:$0xff] }
0x12bb   : > { %6148 = vmatpush1.bf16.msra.mxu1 %v8500_v21 }
0x12bc   : > { %5213 = vmatpush1.bf16.msra.mxu0 %v7506_v17  ;;  %v7461_v17 = vcombine.high %v4355_v48, %v4359_v19  ;;  %6149 = vmatprep.subr.bf16.mxu1 %v8505_v28 }
0x12bd   : > { %5214 = vmatprep.subr.bf16.mxu0 %v7515_v18  ;;  %v4363_v18 = vld [vmem:[%s9133_s17 + $0x90] sm:$0xff] }
0x12be   : > { %v7468_v34 = vcombine.low %v4363_v18, %v4367_v22 }
0x12bf   : > { %6150 = vmatpush1.bf16.msra.mxu1 %v8503_v27 }
0x12c0   : > { %5215 = vmatpush1.bf16.msra.mxu0 %v7514_v23  ;;  %v7460_v23 = vcombine.low %v4355_v48, %v4359_v19  ;;  %6151 = vmatprep.subr.bf16.mxu1 %v8508_v24  ;;  %v4455_v24 = vld [vmem:[%s9133_s17 + $0x370] sm:$0xff] }
0x12c1   : > { %5216 = vmatprep.subr.bf16.mxu0 %v7523_v29  ;;  %v7469_v29 = vcombine.high %v4363_v18, %v4367_v22  ;;  %v4443_v18 = vld [vmem:[%s9133_s17 + $0x310] sm:$0xff] }
0x12c2   : > { %v4447_v22 = vld [vmem:[%s9133_s17 + $0x330] sm:$0xff] }
0x12c3   : > { %6152 = vmatpush1.bf16.msra.mxu1 %v8506_v31  ;;  %v7549_v28 = vcombine.high %v4443_v18, %v4447_v22  ;;  %v4463_v31 = vld [vmem:[%s9133_s17 + $0x3b0] sm:$0xff] }
0x12c4   : > { %5217 = vmatpush1.bf16.msra.mxu0 %v7522_v32  ;;  %v8511_v32 = vld [vmem:[%s9143_s0 + $0xb4] ss:$8 sps:$4 sm:$0xff]  }
0x12c5   : > { %5218 = vmatprep.subr.bf16.mxu0 %v7531_v35  ;;  %v7477_v35 = vcombine.high %v4371_v30, %v4375_v33  ;;  %6153 = vmatprep.subr.bf16.mxu1 %v8511_v32  ;;  %v4459_v33 = vld [vmem:[%s9133_s17 + $0x390] sm:$0xff] }
0x12c7   : > { %6154 = vmatpush1.bf16.msra.mxu1 %v8509_v38 }
0x12c8   : > { %5219 = vmatpush1.bf16.msra.mxu0 %v7530_v25  ;;  %v8514_v25 = vld [vmem:[%s9143_s0 + $0xc4] ss:$8 sps:$4 sm:$0xff]  }
0x12c9   : > { %5220 = vmatprep.subr.bf16.mxu0 %v7539_v46  ;;  %v7485_v46 = vcombine.high %v4379_v36, %v4383_v37  ;;  %6155 = vmatprep.subr.bf16.mxu1 %v8514_v25  ;;  %v4471_v36 = vld [vmem:[%s9133_s17 + $0x3f0] sm:$0xff]  ;;  %v7564_v37 = vcombine.low %v4459_v33, %v4463_v31  ;;  %v4348_v25 = vld [vmem:[%s9133_s17 + $0x18] sm:$0xff] }
0x12cb   : > { %6156 = vmatpush1.bf16.msra.mxu1 %v8512_v56  ;;  %v4360_v56 = vld [vmem:[%s9133_s17 + $0x78] sm:$0xff] }
0x12cc   : > { %5221 = vmatpush1.bf16.msra.mxu0 %v7538_v39  ;;  %v8517_v39 = vld [vmem:[%s9143_s0 + $0xd4] ss:$8 sps:$4 sm:$0xff]  }
0x12cd   : > { %5222 = vmatprep.subr.bf16.mxu0 %v7547_v40  ;;  %v7493_v40 = vcombine.high %v4387_v50, %v4391_v52  ;;  %6157 = vmatprep.subr.bf16.mxu1 %v8517_v39 }
0x12cf   : > { %6158 = vmatpush1.bf16.msra.mxu1 %v8515_v43 }
0x12d0   : > { %5223 = vmatpush1.bf16.msra.mxu0 %v7546_v44  ;;  %v7492_v44 = vcombine.low %v4387_v50, %v4391_v52  ;;  %6159 = vmatprep.subr.bf16.mxu1 %v8520_v53  ;;  %v4356_v52 = vld [vmem:[%s9133_s17 + $0x58] sm:$0xff] }
0x12d1   : > { %5224 = vmatprep.subr.bf16.mxu0 %v7555_v47  ;;  %v4403_v47 = vld [vmem:[%s9133_s17 + $0x1d0] sm:$0xff]  ;;  %v7462_v60 = vcombine.low %v4356_v52, %v4360_v56  ;;  %v4380_v53 = vld [vmem:[%s9133_s17 + $0x118] sm:$0xff] }
0x12d2   : > { %v7509_v4 = vcombine.high %v4403_v47, %v4407_v54  ;;  %v7508_v8 = vcombine.low %v4403_v47, %v4407_v54 }
0x12d4   : > { %5225 = vmatpush1.bf16.msra.mxu0 %v7554_v55  ;;  %v8518_v55 = vld [vmem:[%s9143_s0 + $0xe0] ss:$8 sps:$4 sm:$0xff]  }
0x12d5   : > { %5226 = vmatprep.subr.bf16.mxu0 %v7563_v5  ;;  %v4411_v5 = vld [vmem:[%s9133_s17 + $0x210] sm:$0xff]  ;;  %6160 = vmatpush1.bf16.msra.mxu1 %v8518_v55 }
0x12d6   : > { %v7517_v10 = vcombine.high %v4411_v5, %v4415_v6  ;;  %6161 = vmatprep.subr.bf16.mxu1 %v8523_v7  ;;  %v7516_v26 = vcombine.low %v4411_v5, %v4415_v6  ;;  %v4392_v5 = vld [vmem:[%s9133_s17 + $0x178] sm:$0xff] }
0x12d8   : > { %5227 = vmatpush1.bf16.msra.mxu0 %v7562_v9  ;;  %v8521_v9 = vld [vmem:[%s9143_s0 + $0xf0] ss:$8 sps:$4 sm:$0xff]  }
0x12d9   : > { %5228 = vmatprep.subr.bf16.mxu0 %v7571_v12  ;;  %v4419_v12 = vld [vmem:[%s9133_s17 + $0x250] sm:$0xff]  ;;  %6162 = vmatpush1.bf16.msra.mxu1 %v8521_v9  ;;  %v4400_v9 = vld [vmem:[%s9133_s17 + $0x1b8] sm:$0xff] }
0x12da   : > { %6174 = vmatprep.subr.bf16.mxu1 %v8526_v13  ;;  %v7524_v48 = vcombine.low %v4419_v12, %v4423_v42  ;;  %v4408_v13 = vld [vmem:[%s9133_s17 + $0x1f8] sm:$0xff] }
0x12dc   : > { %5229 = vmatpush1.bf16.msra.mxu0 %v7570_v14  ;;  %v7525_v14 = vcombine.high %v4419_v12, %v4423_v42  ;;  %v4404_v42 = vld [vmem:[%s9133_s17 + $0x1d8] sm:$0xff] }
0x12dd   : > { %5241 = vmatprep.subr.bf16.mxu0 %v7453_v16  ;;  %v4431_v16 = vld [vmem:[%s9133_s17 + $0x2b0] sm:$0xff] }
0x12de   : > { %v7533_v19 = vcombine.high %v4427_v15, %v4431_v16  ;;  %v7532_v21 = vcombine.low %v4427_v15, %v4431_v16  ;;  %v4412_v15 = vld [vmem:[%s9133_s17 + $0x218] sm:$0xff] }
0x12df   : > { %5231 = vmatmul.mubr.bf16.vlgmr.msra.gmra.mrb[48].mxu0 %v9694_v63  ;;  %v4416_v16 = vld [vmem:[%s9133_s17 + $0x238] sm:$0xff] }
0x12e0   : > { %5242 = vmatpush1.bf16.msra.mxu0 %v7452_v20  ;;  %5273 = vmatprep.mubr.bf16.mxu0 %v9692_v62  ;;  %v4439_v20 = vld [vmem:[%s9133_s17 + $0x2f0] sm:$0xff] }
0x12e1   : > { %5243 = vmatprep.subr.bf16.mxu0 %v7461_v17  ;;  %v7541_v17 = vcombine.high %v4435_v45, %v4439_v20  ;;  %v7540_v27 = vcombine.low %v4435_v45, %v4439_v20  ;;  %v4420_v45 = vld [vmem:[%s9133_s17 + $0x258] sm:$0xff] }
0x12e2   : > { %v4424_v20 = vld [vmem:[%s9133_s17 + $0x278] sm:$0xff] }
0x12e4   : > { %5244 = vmatpush1.bf16.msra.mxu0 %v7460_v23  ;;  %v4451_v23 = vld [vmem:[%s9133_s17 + $0x350] sm:$0xff] }
0x12e5   : > { %5245 = vmatprep.subr.bf16.mxu0 %v7469_v29  ;;  %v7548_v29 = vcombine.low %v4443_v18, %v4447_v22  ;;  %v7557_v30 = vcombine.high %v4451_v23, %v4455_v24  ;;  %v7556_v32 = vcombine.low %v4451_v23, %v4455_v24  ;;  %v4428_v18 = vld [vmem:[%s9133_s17 + $0x298] sm:$0xff] }
0x12e6   : > { %v4432_v22 = vld [vmem:[%s9133_s17 + $0x2b8] sm:$0xff] }
0x12e7   : > { %v4436_v23 = vld [vmem:[%s9133_s17 + $0x2d8] sm:$0xff] }
0x12e8   : > { %5246 = vmatpush1.bf16.msra.mxu0 %v7468_v34  ;;  %v7565_v34 = vcombine.high %v4459_v33, %v4463_v31  ;;  %v4440_v24 = vld [vmem:[%s9133_s17 + $0x2f8] sm:$0xff] }
0x12e9   : > { %5247 = vmatprep.subr.bf16.mxu0 %v7477_v35  ;;  %v4467_v35 = vld [vmem:[%s9133_s17 + $0x3d0] sm:$0xff]  ;;  %v4444_v33 = vld [vmem:[%s9133_s17 + $0x318] sm:$0xff] }
0x12ea   : > { %v7573_v38 = vcombine.high %v4467_v35, %v4471_v36  ;;  %v4448_v31 = vld [vmem:[%s9133_s17 + $0x338] sm:$0xff] }
0x12ec   : > { %5248 = vmatpush1.bf16.msra.mxu0 %v7476_v41  ;;  %v4352_v41 = vld [vmem:[%s9133_s17 + $0x38] sm:$0xff] }
0x12ed   : > { %5249 = vmatprep.subr.bf16.mxu0 %v7485_v46  ;;  %v7572_v46 = vcombine.low %v4467_v35, %v4471_v36  ;;  %v7455_v50 = vcombine.high %v4348_v25, %v4352_v41  ;;  %v7454_v39 = vcombine.low %v4348_v25, %v4352_v41  ;;  %v4452_v35 = vld [vmem:[%s9133_s17 + $0x358] sm:$0xff] }
0x12ee   : > { %v4456_v36 = vld [vmem:[%s9133_s17 + $0x378] sm:$0xff] }
0x12ef   : > { %v4460_v25 = vld [vmem:[%s9133_s17 + $0x398] sm:$0xff] }
0x12f0   : > { %5250 = vmatpush1.bf16.msra.mxu0 %v7484_v51  ;;  %v7463_v51 = vcombine.high %v4356_v52, %v4360_v56  ;;  %v4464_v41 = vld [vmem:[%s9133_s17 + $0x3b8] sm:$0xff] }
0x12f1   : > { %5251 = vmatprep.subr.bf16.mxu0 %v7493_v40  ;;  %v4364_v40 = vld [vmem:[%s9133_s17 + $0x98] sm:$0xff] }
0x12f2   : > { %v7471_v43 = vcombine.high %v4364_v40, %v4368_v58  ;;  %v7470_v47 = vcombine.low %v4364_v40, %v4368_v58  ;;  %v4468_v52 = vld [vmem:[%s9133_s17 + $0x3d8] sm:$0xff]  ;;  %v9830_v58 = vld [vmem:[%s9138_s24] sm:$0xff] }
0x12f3   : > { %v4472_v56 = vld [vmem:[%s9133_s17 + $0x3f8] sm:$0xff] }
0x12f4   : > { %5252 = vmatpush1.bf16.msra.mxu0 %v7492_v44  ;;  %v4372_v44 = vld [vmem:[%s9133_s17 + $0xd8] sm:$0xff]  ;;  %v7574_v40 = vcombine.low %v4468_v52, %v4472_v56 }
0x12f5   : > { %5253 = vmatprep.subr.bf16.mxu0 %v7501_v3  ;;  %v4376_v3 = vld [vmem:[%s9133_s17 + $0xf8] sm:$0xff] }
0x12f6   : > { %v7479_v54 = vcombine.high %v4372_v44, %v4376_v3  ;;  %v7478_v55 = vcombine.low %v4372_v44, %v4376_v3 }
0x12f8   : > { %5254 = vmatpush1.bf16.msra.mxu0 %v7500_v11  ;;  %v4384_v11 = vld [vmem:[%s9133_s17 + $0x138] sm:$0xff] }
0x12f9   : > { %5255 = vmatprep.subr.bf16.mxu0 %v7509_v4  ;;  %v4388_v4 = vld [vmem:[%s9133_s17 + $0x158] sm:$0xff]  ;;  %v7486_v6 = vcombine.low %v4380_v53, %v4384_v11 }
0x12fa   : > { %v7495_v7 = vcombine.high %v4388_v4, %v4392_v5 }
0x12fc   : > { %5256 = vmatpush1.bf16.msra.mxu0 %v7508_v8  ;;  %v4396_v8 = vld [vmem:[%s9133_s17 + $0x198] sm:$0xff] }
0x12fd   : > { %5257 = vmatprep.subr.bf16.mxu0 %v7517_v10  ;;  %v7494_v10 = vcombine.low %v4388_v4, %v4392_v5  ;;  %v7503_v12 = vcombine.high %v4396_v8, %v4400_v9 }
0x1300   : > { %5258 = vmatpush1.bf16.msra.mxu0 %v7516_v26  ;;  %v7502_v26 = vcombine.low %v4396_v8, %v4400_v9  ;;  %v8524_v9 = vld [vmem:[%s9143_s0 + $0x100] ss:$8 sps:$4 sm:$0xff]  }
0x1301   : > { %5259 = vmatprep.subr.bf16.mxu0 %v7525_v14  ;;  %v7511_v14 = vcombine.high %v4404_v42, %v4408_v13 }
0x1304   : > { %5260 = vmatpush1.bf16.msra.mxu0 %v7524_v48  ;;  %v7510_v48 = vcombine.low %v4404_v42, %v4408_v13  ;;  %v8532_v42 = vld [vmem:[%s9143_s0 + $0x124] ss:$8 sps:$4 sm:$0xff]   ;;  %v8530_v13 = vld [vmem:[%s9143_s0 + $0x120] ss:$8 sps:$4 sm:$0xff]  }
0x1305   : > { %5261 = vmatprep.subr.bf16.mxu0 %v7533_v19  ;;  %v7519_v19 = vcombine.high %v4412_v15, %v4416_v16 }
0x1308   : > { %5262 = vmatpush1.bf16.msra.mxu0 %v7532_v21  ;;  %v7518_v21 = vcombine.low %v4412_v15, %v4416_v16  ;;  %v8538_v15 = vld [vmem:[%s9143_s0 + $0x144] ss:$8 sps:$4 sm:$0xff]   ;;  %v8536_v16 = vld [vmem:[%s9143_s0 + $0x140] ss:$8 sps:$4 sm:$0xff]  }
0x1309   : > { %5263 = vmatprep.subr.bf16.mxu0 %v7541_v17  ;;  %v7527_v17 = vcombine.high %v4420_v45, %v4424_v20 }
0x130c   : > { %5264 = vmatpush1.bf16.msra.mxu0 %v7540_v27  ;;  %v7526_v27 = vcombine.low %v4420_v45, %v4424_v20  ;;  %v8544_v45 = vld [vmem:[%s9143_s0 + $0x164] ss:$8 sps:$4 sm:$0xff]   ;;  %v8542_v20 = vld [vmem:[%s9143_s0 + $0x160] ss:$8 sps:$4 sm:$0xff]  }
0x130d   : > { %5265 = vmatprep.subr.bf16.mxu0 %v7549_v28  ;;  %v7535_v28 = vcombine.high %v4428_v18, %v4432_v22 }
0x1310   : > { %5266 = vmatpush1.bf16.msra.mxu0 %v7548_v29  ;;  %v7534_v29 = vcombine.low %v4428_v18, %v4432_v22  ;;  %v8550_v18 = vld [vmem:[%s9143_s0 + $0x184] ss:$8 sps:$4 sm:$0xff]   ;;  %v8548_v22 = vld [vmem:[%s9143_s0 + $0x180] ss:$8 sps:$4 sm:$0xff]  }
0x1311   : > { %5267 = vmatprep.subr.bf16.mxu0 %v7557_v30  ;;  %v7543_v30 = vcombine.high %v4436_v23, %v4440_v24 }
0x1314   : > { %5268 = vmatpush1.bf16.msra.mxu0 %v7556_v32  ;;  %v7542_v32 = vcombine.low %v4436_v23, %v4440_v24  ;;  %v8556_v23 = vld [vmem:[%s9143_s0 + $0x1a4] ss:$8 sps:$4 sm:$0xff]   ;;  %v8554_v24 = vld [vmem:[%s9143_s0 + $0x1a0] ss:$8 sps:$4 sm:$0xff]  }
0x1315   : > { %5269 = vmatprep.subr.bf16.mxu0 %v7565_v34  ;;  %v7551_v34 = vcombine.high %v4444_v33, %v4448_v31 }
0x1318   : > { %5270 = vmatpush1.bf16.msra.mxu0 %v7564_v37  ;;  %v7550_v37 = vcombine.low %v4444_v33, %v4448_v31  ;;  %v8562_v33 = vld [vmem:[%s9143_s0 + $0x1c4] ss:$8 sps:$4 sm:$0xff]   ;;  %v8560_v31 = vld [vmem:[%s9143_s0 + $0x1c0] ss:$8 sps:$4 sm:$0xff]  }
0x1319   : > { %5271 = vmatprep.subr.bf16.mxu0 %v7573_v38  ;;  %v7559_v38 = vcombine.high %v4452_v35, %v4456_v36 }
0x131c   : > { %5272 = vmatpush1.bf16.msra.mxu0 %v7572_v46  ;;  %v7558_v46 = vcombine.low %v4452_v35, %v4456_v36  ;;  %v4489_v35 = vsub.s32 3, %v9211_v0  ;;  %v8563_v36 = vld [vmem:[%s9143_s0 + $0x1d0] ss:$8 sps:$4 sm:$0xff]  }
0x131d   : > { %5284 = vmatprep.subr.bf16.mxu0 %v7455_v50  ;;  %v7567_v50 = vcombine.high %v4460_v25, %v4464_v41 }
0x131f   : > { %5274 = vmatmul.mubr.bf16.vlgmr.msra.gmra.mrb[52].mxu0 %v9694_v63 }
0x1320   : > { %5285 = vmatpush1.bf16.msra.mxu0 %v7454_v39  ;;  %5316 = vmatprep.mubr.bf16.mxu0 %v9692_v62  ;;  %v7487_v62 = vcombine.high %v4380_v53, %v4384_v11  ;;  %v7566_v39 = vcombine.low %v4460_v25, %v4464_v41  ;;  %v4490_v25 = vrot.slane %v9830_v58, %v4489_v35  ;;  %v8614_v35 = vld [vmem:[%s9143_s0 + $0x2e0] ss:$8 sps:$4 sm:$0xff]  }
0x1321   : > { %5286 = vmatprep.subr.bf16.mxu0 %v7463_v51  ;;  %v7575_v51 = vcombine.high %v4468_v52, %v4472_v56  ;;  %v8571_v56 = vld [vmem:[%s9143_s0 + $0x1f4] ss:$8 sps:$4 sm:$0xff]  }
0x1324   : > { %5287 = vmatpush1.bf16.msra.mxu0 %v7462_v60  ;;  %v4478_v60 = vrot.slane %v9830_v58, %v9214_v1 }
0x1325   : > { %5288 = vmatprep.subr.bf16.mxu0 %v7471_v43  ;;  %v4482_v43 = vrot.slane %v9830_v58, %v9217_v2 }
0x1328   : > { %5289 = vmatpush1.bf16.msra.mxu0 %v7470_v47 }
0x1329   : > { %5290 = vmatprep.subr.bf16.mxu0 %v7479_v54 }
0x132c   : > { %5291 = vmatpush1.bf16.msra.mxu0 %v7478_v55 }
0x132d   : > { %5292 = vmatprep.subr.bf16.mxu0 %v7487_v62 }
0x1330   : > { %5293 = vmatpush1.bf16.msra.mxu0 %v7486_v6 }
0x1331   : > { %5294 = vmatprep.subr.bf16.mxu0 %v7495_v7 }
0x1334   : > { %5295 = vmatpush1.bf16.msra.mxu0 %v7494_v10  ;;  %v8529_v10 = vld [vmem:[%s9143_s0 + $0x114] ss:$8 sps:$4 sm:$0xff]  }
0x1335   : > { %5296 = vmatprep.subr.bf16.mxu0 %v7503_v12  ;;  %v8527_v12 = vld [vmem:[%s9143_s0 + $0x110] ss:$8 sps:$4 sm:$0xff]  }
0x1338   : > { %5297 = vmatpush1.bf16.msra.mxu0 %v7502_v26  ;;  %v8535_v26 = vld [vmem:[%s9143_s0 + $0x134] ss:$8 sps:$4 sm:$0xff]  }
0x1339   : > { %5298 = vmatprep.subr.bf16.mxu0 %v7511_v14  ;;  %v8533_v14 = vld [vmem:[%s9143_s0 + $0x130] ss:$8 sps:$4 sm:$0xff]  }
0x133c   : > { %5299 = vmatpush1.bf16.msra.mxu0 %v7510_v48  ;;  %v8541_v48 = vld [vmem:[%s9143_s0 + $0x154] ss:$8 sps:$4 sm:$0xff]  }
0x133d   : > { %5300 = vmatprep.subr.bf16.mxu0 %v7519_v19  ;;  %v8539_v19 = vld [vmem:[%s9143_s0 + $0x150] ss:$8 sps:$4 sm:$0xff]  }
0x1340   : > { %5301 = vmatpush1.bf16.msra.mxu0 %v7518_v21  ;;  %v8547_v21 = vld [vmem:[%s9143_s0 + $0x174] ss:$8 sps:$4 sm:$0xff]  }
0x1341   : > { %5302 = vmatprep.subr.bf16.mxu0 %v7527_v17  ;;  %v8545_v17 = vld [vmem:[%s9143_s0 + $0x170] ss:$8 sps:$4 sm:$0xff]  }
0x1344   : > { %5303 = vmatpush1.bf16.msra.mxu0 %v7526_v27  ;;  %v8553_v27 = vld [vmem:[%s9143_s0 + $0x194] ss:$8 sps:$4 sm:$0xff]  }
0x1345   : > { %5304 = vmatprep.subr.bf16.mxu0 %v7535_v28  ;;  %v8551_v28 = vld [vmem:[%s9143_s0 + $0x190] ss:$8 sps:$4 sm:$0xff]  }
0x1348   : > { %5305 = vmatpush1.bf16.msra.mxu0 %v7534_v29  ;;  %v8559_v29 = vld [vmem:[%s9143_s0 + $0x1b4] ss:$8 sps:$4 sm:$0xff]  }
0x1349   : > { %5306 = vmatprep.subr.bf16.mxu0 %v7543_v30  ;;  %v8557_v30 = vld [vmem:[%s9143_s0 + $0x1b0] ss:$8 sps:$4 sm:$0xff]  }
0x134c   : > { %5307 = vmatpush1.bf16.msra.mxu0 %v7542_v32  ;;  %v8565_v32 = vld [vmem:[%s9143_s0 + $0x1d4] ss:$8 sps:$4 sm:$0xff]  }
0x134d   : > { %5308 = vmatprep.subr.bf16.mxu0 %v7551_v34  ;;  %v4485_v34 = vsub.s32 2, %v9211_v0 }
0x1350   : > { %5309 = vmatpush1.bf16.msra.mxu0 %v7550_v37  ;;  %v4486_v37 = vrot.slane %v9830_v58, %v4485_v34 }
0x1351   : > { %5310 = vmatprep.subr.bf16.mxu0 %v7559_v38  ;;  %v8568_v38 = vld [vmem:[%s9143_s0 + $0x1e4] ss:$8 sps:$4 sm:$0xff]  }
0x1354   : > { %5311 = vmatpush1.bf16.msra.mxu0 %v7558_v46  ;;  %v8566_v46 = vld [vmem:[%s9143_s0 + $0x1e0] ss:$8 sps:$4 sm:$0xff]  }
0x1355   : > { %5312 = vmatprep.subr.bf16.mxu0 %v7567_v50 }
0x1358   : > { %5313 = vmatpush1.bf16.msra.mxu0 %v7566_v39 }
0x1359   : > { %5314 = vmatprep.subr.bf16.mxu0 %v7575_v51 }
0x135c   : > { %5315 = vmatpush1.bf16.msra.mxu0 %v7574_v40 }
0x135f   : > { %5317 = vmatmul.mubr.bf16.vlgmr.msra.gmra.mrb[56].mxu0 %v9694_v63 }
0x1372   : > { %v5189_v44 = vpop.f32.mrb[44].mxu0 }
0x1373   : > { %v5190_v3 = vadd.f32 %v5189_v44, %v4478_v60  ;;  %v5191_v47 = vpop.f32.mrb[45].mxu0  ;;  %v8569_v44 = vld [vmem:[%s9143_s0 + $0x1f0] ss:$8 sps:$4 sm:$0xff]  }
0x1374   : > { %v5192_v54 = vadd.f32 %v5191_v47, %v4482_v43  ;;  %v5193_v53 = vpop.f32.mrb[46].mxu0 }
0x1375   : > { %v5194_v11 = vadd.f32 %v5193_v53, %v4478_v60  ;;  %v5195_v55 = vpop.f32.mrb[47].mxu0  ;;  %v5327_v62 = vmax.f32 %v5190_v3, 0.0 }
0x1376   : > { %v5196_v63 = vadd.f32 %v5195_v55, %v4482_v43  ;;  %v5328_v5 = vmax.f32 %v5192_v54, 0.0  ;;  %v8574_v54 = vld [vmem:[%s9143_s0 + $0x204] ss:$8 sps:$4 sm:$0xff]  }
0x1377   : > { %v5335_v4 = vmax.f32 %v5194_v11, 0.0 }
0x1378   : > { %v5336_v6 = vmax.f32 %v5196_v63, 0.0 }
0x1379   : > { %v5343_v7 = vpack.c.bf16 %v5335_v4, %v5327_v62  ;;  %v8572_v62 = vld [vmem:[%s9143_s0 + $0x200] ss:$8 sps:$4 sm:$0xff]   ;;  %v8577_v4 = vld [vmem:[%s9143_s0 + $0x214] ss:$8 sps:$4 sm:$0xff]  }
0x137a   : > { %v5344_v8 = vpack.c.bf16 %v5336_v6, %v5328_v5  ;;  %v8575_v5 = vld [vmem:[%s9143_s0 + $0x210] ss:$8 sps:$4 sm:$0xff]   ;;  %v8580_v6 = vld [vmem:[%s9143_s0 + $0x224] ss:$8 sps:$4 sm:$0xff]  }
0x137c   : > { %6163 = vmatprep.mubr.bf16.mxu1 %v5344_v8  ;;  %v8583_v8 = vld [vmem:[%s9143_s0 + $0x234] ss:$8 sps:$4 sm:$0xff]  }
0x137d   : > { %6164 = vmatmul.mubr.bf16.vlgmr.msra.gmra.mrb[72].mxu1 %v5343_v7  ;;  %v8578_v7 = vld [vmem:[%s9143_s0 + $0x220] ss:$8 sps:$4 sm:$0xff]  }
0x137e   : > { %6175 = vmatpush1.bf16.msra.mxu1 %v8524_v9  ;;  %v8581_v9 = vld [vmem:[%s9143_s0 + $0x230] ss:$8 sps:$4 sm:$0xff]  }
0x137f   : > { %6176 = vmatprep.subr.bf16.mxu1 %v8529_v10  ;;  %v8586_v10 = vld [vmem:[%s9143_s0 + $0x244] ss:$8 sps:$4 sm:$0xff]  }
0x1382   : > { %6177 = vmatpush1.bf16.msra.mxu1 %v8527_v12  ;;  %v8584_v12 = vld [vmem:[%s9143_s0 + $0x240] ss:$8 sps:$4 sm:$0xff]  }
0x1383   : > { %6178 = vmatprep.subr.bf16.mxu1 %v8532_v42  ;;  %v8589_v42 = vld [vmem:[%s9143_s0 + $0x254] ss:$8 sps:$4 sm:$0xff]  }
0x1386   : > { %6179 = vmatpush1.bf16.msra.mxu1 %v8530_v13  ;;  %v8587_v13 = vld [vmem:[%s9143_s0 + $0x250] ss:$8 sps:$4 sm:$0xff]  }
0x1387   : > { %6180 = vmatprep.subr.bf16.mxu1 %v8535_v26  ;;  %v8592_v26 = vld [vmem:[%s9143_s0 + $0x264] ss:$8 sps:$4 sm:$0xff]  }
0x138a   : > { %6181 = vmatpush1.bf16.msra.mxu1 %v8533_v14  ;;  %v8590_v14 = vld [vmem:[%s9143_s0 + $0x260] ss:$8 sps:$4 sm:$0xff]  }
0x138b   : > { %6182 = vmatprep.subr.bf16.mxu1 %v8538_v15  ;;  %v8595_v15 = vld [vmem:[%s9143_s0 + $0x274] ss:$8 sps:$4 sm:$0xff]  }
0x138e   : > { %6183 = vmatpush1.bf16.msra.mxu1 %v8536_v16  ;;  %v8593_v16 = vld [vmem:[%s9143_s0 + $0x270] ss:$8 sps:$4 sm:$0xff]  }
0x138f   : > { %6184 = vmatprep.subr.bf16.mxu1 %v8541_v48  ;;  %v8598_v48 = vld [vmem:[%s9143_s0 + $0x284] ss:$8 sps:$4 sm:$0xff]  }
0x1392   : > { %6185 = vmatpush1.bf16.msra.mxu1 %v8539_v19  ;;  %v8596_v19 = vld [vmem:[%s9143_s0 + $0x280] ss:$8 sps:$4 sm:$0xff]  }
0x1393   : > { %6186 = vmatprep.subr.bf16.mxu1 %v8544_v45  ;;  %v8601_v45 = vld [vmem:[%s9143_s0 + $0x294] ss:$8 sps:$4 sm:$0xff]  }
0x1396   : > { %6187 = vmatpush1.bf16.msra.mxu1 %v8542_v20  ;;  %v8599_v20 = vld [vmem:[%s9143_s0 + $0x290] ss:$8 sps:$4 sm:$0xff]  }
0x1397   : > { %6188 = vmatprep.subr.bf16.mxu1 %v8547_v21  ;;  %v8604_v21 = vld [vmem:[%s9143_s0 + $0x2a4] ss:$8 sps:$4 sm:$0xff]  }
0x139a   : > { %6189 = vmatpush1.bf16.msra.mxu1 %v8545_v17  ;;  %v8602_v17 = vld [vmem:[%s9143_s0 + $0x2a0] ss:$8 sps:$4 sm:$0xff]  }
0x139b   : > { %6190 = vmatprep.subr.bf16.mxu1 %v8550_v18  ;;  %v8607_v18 = vld [vmem:[%s9143_s0 + $0x2b4] ss:$8 sps:$4 sm:$0xff]  }
0x139e   : > { %6191 = vmatpush1.bf16.msra.mxu1 %v8548_v22  ;;  %v8605_v22 = vld [vmem:[%s9143_s0 + $0x2b0] ss:$8 sps:$4 sm:$0xff]  }
0x139f   : > { %6192 = vmatprep.subr.bf16.mxu1 %v8553_v27  ;;  %v8610_v27 = vld [vmem:[%s9143_s0 + $0x2c4] ss:$8 sps:$4 sm:$0xff]  }
0x13a2   : > { %6193 = vmatpush1.bf16.msra.mxu1 %v8551_v28  ;;  %v8608_v28 = vld [vmem:[%s9143_s0 + $0x2c0] ss:$8 sps:$4 sm:$0xff]  }
0x13a3   : > { %6194 = vmatprep.subr.bf16.mxu1 %v8556_v23  ;;  %v8613_v23 = vld [vmem:[%s9143_s0 + $0x2d4] ss:$8 sps:$4 sm:$0xff]  }
0x13a6   : > { %6195 = vmatpush1.bf16.msra.mxu1 %v8554_v24  ;;  %v4493_v24 = vsub.s32 4, %v9211_v0 }
0x13a7   : > { %6196 = vmatprep.subr.bf16.mxu1 %v8559_v29  ;;  %v4497_v29 = vsub.s32 5, %v9211_v0 }
0x13aa   : > { %6197 = vmatpush1.bf16.msra.mxu1 %v8557_v30  ;;  %v8611_v30 = vld [vmem:[%s9143_s0 + $0x2d0] ss:$8 sps:$4 sm:$0xff]  }
0x13ab   : > { %6198 = vmatprep.subr.bf16.mxu1 %v8562_v33  ;;  %v4494_v33 = vrot.slane %v9830_v58, %v4493_v24 }
0x13ae   : > { %6199 = vmatpush1.bf16.msra.mxu1 %v8560_v31  ;;  %v8616_v31 = vld [vmem:[%s9143_s0 + $0x2e4] ss:$8 sps:$4 sm:$0xff]  }
0x13af   : > { %6200 = vmatprep.subr.bf16.mxu1 %v8565_v32  ;;  %v4498_v32 = vrot.slane %v9830_v58, %v4497_v29  ;;  %v8662_v29 = vld [vmem:[%s9143_s0 + $0x3e0] ss:$8 sps:$4 sm:$0xff]  }
0x13b2   : > { %v5232_v41 = vpop.f32.mrb[48].mxu0  ;;  %6201 = vmatpush1.bf16.msra.mxu1 %v8563_v36 }
0x13b3   : > { %v5233_v50 = vadd.f32 %v5232_v41, %v4486_v37  ;;  %v5234_v52 = vpop.f32.mrb[49].mxu0  ;;  %6202 = vmatprep.subr.bf16.mxu1 %v8568_v38  ;;  %v8619_v38 = vld [vmem:[%s9143_s0 + $0x2f4] ss:$8 sps:$4 sm:$0xff]  }
0x13b4   : > { %v5235_v39 = vadd.f32 %v5234_v52, %v4490_v25  ;;  %v5236_v51 = vpop.f32.mrb[50].mxu0 }
0x13b5   : > { %v5237_v40 = vadd.f32 %v5236_v51, %v4486_v37  ;;  %v5238_v60 = vpop.f32.mrb[51].mxu0  ;;  %v5329_v3 = vmax.f32 %v5233_v50, 0.0 }
0x13b6   : > { %v5239_v43 = vadd.f32 %v5238_v60, %v4490_v25  ;;  %6203 = vmatpush1.bf16.msra.mxu1 %v8566_v46  ;;  %v5330_v53 = vmax.f32 %v5235_v39, 0.0 }
0x13b7   : > { %v5337_v47 = vmax.f32 %v5237_v40, 0.0  ;;  %6204 = vmatprep.subr.bf16.mxu1 %v8571_v56  ;;  %v8617_v56 = vld [vmem:[%s9143_s0 + $0x2f0] ss:$8 sps:$4 sm:$0xff]   ;;  %v8622_v40 = vld [vmem:[%s9143_s0 + $0x304] ss:$8 sps:$4 sm:$0xff]  }
0x13b8   : > { %v5338_v11 = vmax.f32 %v5239_v43, 0.0 }
0x13b9   : > { %v5345_v55 = vpack.c.bf16 %v5337_v47, %v5329_v3  ;;  %v8620_v47 = vld [vmem:[%s9143_s0 + $0x300] ss:$8 sps:$4 sm:$0xff]  }
0x13ba   : > { %v5346_v63 = vpack.c.bf16 %v5338_v11, %v5330_v53  ;;  %6205 = vmatpush1.bf16.msra.mxu1 %v8569_v44  ;;  %v8623_v53 = vld [vmem:[%s9143_s0 + $0x310] ss:$8 sps:$4 sm:$0xff]   ;;  %v8628_v11 = vld [vmem:[%s9143_s0 + $0x324] ss:$8 sps:$4 sm:$0xff]  }
0x13bb   : > { %6217 = vmatprep.subr.bf16.mxu1 %v8574_v54  ;;  %v8625_v54 = vld [vmem:[%s9143_s0 + $0x314] ss:$8 sps:$4 sm:$0xff]  }
0x13bc   : > { %6206 = vmatprep.mubr.bf16.mxu1 %v5346_v63  ;;  %v8631_v63 = vld [vmem:[%s9143_s0 + $0x334] ss:$8 sps:$4 sm:$0xff]  }
0x13bd   : > { %6207 = vmatmul.mubr.bf16.vlgmr.msra.gmra.mrb[72].mxu1 %v5345_v55  ;;  %v8626_v55 = vld [vmem:[%s9143_s0 + $0x320] ss:$8 sps:$4 sm:$0xff]  }
0x13be   : > { %6218 = vmatpush1.bf16.msra.mxu1 %v8572_v62  ;;  %v8629_v62 = vld [vmem:[%s9143_s0 + $0x330] ss:$8 sps:$4 sm:$0xff]  }
0x13bf   : > { %6219 = vmatprep.subr.bf16.mxu1 %v8577_v4  ;;  %v8634_v4 = vld [vmem:[%s9143_s0 + $0x344] ss:$8 sps:$4 sm:$0xff]  }
0x13c2   : > { %6220 = vmatpush1.bf16.msra.mxu1 %v8575_v5  ;;  %v8632_v5 = vld [vmem:[%s9143_s0 + $0x340] ss:$8 sps:$4 sm:$0xff]  }
0x13c3   : > { %6221 = vmatprep.subr.bf16.mxu1 %v8580_v6  ;;  %v8637_v6 = vld [vmem:[%s9143_s0 + $0x354] ss:$8 sps:$4 sm:$0xff]  }
0x13c6   : > { %6222 = vmatpush1.bf16.msra.mxu1 %v8578_v7  ;;  %v8635_v7 = vld [vmem:[%s9143_s0 + $0x350] ss:$8 sps:$4 sm:$0xff]  }
0x13c7   : > { %6223 = vmatprep.subr.bf16.mxu1 %v8583_v8  ;;  %v8640_v8 = vld [vmem:[%s9143_s0 + $0x364] ss:$8 sps:$4 sm:$0xff]  }
0x13ca   : > { %6224 = vmatpush1.bf16.msra.mxu1 %v8581_v9  ;;  %v8638_v9 = vld [vmem:[%s9143_s0 + $0x360] ss:$8 sps:$4 sm:$0xff]  }
0x13cb   : > { %6225 = vmatprep.subr.bf16.mxu1 %v8586_v10  ;;  %v8643_v10 = vld [vmem:[%s9143_s0 + $0x374] ss:$8 sps:$4 sm:$0xff]  }
0x13ce   : > { %6226 = vmatpush1.bf16.msra.mxu1 %v8584_v12  ;;  %v8641_v12 = vld [vmem:[%s9143_s0 + $0x370] ss:$8 sps:$4 sm:$0xff]  }
0x13cf   : > { %6227 = vmatprep.subr.bf16.mxu1 %v8589_v42  ;;  %v8646_v42 = vld [vmem:[%s9143_s0 + $0x384] ss:$8 sps:$4 sm:$0xff]  }
0x13d2   : > { %6228 = vmatpush1.bf16.msra.mxu1 %v8587_v13  ;;  %v8644_v13 = vld [vmem:[%s9143_s0 + $0x380] ss:$8 sps:$4 sm:$0xff]  }
0x13d3   : > { %6229 = vmatprep.subr.bf16.mxu1 %v8592_v26  ;;  %v8649_v26 = vld [vmem:[%s9143_s0 + $0x394] ss:$8 sps:$4 sm:$0xff]  }
0x13d6   : > { %6230 = vmatpush1.bf16.msra.mxu1 %v8590_v14  ;;  %v8647_v14 = vld [vmem:[%s9143_s0 + $0x390] ss:$8 sps:$4 sm:$0xff]  }
0x13d7   : > { %6231 = vmatprep.subr.bf16.mxu1 %v8595_v15  ;;  %v8652_v15 = vld [vmem:[%s9143_s0 + $0x3a4] ss:$8 sps:$4 sm:$0xff]  }
0x13da   : > { %6232 = vmatpush1.bf16.msra.mxu1 %v8593_v16  ;;  %v8650_v16 = vld [vmem:[%s9143_s0 + $0x3a0] ss:$8 sps:$4 sm:$0xff]  }
0x13db   : > { %6233 = vmatprep.subr.bf16.mxu1 %v8598_v48  ;;  %v8655_v48 = vld [vmem:[%s9143_s0 + $0x3b4] ss:$8 sps:$4 sm:$0xff]  }
0x13de   : > { %6234 = vmatpush1.bf16.msra.mxu1 %v8596_v19  ;;  %v8653_v19 = vld [vmem:[%s9143_s0 + $0x3b0] ss:$8 sps:$4 sm:$0xff]  }
0x13df   : > { %6235 = vmatprep.subr.bf16.mxu1 %v8601_v45  ;;  %v8658_v45 = vld [vmem:[%s9143_s0 + $0x3c4] ss:$8 sps:$4 sm:$0xff]  }
0x13e2   : > { %6236 = vmatpush1.bf16.msra.mxu1 %v8599_v20  ;;  %v8656_v20 = vld [vmem:[%s9143_s0 + $0x3c0] ss:$8 sps:$4 sm:$0xff]  }
0x13e3   : > { %6237 = vmatprep.subr.bf16.mxu1 %v8604_v21  ;;  %v8661_v21 = vld [vmem:[%s9143_s0 + $0x3d4] ss:$8 sps:$4 sm:$0xff]  }
0x13e6   : > { %6238 = vmatpush1.bf16.msra.mxu1 %v8602_v17  ;;  %v4501_v17 = vsub.s32 6, %v9211_v0 }
0x13e7   : > { %6239 = vmatprep.subr.bf16.mxu1 %v8607_v18  ;;  %v4505_v18 = vsub.s32 7, %v9211_v0 }
0x13ea   : > { %6240 = vmatpush1.bf16.msra.mxu1 %v8605_v22  ;;  %v8659_v22 = vld [vmem:[%s9143_s0 + $0x3d0] ss:$8 sps:$4 sm:$0xff]  }
0x13eb   : > { %6241 = vmatprep.subr.bf16.mxu1 %v8610_v27  ;;  %v4502_v27 = vrot.slane %v9830_v58, %v4501_v17 }
0x13ee   : > { %6242 = vmatpush1.bf16.msra.mxu1 %v8608_v28  ;;  %v8664_v28 = vld [vmem:[%s9143_s0 + $0x3e4] ss:$8 sps:$4 sm:$0xff]  }
0x13ef   : > { %6243 = vmatprep.subr.bf16.mxu1 %v8613_v23  ;;  %v4506_v23 = vrot.slane %v9830_v58, %v4505_v18 }
0x13f2   : > { %v5275_v34 = vpop.f32.mrb[52].mxu0  ;;  %6244 = vmatpush1.bf16.msra.mxu1 %v8611_v30 }
0x13f3   : > { %v5276_v36 = vadd.f32 %v5275_v34, %v4494_v33  ;;  %v5277_v37 = vpop.f32.mrb[53].mxu0  ;;  %6245 = vmatprep.subr.bf16.mxu1 %v8616_v31  ;;  %v8667_v31 = vld [vmem:[%s9143_s0 + $0x3f4] ss:$8 sps:$4 sm:$0xff]  }
0x13f4   : > { %v5278_v25 = vadd.f32 %v5277_v37, %v4498_v32  ;;  %v5279_v41 = vpop.f32.mrb[54].mxu0  ;;  %v8665_v37 = vld [vmem:[%s9143_s0 + $0x3f0] ss:$8 sps:$4 sm:$0xff]   ;;  %s10178_s0 = sld [smem:[#allocation24_spill]] (!%p7704_p9) }
0x13f5   : > { %v5280_v46 = vadd.f32 %v5279_v41, %v4494_v33  ;;  %v5281_v50 = vpop.f32.mrb[55].mxu0  ;;  %v5331_v39 = vmax.f32 %v5276_v36, 0.0 }
0x13f6   : > { %v5282_v52 = vadd.f32 %v5281_v50, %v4498_v32  ;;  %6246 = vmatpush1.bf16.msra.mxu1 %v8614_v35  ;;  %v5332_v60 = vmax.f32 %v5278_v25, 0.0 }
0x13f7   : > { %v5339_v51 = vmax.f32 %v5280_v46, 0.0  ;;  %6247 = vmatprep.subr.bf16.mxu1 %v8619_v38 }
0x13f8   : > { %v5340_v43 = vmax.f32 %v5282_v52, 0.0  ;;  %v5479_v52 = vld [vmem:[%s869_s28] sm:$0x3] }
0x13f9   : > { %v5347_v44 = vpack.c.bf16 %v5339_v51, %v5331_v39  ;;  %v5488_v39 = vrot.slane %v5479_v52, %v9217_v2 }
0x13fa   : > { %v5348_v3 = vpack.c.bf16 %v5340_v43, %v5332_v60  ;;  %6248 = vmatpush1.bf16.msra.mxu1 %v8617_v56  ;;  %v5484_v56 = vrot.slane %v5479_v52, %v9214_v1  ;;  %s10179_s28 = smov (!%p7704_p9), %s10178_s0 }
0x13fb   : > { %6260 = vmatprep.subr.bf16.mxu1 %v8622_v40  ;;  %v8760_v52 = vld [vmem:[%s10179_s28 + $0xf0] ss:$8 sps:$4 sm:$0xff] (!%p7704_p9)  }
0x13fc   : > { %6249 = vmatprep.mubr.bf16.mxu1 %v5348_v3 }
0x13fd   : > { %6250 = vmatmul.mubr.bf16.vlgmr.msra.gmra.mrb[72].mxu1 %v5347_v44 }
0x13fe   : > { %6261 = vmatpush1.bf16.msra.mxu1 %v8620_v47 }
0x13ff   : > { %6262 = vmatprep.subr.bf16.mxu1 %v8625_v54 }
0x1402   : > { %6263 = vmatpush1.bf16.msra.mxu1 %v8623_v53 }
0x1403   : > { %6264 = vmatprep.subr.bf16.mxu1 %v8628_v11 }
0x1406   : > { %6265 = vmatpush1.bf16.msra.mxu1 %v8626_v55 }
0x1407   : > { %6266 = vmatprep.subr.bf16.mxu1 %v8631_v63 }
0x140a   : > { %6267 = vmatpush1.bf16.msra.mxu1 %v8629_v62 }
0x140b   : > { %6268 = vmatprep.subr.bf16.mxu1 %v8634_v4 }
0x140e   : > { %6269 = vmatpush1.bf16.msra.mxu1 %v8632_v5  ;;  %v8719_v5 = vld [vmem:[%s10179_s28 + $0x24] ss:$8 sps:$4 sm:$0xff] (!%p7704_p9)  }
0x140f   : > { %6270 = vmatprep.subr.bf16.mxu1 %v8637_v6  ;;  %v8721_v6 = vld [vmem:[%s10179_s28 + $0x20] ss:$8 sps:$4 sm:$0xff] (!%p7704_p9)  }
0x1412   : > { %6271 = vmatpush1.bf16.msra.mxu1 %v8635_v7  ;;  %v8722_v7 = vld [vmem:[%s10179_s28 + $0x34] ss:$8 sps:$4 sm:$0xff] (!%p7704_p9)  }
0x1413   : > { %6272 = vmatprep.subr.bf16.mxu1 %v8640_v8  ;;  %v8724_v8 = vld [vmem:[%s10179_s28 + $0x30] ss:$8 sps:$4 sm:$0xff] (!%p7704_p9)  }
0x1416   : > { %6273 = vmatpush1.bf16.msra.mxu1 %v8638_v9  ;;  %v8725_v9 = vld [vmem:[%s10179_s28 + $0x44] ss:$8 sps:$4 sm:$0xff] (!%p7704_p9)  }
0x1417   : > { %6274 = vmatprep.subr.bf16.mxu1 %v8643_v10  ;;  %v8727_v10 = vld [vmem:[%s10179_s28 + $0x40] ss:$8 sps:$4 sm:$0xff] (!%p7704_p9)  }
0x141a   : > { %6275 = vmatpush1.bf16.msra.mxu1 %v8641_v12  ;;  %v8728_v12 = vld [vmem:[%s10179_s28 + $0x54] ss:$8 sps:$4 sm:$0xff] (!%p7704_p9)  }
0x141b   : > { %6276 = vmatprep.subr.bf16.mxu1 %v8646_v42  ;;  %v8730_v42 = vld [vmem:[%s10179_s28 + $0x50] ss:$8 sps:$4 sm:$0xff] (!%p7704_p9)  }
0x141e   : > { %6277 = vmatpush1.bf16.msra.mxu1 %v8644_v13  ;;  %v8731_v13 = vld [vmem:[%s10179_s28 + $0x64] ss:$8 sps:$4 sm:$0xff] (!%p7704_p9)  }
0x141f   : > { %6278 = vmatprep.subr.bf16.mxu1 %v8649_v26  ;;  %v8733_v26 = vld [vmem:[%s10179_s28 + $0x60] ss:$8 sps:$4 sm:$0xff] (!%p7704_p9)  }
0x1422   : > { %6279 = vmatpush1.bf16.msra.mxu1 %v8647_v14  ;;  %v8734_v14 = vld [vmem:[%s10179_s28 + $0x74] ss:$8 sps:$4 sm:$0xff] (!%p7704_p9)  }
0x1423   : > { %6280 = vmatprep.subr.bf16.mxu1 %v8652_v15  ;;  %v8736_v15 = vld [vmem:[%s10179_s28 + $0x70] ss:$8 sps:$4 sm:$0xff] (!%p7704_p9)  }
0x1426   : > { %6281 = vmatpush1.bf16.msra.mxu1 %v8650_v16  ;;  %v8737_v16 = vld [vmem:[%s10179_s28 + $0x84] ss:$8 sps:$4 sm:$0xff] (!%p7704_p9)  }
0x1427   : > { %6282 = vmatprep.subr.bf16.mxu1 %v8655_v48  ;;  %v8739_v48 = vld [vmem:[%s10179_s28 + $0x80] ss:$8 sps:$4 sm:$0xff] (!%p7704_p9)  }
0x142a   : > { %6283 = vmatpush1.bf16.msra.mxu1 %v8653_v19 }
0x142b   : > { %6284 = vmatprep.subr.bf16.mxu1 %v8658_v45 }
0x142e   : > { %6285 = vmatpush1.bf16.msra.mxu1 %v8656_v20 }
0x142f   : > { %6286 = vmatprep.subr.bf16.mxu1 %v8661_v21 }
0x1432   : > { %v5318_v24 = vpop.f32.mrb[56].mxu0  ;;  %6287 = vmatpush1.bf16.msra.mxu1 %v8659_v22 }
0x1433   : > { %v5319_v30 = vadd.f32 %v5318_v24, %v4502_v27  ;;  %v5320_v33 = vpop.f32.mrb[57].mxu0  ;;  %6288 = vmatprep.subr.bf16.mxu1 %v8664_v28 }
0x1434   : > { %v5321_v32 = vadd.f32 %v5320_v33, %v4506_v23  ;;  %v5322_v34 = vpop.f32.mrb[58].mxu0 }
0x1435   : > { %v5323_v0 = vadd.f32 %v5322_v34, %v4502_v27  ;;  %v5324_v35 = vpop.f32.mrb[59].mxu0  ;;  %v5333_v38 = vmax.f32 %v5319_v30, 0.0  ;;  %v8743_v34 = vld [vmem:[%s10179_s28 + $0xa4] ss:$8 sps:$4 sm:$0xff] (!%p7704_p9)  }
0x1436   : > { %v5325_v36 = vadd.f32 %v5324_v35, %v4506_v23  ;;  %6289 = vmatpush1.bf16.msra.mxu1 %v8662_v29  ;;  %v5334_v41 = vmax.f32 %v5321_v32, 0.0  ;;  %v8742_v32 = vld [vmem:[%s10179_s28 + $0x90] ss:$8 sps:$4 sm:$0xff] (!%p7704_p9)   ;;  %v8746_v35 = vld [vmem:[%s10179_s28 + $0xb4] ss:$8 sps:$4 sm:$0xff] (!%p7704_p9)  }
0x1437   : > { %v5341_v25 = vmax.f32 %v5323_v0, 0.0  ;;  %6290 = vmatprep.subr.bf16.mxu1 %v8667_v31  ;;  %v8740_v31 = vld [vmem:[%s10179_s28 + $0x94] ss:$8 sps:$4 sm:$0xff] (!%p7704_p9)   ;;  %v8745_v0 = vld [vmem:[%s10179_s28 + $0xa0] ss:$8 sps:$4 sm:$0xff] (!%p7704_p9)  }
0x1438   : > { %v5342_v58 = vmax.f32 %v5325_v36, 0.0  ;;  %v8748_v36 = vld [vmem:[%s10179_s28 + $0xb0] ss:$8 sps:$4 sm:$0xff] (!%p7704_p9)  }
0x1439   : > { %v5349_v46 = vpack.c.bf16 %v5341_v25, %v5333_v38  ;;  %v8751_v38 = vld [vmem:[%s10179_s28 + $0xc0] ss:$8 sps:$4 sm:$0xff] (!%p7704_p9)   ;;  %v8752_v25 = vld [vmem:[%s10179_s28 + $0xd4] ss:$8 sps:$4 sm:$0xff] (!%p7704_p9)  }
0x143a   : > { %v5350_v50 = vpack.c.bf16 %v5342_v58, %v5334_v41  ;;  %6291 = vmatpush1.bf16.msra.mxu1 %v8665_v37  ;;  %v8749_v37 = vld [vmem:[%s10179_s28 + $0xc4] ss:$8 sps:$4 sm:$0xff] (!%p7704_p9)   ;;  %v8754_v41 = vld [vmem:[%s10179_s28 + $0xd0] ss:$8 sps:$4 sm:$0xff] (!%p7704_p9)  }
0x143b   : > { %v8755_v58 = vld [vmem:[%s10179_s28 + $0xe4] ss:$8 sps:$4 sm:$0xff] (!%p7704_p9)  }
0x143c   : > { %6292 = vmatprep.mubr.bf16.mxu1 %v5350_v50  ;;  %v8758_v50 = vld [vmem:[%s10179_s28 + $0xf4] ss:$8 sps:$4 sm:$0xff] (!%p7704_p9)  }
0x143d   : > { %6293 = vmatmul.mubr.bf16.vlgmr.msra.gmra.mrb[72].mxu1 %v5349_v46  ;;  %v8757_v46 = vld [vmem:[%s10179_s28 + $0xe0] ss:$8 sps:$4 sm:$0xff] (!%p7704_p9)  }
0x1510   : > { %v6294_v51 = vpop.f32.mrb[72].mxu1 }
0x1511   : > { %v8139_v40 = vadd.f32 %v6294_v51, %v5484_v56  ;;  %v6296_v60 = vpop.f32.mrb[73].mxu1 }
0x1512   : > { %v8140_v43 = vadd.f32 %v6296_v60, %v5488_v39  ;;  %v6298_v44 = vpop.f32.mrb[74].mxu1  ;;  %6314 = sbr.rel (%p7704_p9) target bundleno = 5938 (0x1732), region = 108 }
0x1513   : > { %v6303_v3 = vadd.f32 %v8139_v40, %v9606_v49  ;;  %v8141_v47 = vadd.f32 %v6298_v44, %v5484_v56  ;;  %v6300_v54 = vpop.f32.mrb[75].mxu1  ;;  %v8713_v49 = vld [vmem:[%s10178_s0 + $0x4] ss:$8 sps:$4 sm:$0xff] (!%p7704_p9)   ;;  %v6315_v44 = vld [vmem:[%s10180_s26] sm:$0x3] (!%p7704_p9) }
0x1514   : > { %v6304_v53 = vadd.f32 %v8140_v43, %v9608_v57  ;;  %v8142_v11 = vadd.f32 %v6300_v54, %v5488_v39  ;;  %v8715_v57 = vld [vmem:[%s10179_s28] ss:$8 sps:$4 sm:$0xff] (!%p7704_p9)   ;;  %6585 = vmatprep.subr.bf16.mxu0 (!%p7704_p9), %v8713_v49 }
0x1515   : > { %6307 = vst [vmem:[#allocation2] sm:$0xff] %v6303_v3  ;;  %v6305_v55 = vadd.f32 %v8141_v47, %v9610_v59  ;;  %v8716_v59 = vld [vmem:[%s10179_s28 + $0x14] ss:$8 sps:$4 sm:$0xff] (!%p7704_p9)   ;;  %6586 = vmatpush1.bf16.msra.mxu0 (!%p7704_p9), %v8715_v57  ;;  %v6316_v47 = vld [vmem:[%s10181_s15] sm:$0x3] (!%p7704_p9) }
0x1516   : > { %6308 = vst [vmem:[#allocation2 + $0x8] sm:$0xff] %v6304_v53  ;;  %v6306_v63 = vadd.f32 %v8142_v11, %v9612_v61  ;;  %v6317_v62 = vadd.f32 (!%p7704_p9), %v6304_v53, %v6303_v3  ;;  %v8718_v61 = vld [vmem:[%s10179_s28 + $0x10] ss:$8 sps:$4 sm:$0xff] (!%p7704_p9)   ;;  %6587 = vmatprep.subr.bf16.mxu0 (!%p7704_p9), %v8716_v59  ;;  %v6357_v11 = vrot.slane (!%p7704_p9), %v6315_v44, %v9217_v2 }
0x1517   : > { %6309 = vst [vmem:[#allocation2 + $0x10] sm:$0xff] %v6305_v55 }
0x1518   : > { %6310 = vst [vmem:[#allocation2 + $0x18] sm:$0xff] %v6306_v63  ;;  %6318 = vadd.xlane.f32.xlu0 (!%p7704_p9), %v6317_v62  ;;  %v6320_v4 = vadd.f32 (!%p7704_p9), %v6306_v63, %v6305_v55  ;;  %v6368_v62 = vrot.slane (!%p7704_p9), %v6316_v47, %v9214_v1 }
0x1519   : > { %6588 = vmatpush1.bf16.msra.mxu0 %v8718_v61 }
0x151a   : > { %6589 = vmatprep.subr.bf16.mxu0 %v8719_v5 }
0x151c   : > { %6321 = vadd.xlane.f32.xlu0 %v6320_v4  ;;  %v6372_v4 = vrot.slane %v6316_v47, %v9217_v2 }
0x151d   : > { %6590 = vmatpush1.bf16.msra.mxu0 %v8721_v6 }
0x151e   : > { %6591 = vmatprep.subr.bf16.mxu0 %v8722_v7 }
0x1521   : > { %6592 = vmatpush1.bf16.msra.mxu0 %v8724_v8 }
0x1522   : > { %6593 = vmatprep.subr.bf16.mxu0 %v8725_v9 }
0x1525   : > { %6594 = vmatpush1.bf16.msra.mxu0 %v8727_v10 }
0x1526   : > { %6595 = vmatprep.subr.bf16.mxu0 %v8728_v12 }
0x1529   : > { %6596 = vmatpush1.bf16.msra.mxu0 %v8730_v42 }
0x152a   : > { %6597 = vmatprep.subr.bf16.mxu0 %v8731_v13  ;;  %v6413_v13 = vld [vmem:[%s10182_s3] sm:$0x3] }
0x152d   : > { %6598 = vmatpush1.bf16.msra.mxu0 %v8733_v26  ;;  %v6418_v26 = vrot.slane %v6413_v13, %v9214_v1 }
0x152e   : > { %6599 = vmatprep.subr.bf16.mxu0 %v8734_v14  ;;  %v6422_v14 = vrot.slane %v6413_v13, %v9217_v2 }
0x1531   : > { %6600 = vmatpush1.bf16.msra.mxu0 %v8736_v15 }
0x1532   : > { %6601 = vmatprep.subr.bf16.mxu0 %v8737_v16 }
0x1535   : > { %6602 = vmatpush1.bf16.msra.mxu0 %v8739_v48 }
0x1536   : > { %6603 = vmatprep.subr.bf16.mxu0 %v8740_v31 }
0x1539   : > { %6604 = vmatpush1.bf16.msra.mxu0 %v8742_v32 }
0x153a   : > { %6605 = vmatprep.subr.bf16.mxu0 %v8743_v34 }
0x153d   : > { %6606 = vmatpush1.bf16.msra.mxu0 %v8745_v0 }
0x153e   : > { %6607 = vmatprep.subr.bf16.mxu0 %v8746_v35 }
0x1541   : > { %6608 = vmatpush1.bf16.msra.mxu0 %v8748_v36 }
0x1542   : > { %6609 = vmatprep.subr.bf16.mxu0 %v8749_v37 }
0x1545   : > { %6610 = vmatpush1.bf16.msra.mxu0 %v8751_v38 }
0x1546   : > { %6611 = vmatprep.subr.bf16.mxu0 %v8752_v25 }
0x1549   : > { %6612 = vmatpush1.bf16.msra.mxu0 %v8754_v41 }
0x154a   : > { %6613 = vmatprep.subr.bf16.mxu0 %v8755_v58 }
0x154d   : > { %6614 = vmatpush1.bf16.msra.mxu0 %v8757_v46 }
0x154e   : > { %6615 = vmatprep.subr.bf16.mxu0 %v8758_v50 }
0x1551   : > { %6616 = vmatpush1.bf16.msra.mxu0 %v8760_v52 }
0x15a5   : > { %v6319_v19 = vpop.xlane.xlu0 %6318 }
0x15a6   : > { %v6323_v45 = vmul.f32 0.00390625, %v6319_v19 }
0x15a8   : > { %v6325_v20 = vsub.f32 %v6303_v3, %v6323_v45  ;;  %v6326_v21 = vsub.f32 %v6304_v53, %v6323_v45  ;;  %v6353_v53 = vrot.slane %v6315_v44, %v9214_v1 }
0x15a9   : > { %v6322_v17 = vpop.xlane.xlu0 %6321 }
0x15aa   : > { %v6324_v18 = vmul.f32 0.00390625, %v6322_v17  ;;  %v6329_v22 = vmul.f32 %v6325_v20, %v6325_v20  ;;  %v6330_v27 = vmul.f32 %v6326_v21, %v6326_v21 }
0x15ac   : > { %v6327_v28 = vsub.f32 %v6305_v55, %v6324_v18  ;;  %v6328_v23 = vsub.f32 %v6306_v63, %v6324_v18  ;;  %v6333_v24 = vadd.f32 %v6330_v27, %v6329_v22 }
0x15ae   : > { %6334 = vadd.xlane.f32.xlu1 %v6333_v24  ;;  %v6331_v29 = vmul.f32 %v6327_v28, %v6327_v28  ;;  %v6332_v30 = vmul.f32 %v6328_v23, %v6328_v23 }
0x15b0   : > { %v6336_v33 = vadd.f32 %v6332_v30, %v6331_v29 }
0x15b2   : > { %6337 = vadd.xlane.f32.xlu1 %v6336_v33 }
0x163b   : > { %v6335_v56 = vpop.xlane.xlu1 %6334 }
0x163c   : > { %v6339_v39 = vmul.f32 0.00390625, %v6335_v56 }
0x163e   : > { %v6341_v51 = vadd.f32 1e-05, %v6339_v39 }
0x163f   : > { %v6338_v40 = vpop.xlane.xlu1 %6337 }
0x1640   : > { %8761 = vrsqrt.f32 %v6341_v51  ;;  %v6340_v60 = vmul.f32 0.00390625, %v6338_v40 }
0x1642   : > { %v6342_v43 = vadd.f32 1e-05, %v6340_v60 }
0x1644   : > { %8763 = vrsqrt.f32 %v6342_v43 }
0x164a   : > { %v8762_v3 = vpop.eup %8761 }
0x164b   : > { %v6346_v54 = vmul.f32 %v8762_v3, %v6326_v21  ;;  %v6345_v55 = vmul.f32 %v8762_v3, %v6325_v20 }
0x164d   : > { %v6361_v57 = vmul.f32 %v6357_v11, %v6346_v54  ;;  %v6360_v61 = vmul.f32 %v6353_v53, %v6345_v55 }
0x164e   : > { %v8764_v63 = vpop.eup %8763 }
0x164f   : > { %v6348_v49 = vmul.f32 %v8764_v63, %v6328_v23  ;;  %v6347_v59 = vmul.f32 %v8764_v63, %v6327_v28  ;;  %v6376_v7 = vadd.f32 %v6372_v4, %v6361_v57  ;;  %v6375_v9 = vadd.f32 %v6368_v62, %v6360_v61 }
0x1651   : > { %v6363_v5 = vmul.f32 %v6357_v11, %v6348_v49  ;;  %v6362_v6 = vmul.f32 %v6353_v53, %v6347_v59 }
0x1653   : > { %v6378_v8 = vadd.f32 %v6372_v4, %v6363_v5  ;;  %v6377_v10 = vadd.f32 %v6368_v62, %v6362_v6 }
0x1655   : > { %v6380_v12 = vpack.c.bf16 %v6378_v8, %v6376_v7  ;;  %v6379_v42 = vpack.c.bf16 %v6377_v10, %v6375_v9 }
0x1657   : > { %6617 = vmatprep.mubr.bf16.mxu0 %v6380_v12 }
0x1658   : > { %6618 = vmatmul.mubr.bf16.vlgmr.msra.gmra.mrb[0].mxu0 %v6379_v42 }
0x172b   : > { %v6619_v15 = vpop.f32.mrb[0].mxu0 }
0x172c   : > { %v6620_v16 = vadd.f32 %v6619_v15, %v6418_v26  ;;  %v6621_v48 = vpop.f32.mrb[1].mxu0 }
0x172d   : > { %v6622_v19 = vadd.f32 %v6621_v48, %v6422_v14  ;;  %v6623_v45 = vpop.f32.mrb[2].mxu0 }
0x172e   : > { %6628 = vst [vmem:[#allocation6] sm:$0xff] %v6620_v16  ;;  %v6624_v20 = vadd.f32 %v6623_v45, %v6418_v26  ;;  %v6625_v21 = vpop.f32.mrb[3].mxu0 }
0x172f   : > { %6629 = vst [vmem:[#allocation6 + $0x8] sm:$0xff] %v6622_v19  ;;  %v6626_v17 = vadd.f32 %v6625_v21, %v6422_v14 }
0x1730   : > { %6630 = vst [vmem:[#allocation6 + $0x10] sm:$0xff] %v6624_v20 }
0x1731   : > { %6631 = vst [vmem:[#allocation6 + $0x18] sm:$0xff] %v6626_v17 }
0x1732 PF: > { %s10183_s7 = sld [smem:[#allocation12_spill]]  ;;  %s8883_s24 = smov [#allocation6]  }
0x1733   : > { %s6642_s0 = sshll.u32 %s8883_s24, 4  ;;  %s6643_s0 = int_to_ptr.vmem [resolvable:$true] %s6642_s0 }
0x1734   : > { %s8795_s16 = scalar_lea.vmem %s6643_s0, 512  ;;  %p8802_p12 = scmp.lt.s32.totalorder %s6643_s0, %s6643_s0 }
0x1735   : > { %p8796_p6 = scmp.ne.s32.totalorder %s6643_s0, %s8795_s16  ;;  %p8803_p0 = scmp.lt.s32.totalorder %s8795_s16, %s8795_s16 }
0x1737   : > { %p8804_p1 = por %p8803_p0, %p8802_p12 }
0x1738   : > { %s10184_s17 = sadd.s32 4294967295, %s10183_s7  }
0x1739   : > { %p10068_p5 = scmp.eq.s32.totalorder %s10184_s17, 5 }
0x173b   : > { %p8797_p8 = pnand %p8796_p6, %p10068_p5 }
0x173d   : > { %p8798_p10 = pneg %p8797_p8 }
0x173f   : > { %p8805_p2 = pnand %p8804_p1, %p8798_p10 }
0x1741   : > { %8808 = shalt.err (!%p8805_p2)
}
0x1742   : > { %s10186_s30 = sld [smem:[#allocation26_spill]] }
0x1748   : > { %s10187_s19 = smov %s10186_s30  ;;  %s8809_s21 = scalar_lea.hbm %s10186_s30, 512 }
0x1749   : > { %p8810_p11 = scmp.ne.s32.totalorder %s10187_s19, %s8809_s21  ;;  %p8815_p4 = scmp.lt.u32.totalorder %s8809_s21, %s10187_s19 }
0x174b   : > { %p8811_p13 = pnand %p8810_p11, %p10068_p5 }
0x174d   : > { %p8812_p3 = pneg %p8811_p13 }
0x174f   : > { %p8817_p7 = pnand %p8815_p4, %p8812_p3 }
0x1751   : > { %8820 = shalt.err (!%p8817_p7)
}
0x1752   : > { %s8884_s15 = smov 256   ;;  %s8885_s22 = smov 16  }
0x1753   : > { %8170 = dma.vmem_to_hbm [thread:$0]  (%p10068_p5), %s6643_s0, 512, %s10187_s19, [#allocation5], %s8884_s15, %s8884_s15, %s8885_s22  }
0x1754   : > { %8850 = dma.done.wait (%p10068_p5), [#allocation5], 512  }
0x1755   : > { %8852 = vsyncadd (%p10068_p5), [#allocation5], 4294966784 }
0x1756 PF: > { %s10188_s7 = sld [smem:[#allocation12_spill]]  ;;  %s10189_s0 = sld [smem:[#allocation9_spill]] }
0x1757   : > { %s10190_s30 = sld [smem:[#allocation10_spill]]  ;;  %s10191_s20 = sld [smem:[#allocation14_spill]] }
0x1758   : > { %s10192_s21 = sld [smem:[#allocation11_spill]]  ;;  %s10193_s1 = sld [smem:[#allocation13_spill]] }
0x175c   : > { %s33_s22 = sadd.s32 1, %s10188_s7  }
0x175d   : > { %p30_p9 = scmp.ge.s32.totalorder %s33_s22, 8  }
0x175f   :  { %32 = sbr.rel (!%p30_p9) target bundleno = 17 (0x11), region = 193 }
0x1766   :  { %6658 = vsyncpa [#allocation4], 1 }
0x1767   :  { %6660 = vsyncpa [#allocation4 + $0x1], 1 }
0x1768   :  { %6661 = vsyncpa [#allocation5], 1 }
0x1769   :  { %6663 = vsyncpa [#allocation5 + $0x1], 1 }

</bundles_post_ra>
